<compile_context>
chip_gen: v5e
topology: v5e:2x2
jax: 0.10.0
libtpu: 0.0.40
codegen_flags: <defaults>
</compile_context>

<pallas_src>
import jax
import jax.numpy as jnp
from jax.experimental import pallas as pl
from jax.experimental.pallas import tpu as pltpu

NUM_LAYERS = 9
NUM_OPS = 4          # |OPERATIONS|
D = 128              # dim = hidden_dim = out_dim (lane-friendly)

# Candidate-op activations (index == op id, applied after the linear).
ACTS = (
    lambda h: h,           # plain linear
    jax.nn.relu,           # linear + relu
    jnp.tanh,              # linear + tanh
    jax.nn.sigmoid,        # linear + sigmoid
)


def search_cell_kernel(wsm_ref, x_ref, bias_ref, w_hbm, o_ref, wbuf, sem):
    """One batch tile, all 9 MixedOp layers, weights manually double-buffered.

    wsm_ref : SMEM [NUM_LAYERS*NUM_OPS]            softmax(alphas), f32 (flat)
    x_ref   : VMEM [TB, D]                          batch-tile input, f32
    bias_ref: VMEM [NUM_LAYERS, NUM_OPS*D]          fused op biases, f32
    w_hbm   : HBM  [NUM_LAYERS, D, NUM_OPS*D]       fused op weights, bf16
    o_ref   : VMEM [TB, D]                          batch-tile output, f32
    wbuf    : VMEM [2, D, NUM_OPS*D] bf16           weight double buffer
    sem     : DMA semaphores (2,)
    """
    tb = x_ref.shape[0]

    def start_fetch(layer, slot):
        pltpu.make_async_copy(w_hbm.at[layer], wbuf.at[slot], sem.at[slot]).start()

    def wait_fetch(layer, slot):
        pltpu.make_async_copy(w_hbm.at[layer], wbuf.at[slot], sem.at[slot]).wait()

    # Prime the pipeline with layer 0's weights.
    start_fetch(0, 0)

    x = x_ref[...]  # f32 carry, lives in vregs across the unrolled chain

    for layer in range(NUM_LAYERS):            # static unroll (9 layers)
        slot = layer & 1

        # SMEM scalar reads BEFORE the DMA wait (keep sst->sld forwarding).
        op_w = [wsm_ref[layer * NUM_OPS + op] for op in range(NUM_OPS)]
        bvec = bias_ref[layer, :]               # [NUM_OPS*D] f32, lane-dense

        wait_fetch(layer, slot)
        if layer + 1 < NUM_LAYERS:              # prefetch next layer's weights
            start_fetch(layer + 1, 1 - slot)

        # One wide MXU push covers all 4 candidate ops: [TB,D] @ [D, 4*D].
        h = jnp.dot(
            x.astype(jnp.bfloat16),
            wbuf[slot],
            preferred_element_type=jnp.float32,
        )
        h = h + bvec[None, :]                   # single broadcasted f32 add

        acc = jnp.zeros((tb, D), jnp.float32)
        for op in range(NUM_OPS):               # static lane-slices (128-aligned)
            h_op = h[:, op * D:(op + 1) * D]
            acc = acc + op_w[op] * ACTS[op](h_op)
        x = acc

    o_ref[...] = x.astype(o_ref.dtype)


def prepare_params(W, bias):
    """One-time canonical parameter re-layout — run at init, NOT per forward.

    W    : [L, O, D, D] f32  (y = x @ W[l,o] + bias[l,o])
    bias : [L, O, D]    f32
    Returns:
      Wf : [L, D, O*D] bf16   lane-concatenated so h[:, o*D:(o+1)*D] == x @ W[l,o]
      bf : [L, O*D]    f32    lane-dense fused bias
    """
    Wf = jnp.transpose(W, (0, 2, 1, 3)).reshape(NUM_LAYERS, D, NUM_OPS * D)
    Wf = Wf.astype(jnp.bfloat16)                  # halve weight HBM traffic
    bf = bias.reshape(NUM_LAYERS, NUM_OPS * D).astype(jnp.float32)
    return Wf, bf


@jax.jit
def search_cell_forward(x, Wf, bf, alphas):
    """x: [B,D] f32; Wf: [L,D,O*D] bf16; bf: [L,O*D] f32; alphas: [L,O] f32."""
    B = x.shape[0]
    TB = min(B, 128)                 # batch tile: up to 128 MXU rows per step
    assert B % TB == 0, "demo assumes batch divisible by the batch tile"
    nbt = B // TB

    # softmax over ops per layer (tiny 9x4 op -> plain-JAX glue), flat for SMEM.
    wsm = jax.nn.softmax(alphas, axis=1).astype(jnp.float32).reshape(-1)

    flops = nbt * NUM_LAYERS * 2 * TB * D * (NUM_OPS * D)
    transcendentals = nbt * NUM_LAYERS * TB * D * 2          # tanh + sigmoid
    bytes_accessed = (nbt * Wf.size * 2 + 2 * x.size * 4
                      + bf.size * 4 + wsm.size * 4)

    return pl.pallas_call(
        search_cell_kernel,
        out_shape=jax.ShapeDtypeStruct((B, D), jnp.float32),
        grid_spec=pltpu.PrefetchScalarGridSpec(
            num_scalar_prefetch=0,
            grid=(nbt,),                                    # batch tiles
            in_specs=[
                pl.BlockSpec(memory_space=pltpu.MemorySpace.SMEM),   # wsm (flat)
                pl.BlockSpec((TB, D), lambda i: (i, 0)),             # x tile
                pl.BlockSpec(memory_space=pltpu.MemorySpace.VMEM),   # fused bias
                pl.BlockSpec(memory_space=pl.ANY),                   # Wf in HBM
            ],
            out_specs=pl.BlockSpec((TB, D), lambda i: (i, 0)),
            scratch_shapes=[
                pltpu.VMEM((2, D, NUM_OPS * D), jnp.bfloat16),       # W dbl-buf
                pltpu.SemaphoreType.DMA((2,)),
            ],
        ),
        compiler_params=pltpu.CompilerParams(
            dimension_semantics=("parallel",),      # v7x: shard tiles over TCs
        ),
        cost_estimate=pl.CostEstimate(
            flops=flops,
            transcendentals=transcendentals,
            bytes_accessed=bytes_accessed,
        ),
    )(wsm, x.astype(jnp.float32), bf, Wf)


def ref_forward(x, W, bias, alphas):
    """Pure-JAX reference of SearchCell.forward (matching bf16 weight precision)."""
    w = jax.nn.softmax(alphas, axis=1)
    Wb = W.astype(jnp.bfloat16)
    for i in range(NUM_LAYERS):
        xb = x.astype(jnp.bfloat16)
        acc = jnp.zeros_like(x)
        for op in range(NUM_OPS):
            h = jnp.dot(xb, Wb[i, op], preferred_element_type=jnp.float32)
            h = h + bias[i, op]
            acc = acc + w[i, op] * ACTS[op](h)
        x = acc
    return x


if __name__ == "__main__":
    key = jax.random.PRNGKey(0)
    kx, kw, kb = jax.random.split(key, 3)

    B = 8  # sublane-friendly demo batch
    x = jax.random.normal(kx, (B, D), dtype=jnp.float32)
    W = jax.random.normal(kw, (NUM_LAYERS, NUM_OPS, D, D), dtype=jnp.float32) * 0.05
    bias = jax.random.normal(kb, (NUM_LAYERS, NUM_OPS, D), dtype=jnp.float32) * 0.01
    alphas = jnp.zeros((NUM_LAYERS, NUM_OPS), dtype=jnp.float32)  # as in __init__

    # One-time canonical layout: stored parameters, outside the jitted hot path.
    Wf, bf = jax.block_until_ready(prepare_params(W, bias))

    out = search_cell_forward(x, Wf, bf, alphas)
    out = jax.block_until_ready(out)

    ref = ref_forward(x, W, bias, alphas)
    assert out.shape == (B, D)
    assert jnp.allclose(out, ref, atol=1e-3, rtol=1e-3), "mismatch vs reference"

    print("KERNEL_OK")
</pallas_src>

<mosaic_0001>
module attributes {stable_mosaic.version = 11 : i64} {
  func.func @search_cell_kernel(%arg0: i32, %arg1: memref<36xf32, #tpu.memory_space<smem>>, %arg2: memref<8x128xf32, #tpu.memory_space<vmem>>, %arg3: memref<9x512xf32, #tpu.memory_space<vmem>>, %arg4: memref<9x128x512xbf16, #tpu.memory_space<any>>, %arg5: memref<8x128xf32, #tpu.memory_space<vmem>>, %arg6: memref<2x128x512xbf16, #tpu.memory_space<vmem>>, %arg7: memref<2x!tpu.dma_semaphore, #tpu.memory_space<semaphore_mem>>) attributes {dimension_semantics = [#tpu.dimension_semantics<parallel>], iteration_bounds = array<i64: 1>, scalar_prefetch = 0 : i64, scratch_operands = 2 : i64, tpu.core_type = #tpu.core_type<tc>, window_params = [{transform_indices = @transform_0, window_bounds = array<i64: 36>}, {transform_indices = @transform_1, window_bounds = array<i64: 8, 128>}, {pipeline_mode = #tpu.pipeline_mode<synchronous>, transform_indices = @transform_2, window_bounds = array<i64: 9, 512>}, {}, {transform_indices = @transform_4, window_bounds = array<i64: 8, 128>}]} {
    %c0_i32 = arith.constant 0 : i32
    %c0_i32_0 = arith.constant 0 : i32
    %c0_i32_1 = arith.constant 0 : i32
    %c0_i32_2 = arith.constant 0 : i32
    %c0_i32_3 = arith.constant 0 : i32
    %0 = tpu.memref_slice %arg4[%c0_i32, %c0_i32_2, %c0_i32_3] : memref<9x128x512xbf16, #tpu.memory_space<any>> -> memref<1x128x512xbf16, #tpu.memory_space<any>>
    %1 = tpu.memref_squeeze %0 : memref<1x128x512xbf16, #tpu.memory_space<any>> -> memref<128x512xbf16, #tpu.memory_space<any>>
    %c0_i32_4 = arith.constant 0 : i32
    %c0_i32_5 = arith.constant 0 : i32
    %2 = tpu.memref_slice %arg6[%c0_i32_0, %c0_i32_4, %c0_i32_5] : memref<2x128x512xbf16, #tpu.memory_space<vmem>> -> memref<1x128x512xbf16, #tpu.memory_space<vmem>>
    %3 = tpu.memref_squeeze %2 : memref<1x128x512xbf16, #tpu.memory_space<vmem>> -> memref<128x512xbf16, #tpu.memory_space<vmem>>
    %4 = tpu.memref_slice %arg7[%c0_i32_1] : memref<2x!tpu.dma_semaphore, #tpu.memory_space<semaphore_mem>> -> memref<1x!tpu.dma_semaphore, #tpu.memory_space<semaphore_mem>>
    %5 = tpu.memref_squeeze %4 : memref<1x!tpu.dma_semaphore, #tpu.memory_space<semaphore_mem>> -> memref<!tpu.dma_semaphore, #tpu.memory_space<semaphore_mem>>
    tpu.enqueue_dma source(%1 : memref<128x512xbf16, #tpu.memory_space<any>>) target(%3 : memref<128x512xbf16, #tpu.memory_space<vmem>>) target_semaphore(%5 : memref<!tpu.dma_semaphore, #tpu.memory_space<semaphore_mem>>)
    %c0 = arith.constant 0 : index
    %c0_6 = arith.constant 0 : index
    %6 = vector.load %arg2[%c0, %c0_6] : memref<8x128xf32, #tpu.memory_space<vmem>>, vector<8x128xf32>
    %c0_7 = arith.constant 0 : index
    %7 = memref.load %arg1[%c0_7] : memref<36xf32, #tpu.memory_space<smem>>
    %c1 = arith.constant 1 : index
    %8 = memref.load %arg1[%c1] : memref<36xf32, #tpu.memory_space<smem>>
    %c2 = arith.constant 2 : index
    %9 = memref.load %arg1[%c2] : memref<36xf32, #tpu.memory_space<smem>>
    %c3 = arith.constant 3 : index
    %10 = memref.load %arg1[%c3] : memref<36xf32, #tpu.memory_space<smem>>
    %c0_8 = arith.constant 0 : index
    %c0_9 = arith.constant 0 : index
    %11 = vector.load %arg3[%c0_8, %c0_9] : memref<9x512xf32, #tpu.memory_space<vmem>>, vector<1x512xf32>
    %12 = vector.shape_cast %11 : vector<1x512xf32> to vector<512xf32>
    %c0_i32_10 = arith.constant 0 : i32
    %c0_i32_11 = arith.constant 0 : i32
    %c0_i32_12 = arith.constant 0 : i32
    %c0_i32_13 = arith.constant 0 : i32
    %c0_i32_14 = arith.constant 0 : i32
    %13 = tpu.memref_slice %arg4[%c0_i32_10, %c0_i32_13, %c0_i32_14] : memref<9x128x512xbf16, #tpu.memory_space<any>> -> memref<1x128x512xbf16, #tpu.memory_space<any>>
    %14 = tpu.memref_squeeze %13 : memref<1x128x512xbf16, #tpu.memory_space<any>> -> memref<128x512xbf16, #tpu.memory_space<any>>
    %c0_i32_15 = arith.constant 0 : i32
    %c0_i32_16 = arith.constant 0 : i32
    %15 = tpu.memref_slice %arg6[%c0_i32_11, %c0_i32_15, %c0_i32_16] : memref<2x128x512xbf16, #tpu.memory_space<vmem>> -> memref<1x128x512xbf16, #tpu.memory_space<vmem>>
    %16 = tpu.memref_squeeze %15 : memref<1x128x512xbf16, #tpu.memory_space<vmem>> -> memref<128x512xbf16, #tpu.memory_space<vmem>>
    %17 = tpu.memref_slice %arg7[%c0_i32_12] : memref<2x!tpu.dma_semaphore, #tpu.memory_space<semaphore_mem>> -> memref<1x!tpu.dma_semaphore, #tpu.memory_space<semaphore_mem>>
    %18 = tpu.memref_squeeze %17 : memref<1x!tpu.dma_semaphore, #tpu.memory_space<semaphore_mem>> -> memref<!tpu.dma_semaphore, #tpu.memory_space<semaphore_mem>>
    tpu.wait_dma2 semaphore(%18 : memref<!tpu.dma_semaphore, #tpu.memory_space<semaphore_mem>>) src(%14 : memref<128x512xbf16, #tpu.memory_space<any>>) dst(%16 : memref<128x512xbf16, #tpu.memory_space<vmem>>)
    %c1_i32 = arith.constant 1 : i32
    %c1_i32_17 = arith.constant 1 : i32
    %c1_i32_18 = arith.constant 1 : i32
    %c0_i32_19 = arith.constant 0 : i32
    %c0_i32_20 = arith.constant 0 : i32
    %19 = tpu.memref_slice %arg4[%c1_i32, %c0_i32_19, %c0_i32_20] : memref<9x128x512xbf16, #tpu.memory_space<any>> -> memref<1x128x512xbf16, #tpu.memory_space<any>>
    %20 = tpu.memref_squeeze %19 : memref<1x128x512xbf16, #tpu.memory_space<any>> -> memref<128x512xbf16, #tpu.memory_space<any>>
    %c0_i32_21 = arith.constant 0 : i32
    %c0_i32_22 = arith.constant 0 : i32
    %21 = tpu.memref_slice %arg6[%c1_i32_17, %c0_i32_21, %c0_i32_22] : memref<2x128x512xbf16, #tpu.memory_space<vmem>> -> memref<1x128x512xbf16, #tpu.memory_space<vmem>>
    %22 = tpu.memref_squeeze %21 : memref<1x128x512xbf16, #tpu.memory_space<vmem>> -> memref<128x512xbf16, #tpu.memory_space<vmem>>
    %23 = tpu.memref_slice %arg7[%c1_i32_18] : memref<2x!tpu.dma_semaphore, #tpu.memory_space<semaphore_mem>> -> memref<1x!tpu.dma_semaphore, #tpu.memory_space<semaphore_mem>>
    %24 = tpu.memref_squeeze %23 : memref<1x!tpu.dma_semaphore, #tpu.memory_space<semaphore_mem>> -> memref<!tpu.dma_semaphore, #tpu.memory_space<semaphore_mem>>
    tpu.enqueue_dma source(%20 : memref<128x512xbf16, #tpu.memory_space<any>>) target(%22 : memref<128x512xbf16, #tpu.memory_space<vmem>>) target_semaphore(%24 : memref<!tpu.dma_semaphore, #tpu.memory_space<semaphore_mem>>)
    %25 = arith.truncf %6 : vector<8x128xf32> to vector<8x128xbf16>
    %c0_23 = arith.constant 0 : index
    %c0_24 = arith.constant 0 : index
    %c0_25 = arith.constant 0 : index
    %26 = vector.load %arg6[%c0_23, %c0_24, %c0_25] : memref<2x128x512xbf16, #tpu.memory_space<vmem>>, vector<1x128x512xbf16>
    %27 = vector.shape_cast %26 : vector<1x128x512xbf16> to vector<128x512xbf16>
    %cst = arith.constant dense<0.000000e+00> : vector<8x512xf32>
    %28 = tpu.matmul %25, %27, %cst {dimension_numbers = #tpu.dot_dimension_numbers<[1], [0], [0], [1], [0, 0, 1, 1], [], []>} : vector<8x128xbf16>, vector<128x512xbf16>, vector<8x512xf32> -> vector<8x512xf32>
    %29 = vector.shape_cast %12 : vector<512xf32> to vector<1x512xf32>
    %30 = vector.broadcast %29 : vector<1x512xf32> to vector<8x512xf32>
    %31 = arith.addf %28, %30 : vector<8x512xf32>
    %cst_26 = arith.constant 0.000000e+00 : f32
    %32 = vector.broadcast %cst_26 : f32 to vector<8x128xf32>
    %33 = vector.extract_strided_slice %31 {offsets = [0, 0], sizes = [8, 128], strides = [1, 1]} : vector<8x512xf32> to vector<8x128xf32>
    %34 = vector.broadcast %7 : f32 to vector<8x128xf32>
    %35 = arith.mulf %34, %33 : vector<8x128xf32>
    %36 = arith.addf %32, %35 : vector<8x128xf32>
    %37 = vector.extract_strided_slice %31 {offsets = [0, 128], sizes = [8, 128], strides = [1, 1]} : vector<8x512xf32> to vector<8x128xf32>
    %cst_27 = arith.constant 0.000000e+00 : f32
    %38 = vector.broadcast %cst_27 : f32 to vector<8x128xf32>
    %39 = arith.maximumf %37, %38 : vector<8x128xf32>
    %40 = vector.broadcast %8 : f32 to vector<8x128xf32>
    %41 = arith.mulf %40, %39 : vector<8x128xf32>
    %42 = arith.addf %36, %41 : vector<8x128xf32>
    %43 = vector.extract_strided_slice %31 {offsets = [0, 256], sizes = [8, 128], strides = [1, 1]} : vector<8x512xf32> to vector<8x128xf32>
    %44 = math.tanh %43 : vector<8x128xf32>
    %45 = vector.broadcast %9 : f32 to vector<8x128xf32>
    %46 = arith.mulf %45, %44 : vector<8x128xf32>
    %47 = arith.addf %42, %46 : vector<8x128xf32>
    %48 = vector.extract_strided_slice %31 {offsets = [0, 384], sizes = [8, 128], strides = [1, 1]} : vector<8x512xf32> to vector<8x128xf32>
    %49 = arith.negf %48 : vector<8x128xf32>
    %50 = math.exp %49 : vector<8x128xf32>
    %cst_28 = arith.constant 1.000000e+00 : f32
    %51 = vector.broadcast %cst_28 : f32 to vector<8x128xf32>
    %52 = arith.addf %51, %50 : vector<8x128xf32>
    %53 = arith.divf %51, %52 : vector<8x128xf32>
    %54 = vector.broadcast %10 : f32 to vector<8x128xf32>
    %55 = arith.mulf %54, %53 : vector<8x128xf32>
    %56 = arith.addf %47, %55 : vector<8x128xf32>
    %c4 = arith.constant 4 : index
    %57 = memref.load %arg1[%c4] : memref<36xf32, #tpu.memory_space<smem>>
    %c5 = arith.constant 5 : index
    %58 = memref.load %arg1[%c5] : memref<36xf32, #tpu.memory_space<smem>>
    %c6 = arith.constant 6 : index
    %59 = memref.load %arg1[%c6] : memref<36xf32, #tpu.memory_space<smem>>
    %c7 = arith.constant 7 : index
    %60 = memref.load %arg1[%c7] : memref<36xf32, #tpu.memory_space<smem>>
    %c1_29 = arith.constant 1 : index
    %c0_30 = arith.constant 0 : index
    %61 = vector.load %arg3[%c1_29, %c0_30] : memref<9x512xf32, #tpu.memory_space<vmem>>, vector<1x512xf32>
    %62 = vector.shape_cast %61 : vector<1x512xf32> to vector<512xf32>
    %c1_i32_31 = arith.constant 1 : i32
    %c1_i32_32 = arith.constant 1 : i32
    %c1_i32_33 = arith.constant 1 : i32
    %c0_i32_34 = arith.constant 0 : i32
    %c0_i32_35 = arith.constant 0 : i32
    %63 = tpu.memref_slice %arg4[%c1_i32_31, %c0_i32_34, %c0_i32_35] : memref<9x128x512xbf16, #tpu.memory_space<any>> -> memref<1x128x512xbf16, #tpu.memory_space<any>>
    %64 = tpu.memref_squeeze %63 : memref<1x128x512xbf16, #tpu.memory_space<any>> -> memref<128x512xbf16, #tpu.memory_space<any>>
    %c0_i32_36 = arith.constant 0 : i32
    %c0_i32_37 = arith.constant 0 : i32
    %65 = tpu.memref_slice %arg6[%c1_i32_32, %c0_i32_36, %c0_i32_37] : memref<2x128x512xbf16, #tpu.memory_space<vmem>> -> memref<1x128x512xbf16, #tpu.memory_space<vmem>>
    %66 = tpu.memref_squeeze %65 : memref<1x128x512xbf16, #tpu.memory_space<vmem>> -> memref<128x512xbf16, #tpu.memory_space<vmem>>
    %67 = tpu.memref_slice %arg7[%c1_i32_33] : memref<2x!tpu.dma_semaphore, #tpu.memory_space<semaphore_mem>> -> memref<1x!tpu.dma_semaphore, #tpu.memory_space<semaphore_mem>>
    %68 = tpu.memref_squeeze %67 : memref<1x!tpu.dma_semaphore, #tpu.memory_space<semaphore_mem>> -> memref<!tpu.dma_semaphore, #tpu.memory_space<semaphore_mem>>
    tpu.wait_dma2 semaphore(%68 : memref<!tpu.dma_semaphore, #tpu.memory_space<semaphore_mem>>) src(%64 : memref<128x512xbf16, #tpu.memory_space<any>>) dst(%66 : memref<128x512xbf16, #tpu.memory_space<vmem>>)
    %c2_i32 = arith.constant 2 : i32
    %c0_i32_38 = arith.constant 0 : i32
    %c0_i32_39 = arith.constant 0 : i32
    %c0_i32_40 = arith.constant 0 : i32
    %c0_i32_41 = arith.constant 0 : i32
    %69 = tpu.memref_slice %arg4[%c2_i32, %c0_i32_40, %c0_i32_41] : memref<9x128x512xbf16, #tpu.memory_space<any>> -> memref<1x128x512xbf16, #tpu.memory_space<any>>
    %70 = tpu.memref_squeeze %69 : memref<1x128x512xbf16, #tpu.memory_space<any>> -> memref<128x512xbf16, #tpu.memory_space<any>>
    %c0_i32_42 = arith.constant 0 : i32
    %c0_i32_43 = arith.constant 0 : i32
    %71 = tpu.memref_slice %arg6[%c0_i32_38, %c0_i32_42, %c0_i32_43] : memref<2x128x512xbf16, #tpu.memory_space<vmem>> -> memref<1x128x512xbf16, #tpu.memory_space<vmem>>
    %72 = tpu.memref_squeeze %71 : memref<1x128x512xbf16, #tpu.memory_space<vmem>> -> memref<128x512xbf16, #tpu.memory_space<vmem>>
    %73 = tpu.memref_slice %arg7[%c0_i32_39] : memref<2x!tpu.dma_semaphore, #tpu.memory_space<semaphore_mem>> -> memref<1x!tpu.dma_semaphore, #tpu.memory_space<semaphore_mem>>
    %74 = tpu.memref_squeeze %73 : memref<1x!tpu.dma_semaphore, #tpu.memory_space<semaphore_mem>> -> memref<!tpu.dma_semaphore, #tpu.memory_space<semaphore_mem>>
    tpu.enqueue_dma source(%70 : memref<128x512xbf16, #tpu.memory_space<any>>) target(%72 : memref<128x512xbf16, #tpu.memory_space<vmem>>) target_semaphore(%74 : memref<!tpu.dma_semaphore, #tpu.memory_space<semaphore_mem>>)
    %75 = arith.truncf %56 : vector<8x128xf32> to vector<8x128xbf16>
    %c1_44 = arith.constant 1 : index
    %c0_45 = arith.constant 0 : index
    %c0_46 = arith.constant 0 : index
    %76 = vector.load %arg6[%c1_44, %c0_45, %c0_46] : memref<2x128x512xbf16, #tpu.memory_space<vmem>>, vector<1x128x512xbf16>
    %77 = vector.shape_cast %76 : vector<1x128x512xbf16> to vector<128x512xbf16>
    %cst_47 = arith.constant dense<0.000000e+00> : vector<8x512xf32>
    %78 = tpu.matmul %75, %77, %cst_47 {dimension_numbers = #tpu.dot_dimension_numbers<[1], [0], [0], [1], [0, 0, 1, 1], [], []>} : vector<8x128xbf16>, vector<128x512xbf16>, vector<8x512xf32> -> vector<8x512xf32>
    %79 = vector.shape_cast %62 : vector<512xf32> to vector<1x512xf32>
    %80 = vector.broadcast %79 : vector<1x512xf32> to vector<8x512xf32>
    %81 = arith.addf %78, %80 : vector<8x512xf32>
    %cst_48 = arith.constant 0.000000e+00 : f32
    %82 = vector.broadcast %cst_48 : f32 to vector<8x128xf32>
    %83 = vector.extract_strided_slice %81 {offsets = [0, 0], sizes = [8, 128], strides = [1, 1]} : vector<8x512xf32> to vector<8x128xf32>
    %84 = vector.broadcast %57 : f32 to vector<8x128xf32>
    %85 = arith.mulf %84, %83 : vector<8x128xf32>
    %86 = arith.addf %82, %85 : vector<8x128xf32>
    %87 = vector.extract_strided_slice %81 {offsets = [0, 128], sizes = [8, 128], strides = [1, 1]} : vector<8x512xf32> to vector<8x128xf32>
    %cst_49 = arith.constant 0.000000e+00 : f32
    %88 = vector.broadcast %cst_49 : f32 to vector<8x128xf32>
    %89 = arith.maximumf %87, %88 : vector<8x128xf32>
    %90 = vector.broadcast %58 : f32 to vector<8x128xf32>
    %91 = arith.mulf %90, %89 : vector<8x128xf32>
    %92 = arith.addf %86, %91 : vector<8x128xf32>
    %93 = vector.extract_strided_slice %81 {offsets = [0, 256], sizes = [8, 128], strides = [1, 1]} : vector<8x512xf32> to vector<8x128xf32>
    %94 = math.tanh %93 : vector<8x128xf32>
    %95 = vector.broadcast %59 : f32 to vector<8x128xf32>
    %96 = arith.mulf %95, %94 : vector<8x128xf32>
    %97 = arith.addf %92, %96 : vector<8x128xf32>
    %98 = vector.extract_strided_slice %81 {offsets = [0, 384], sizes = [8, 128], strides = [1, 1]} : vector<8x512xf32> to vector<8x128xf32>
    %99 = arith.negf %98 : vector<8x128xf32>
    %100 = math.exp %99 : vector<8x128xf32>
    %cst_50 = arith.constant 1.000000e+00 : f32
    %101 = vector.broadcast %cst_50 : f32 to vector<8x128xf32>
    %102 = arith.addf %101, %100 : vector<8x128xf32>
    %103 = arith.divf %101, %102 : vector<8x128xf32>
    %104 = vector.broadcast %60 : f32 to vector<8x128xf32>
    %105 = arith.mulf %104, %103 : vector<8x128xf32>
    %106 = arith.addf %97, %105 : vector<8x128xf32>
    %c8 = arith.constant 8 : index
    %107 = memref.load %arg1[%c8] : memref<36xf32, #tpu.memory_space<smem>>
    %c9 = arith.constant 9 : index
    %108 = memref.load %arg1[%c9] : memref<36xf32, #tpu.memory_space<smem>>
    %c10 = arith.constant 10 : index
    %109 = memref.load %arg1[%c10] : memref<36xf32, #tpu.memory_space<smem>>
    %c11 = arith.constant 11 : index
    %110 = memref.load %arg1[%c11] : memref<36xf32, #tpu.memory_space<smem>>
    %c2_51 = arith.constant 2 : index
    %c0_52 = arith.constant 0 : index
    %111 = vector.load %arg3[%c2_51, %c0_52] : memref<9x512xf32, #tpu.memory_space<vmem>>, vector<1x512xf32>
    %112 = vector.shape_cast %111 : vector<1x512xf32> to vector<512xf32>
    %c2_i32_53 = arith.constant 2 : i32
    %c0_i32_54 = arith.constant 0 : i32
    %c0_i32_55 = arith.constant 0 : i32
    %c0_i32_56 = arith.constant 0 : i32
    %c0_i32_57 = arith.constant 0 : i32
    %113 = tpu.memref_slice %arg4[%c2_i32_53, %c0_i32_56, %c0_i32_57] : memref<9x128x512xbf16, #tpu.memory_space<any>> -> memref<1x128x512xbf16, #tpu.memory_space<any>>
    %114 = tpu.memref_squeeze %113 : memref<1x128x512xbf16, #tpu.memory_space<any>> -> memref<128x512xbf16, #tpu.memory_space<any>>
    %c0_i32_58 = arith.constant 0 : i32
    %c0_i32_59 = arith.constant 0 : i32
    %115 = tpu.memref_slice %arg6[%c0_i32_54, %c0_i32_58, %c0_i32_59] : memref<2x128x512xbf16, #tpu.memory_space<vmem>> -> memref<1x128x512xbf16, #tpu.memory_space<vmem>>
    %116 = tpu.memref_squeeze %115 : memref<1x128x512xbf16, #tpu.memory_space<vmem>> -> memref<128x512xbf16, #tpu.memory_space<vmem>>
    %117 = tpu.memref_slice %arg7[%c0_i32_55] : memref<2x!tpu.dma_semaphore, #tpu.memory_space<semaphore_mem>> -> memref<1x!tpu.dma_semaphore, #tpu.memory_space<semaphore_mem>>
    %118 = tpu.memref_squeeze %117 : memref<1x!tpu.dma_semaphore, #tpu.memory_space<semaphore_mem>> -> memref<!tpu.dma_semaphore, #tpu.memory_space<semaphore_mem>>
    tpu.wait_dma2 semaphore(%118 : memref<!tpu.dma_semaphore, #tpu.memory_space<semaphore_mem>>) src(%114 : memref<128x512xbf16, #tpu.memory_space<any>>) dst(%116 : memref<128x512xbf16, #tpu.memory_space<vmem>>)
    %c3_i32 = arith.constant 3 : i32
    %c1_i32_60 = arith.constant 1 : i32
    %c1_i32_61 = arith.constant 1 : i32
    %c0_i32_62 = arith.constant 0 : i32
    %c0_i32_63 = arith.constant 0 : i32
    %119 = tpu.memref_slice %arg4[%c3_i32, %c0_i32_62, %c0_i32_63] : memref<9x128x512xbf16, #tpu.memory_space<any>> -> memref<1x128x512xbf16, #tpu.memory_space<any>>
    %120 = tpu.memref_squeeze %119 : memref<1x128x512xbf16, #tpu.memory_space<any>> -> memref<128x512xbf16, #tpu.memory_space<any>>
    %c0_i32_64 = arith.constant 0 : i32
    %c0_i32_65 = arith.constant 0 : i32
    %121 = tpu.memref_slice %arg6[%c1_i32_60, %c0_i32_64, %c0_i32_65] : memref<2x128x512xbf16, #tpu.memory_space<vmem>> -> memref<1x128x512xbf16, #tpu.memory_space<vmem>>
    %122 = tpu.memref_squeeze %121 : memref<1x128x512xbf16, #tpu.memory_space<vmem>> -> memref<128x512xbf16, #tpu.memory_space<vmem>>
    %123 = tpu.memref_slice %arg7[%c1_i32_61] : memref<2x!tpu.dma_semaphore, #tpu.memory_space<semaphore_mem>> -> memref<1x!tpu.dma_semaphore, #tpu.memory_space<semaphore_mem>>
    %124 = tpu.memref_squeeze %123 : memref<1x!tpu.dma_semaphore, #tpu.memory_space<semaphore_mem>> -> memref<!tpu.dma_semaphore, #tpu.memory_space<semaphore_mem>>
    tpu.enqueue_dma source(%120 : memref<128x512xbf16, #tpu.memory_space<any>>) target(%122 : memref<128x512xbf16, #tpu.memory_space<vmem>>) target_semaphore(%124 : memref<!tpu.dma_semaphore, #tpu.memory_space<semaphore_mem>>)
    %125 = arith.truncf %106 : vector<8x128xf32> to vector<8x128xbf16>
    %c0_66 = arith.constant 0 : index
    %c0_67 = arith.constant 0 : index
    %c0_68 = arith.constant 0 : index
    %126 = vector.load %arg6[%c0_66, %c0_67, %c0_68] : memref<2x128x512xbf16, #tpu.memory_space<vmem>>, vector<1x128x512xbf16>
    %127 = vector.shape_cast %126 : vector<1x128x512xbf16> to vector<128x512xbf16>
    %cst_69 = arith.constant dense<0.000000e+00> : vector<8x512xf32>
    %128 = tpu.matmul %125, %127, %cst_69 {dimension_numbers = #tpu.dot_dimension_numbers<[1], [0], [0], [1], [0, 0, 1, 1], [], []>} : vector<8x128xbf16>, vector<128x512xbf16>, vector<8x512xf32> -> vector<8x512xf32>
    %129 = vector.shape_cast %112 : vector<512xf32> to vector<1x512xf32>
    %130 = vector.broadcast %129 : vector<1x512xf32> to vector<8x512xf32>
    %131 = arith.addf %128, %130 : vector<8x512xf32>
    %cst_70 = arith.constant 0.000000e+00 : f32
    %132 = vector.broadcast %cst_70 : f32 to vector<8x128xf32>
    %133 = vector.extract_strided_slice %131 {offsets = [0, 0], sizes = [8, 128], strides = [1, 1]} : vector<8x512xf32> to vector<8x128xf32>
    %134 = vector.broadcast %107 : f32 to vector<8x128xf32>
    %135 = arith.mulf %134, %133 : vector<8x128xf32>
    %136 = arith.addf %132, %135 : vector<8x128xf32>
    %137 = vector.extract_strided_slice %131 {offsets = [0, 128], sizes = [8, 128], strides = [1, 1]} : vector<8x512xf32> to vector<8x128xf32>
    %cst_71 = arith.constant 0.000000e+00 : f32
    %138 = vector.broadcast %cst_71 : f32 to vector<8x128xf32>
    %139 = arith.maximumf %137, %138 : vector<8x128xf32>
    %140 = vector.broadcast %108 : f32 to vector<8x128xf32>
    %141 = arith.mulf %140, %139 : vector<8x128xf32>
    %142 = arith.addf %136, %141 : vector<8x128xf32>
    %143 = vector.extract_strided_slice %131 {offsets = [0, 256], sizes = [8, 128], strides = [1, 1]} : vector<8x512xf32> to vector<8x128xf32>
    %144 = math.tanh %143 : vector<8x128xf32>
    %145 = vector.broadcast %109 : f32 to vector<8x128xf32>
    %146 = arith.mulf %145, %144 : vector<8x128xf32>
    %147 = arith.addf %142, %146 : vector<8x128xf32>
    %148 = vector.extract_strided_slice %131 {offsets = [0, 384], sizes = [8, 128], strides = [1, 1]} : vector<8x512xf32> to vector<8x128xf32>
    %149 = arith.negf %148 : vector<8x128xf32>
    %150 = math.exp %149 : vector<8x128xf32>
    %cst_72 = arith.constant 1.000000e+00 : f32
    %151 = vector.broadcast %cst_72 : f32 to vector<8x128xf32>
    %152 = arith.addf %151, %150 : vector<8x128xf32>
    %153 = arith.divf %151, %152 : vector<8x128xf32>
    %154 = vector.broadcast %110 : f32 to vector<8x128xf32>
    %155 = arith.mulf %154, %153 : vector<8x128xf32>
    %156 = arith.addf %147, %155 : vector<8x128xf32>
    %c12 = arith.constant 12 : index
    %157 = memref.load %arg1[%c12] : memref<36xf32, #tpu.memory_space<smem>>
    %c13 = arith.constant 13 : index
    %158 = memref.load %arg1[%c13] : memref<36xf32, #tpu.memory_space<smem>>
    %c14 = arith.constant 14 : index
    %159 = memref.load %arg1[%c14] : memref<36xf32, #tpu.memory_space<smem>>
    %c15 = arith.constant 15 : index
    %160 = memref.load %arg1[%c15] : memref<36xf32, #tpu.memory_space<smem>>
    %c3_73 = arith.constant 3 : index
    %c0_74 = arith.constant 0 : index
    %161 = vector.load %arg3[%c3_73, %c0_74] : memref<9x512xf32, #tpu.memory_space<vmem>>, vector<1x512xf32>
    %162 = vector.shape_cast %161 : vector<1x512xf32> to vector<512xf32>
    %c3_i32_75 = arith.constant 3 : i32
    %c1_i32_76 = arith.constant 1 : i32
    %c1_i32_77 = arith.constant 1 : i32
    %c0_i32_78 = arith.constant 0 : i32
    %c0_i32_79 = arith.constant 0 : i32
    %163 = tpu.memref_slice %arg4[%c3_i32_75, %c0_i32_78, %c0_i32_79] : memref<9x128x512xbf16, #tpu.memory_space<any>> -> memref<1x128x512xbf16, #tpu.memory_space<any>>
    %164 = tpu.memref_squeeze %163 : memref<1x128x512xbf16, #tpu.memory_space<any>> -> memref<128x512xbf16, #tpu.memory_space<any>>
    %c0_i32_80 = arith.constant 0 : i32
    %c0_i32_81 = arith.constant 0 : i32
    %165 = tpu.memref_slice %arg6[%c1_i32_76, %c0_i32_80, %c0_i32_81] : memref<2x128x512xbf16, #tpu.memory_space<vmem>> -> memref<1x128x512xbf16, #tpu.memory_space<vmem>>
    %166 = tpu.memref_squeeze %165 : memref<1x128x512xbf16, #tpu.memory_space<vmem>> -> memref<128x512xbf16, #tpu.memory_space<vmem>>
    %167 = tpu.memref_slice %arg7[%c1_i32_77] : memref<2x!tpu.dma_semaphore, #tpu.memory_space<semaphore_mem>> -> memref<1x!tpu.dma_semaphore, #tpu.memory_space<semaphore_mem>>
    %168 = tpu.memref_squeeze %167 : memref<1x!tpu.dma_semaphore, #tpu.memory_space<semaphore_mem>> -> memref<!tpu.dma_semaphore, #tpu.memory_space<semaphore_mem>>
    tpu.wait_dma2 semaphore(%168 : memref<!tpu.dma_semaphore, #tpu.memory_space<semaphore_mem>>) src(%164 : memref<128x512xbf16, #tpu.memory_space<any>>) dst(%166 : memref<128x512xbf16, #tpu.memory_space<vmem>>)
    %c4_i32 = arith.constant 4 : i32
    %c0_i32_82 = arith.constant 0 : i32
    %c0_i32_83 = arith.constant 0 : i32
    %c0_i32_84 = arith.constant 0 : i32
    %c0_i32_85 = arith.constant 0 : i32
    %169 = tpu.memref_slice %arg4[%c4_i32, %c0_i32_84, %c0_i32_85] : memref<9x128x512xbf16, #tpu.memory_space<any>> -> memref<1x128x512xbf16, #tpu.memory_space<any>>
    %170 = tpu.memref_squeeze %169 : memref<1x128x512xbf16, #tpu.memory_space<any>> -> memref<128x512xbf16, #tpu.memory_space<any>>
    %c0_i32_86 = arith.constant 0 : i32
    %c0_i32_87 = arith.constant 0 : i32
    %171 = tpu.memref_slice %arg6[%c0_i32_82, %c0_i32_86, %c0_i32_87] : memref<2x128x512xbf16, #tpu.memory_space<vmem>> -> memref<1x128x512xbf16, #tpu.memory_space<vmem>>
    %172 = tpu.memref_squeeze %171 : memref<1x128x512xbf16, #tpu.memory_space<vmem>> -> memref<128x512xbf16, #tpu.memory_space<vmem>>
    %173 = tpu.memref_slice %arg7[%c0_i32_83] : memref<2x!tpu.dma_semaphore, #tpu.memory_space<semaphore_mem>> -> memref<1x!tpu.dma_semaphore, #tpu.memory_space<semaphore_mem>>
    %174 = tpu.memref_squeeze %173 : memref<1x!tpu.dma_semaphore, #tpu.memory_space<semaphore_mem>> -> memref<!tpu.dma_semaphore, #tpu.memory_space<semaphore_mem>>
    tpu.enqueue_dma source(%170 : memref<128x512xbf16, #tpu.memory_space<any>>) target(%172 : memref<128x512xbf16, #tpu.memory_space<vmem>>) target_semaphore(%174 : memref<!tpu.dma_semaphore, #tpu.memory_space<semaphore_mem>>)
    %175 = arith.truncf %156 : vector<8x128xf32> to vector<8x128xbf16>
    %c1_88 = arith.constant 1 : index
    %c0_89 = arith.constant 0 : index
    %c0_90 = arith.constant 0 : index
    %176 = vector.load %arg6[%c1_88, %c0_89, %c0_90] : memref<2x128x512xbf16, #tpu.memory_space<vmem>>, vector<1x128x512xbf16>
    %177 = vector.shape_cast %176 : vector<1x128x512xbf16> to vector<128x512xbf16>
    %cst_91 = arith.constant dense<0.000000e+00> : vector<8x512xf32>
    %178 = tpu.matmul %175, %177, %cst_91 {dimension_numbers = #tpu.dot_dimension_numbers<[1], [0], [0], [1], [0, 0, 1, 1], [], []>} : vector<8x128xbf16>, vector<128x512xbf16>, vector<8x512xf32> -> vector<8x512xf32>
    %179 = vector.shape_cast %162 : vector<512xf32> to vector<1x512xf32>
    %180 = vector.broadcast %179 : vector<1x512xf32> to vector<8x512xf32>
    %181 = arith.addf %178, %180 : vector<8x512xf32>
    %cst_92 = arith.constant 0.000000e+00 : f32
    %182 = vector.broadcast %cst_92 : f32 to vector<8x128xf32>
    %183 = vector.extract_strided_slice %181 {offsets = [0, 0], sizes = [8, 128], strides = [1, 1]} : vector<8x512xf32> to vector<8x128xf32>
    %184 = vector.broadcast %157 : f32 to vector<8x128xf32>
    %185 = arith.mulf %184, %183 : vector<8x128xf32>
    %186 = arith.addf %182, %185 : vector<8x128xf32>
    %187 = vector.extract_strided_slice %181 {offsets = [0, 128], sizes = [8, 128], strides = [1, 1]} : vector<8x512xf32> to vector<8x128xf32>
    %cst_93 = arith.constant 0.000000e+00 : f32
    %188 = vector.broadcast %cst_93 : f32 to vector<8x128xf32>
    %189 = arith.maximumf %187, %188 : vector<8x128xf32>
    %190 = vector.broadcast %158 : f32 to vector<8x128xf32>
    %191 = arith.mulf %190, %189 : vector<8x128xf32>
    %192 = arith.addf %186, %191 : vector<8x128xf32>
    %193 = vector.extract_strided_slice %181 {offsets = [0, 256], sizes = [8, 128], strides = [1, 1]} : vector<8x512xf32> to vector<8x128xf32>
    %194 = math.tanh %193 : vector<8x128xf32>
    %195 = vector.broadcast %159 : f32 to vector<8x128xf32>
    %196 = arith.mulf %195, %194 : vector<8x128xf32>
    %197 = arith.addf %192, %196 : vector<8x128xf32>
    %198 = vector.extract_strided_slice %181 {offsets = [0, 384], sizes = [8, 128], strides = [1, 1]} : vector<8x512xf32> to vector<8x128xf32>
    %199 = arith.negf %198 : vector<8x128xf32>
    %200 = math.exp %199 : vector<8x128xf32>
    %cst_94 = arith.constant 1.000000e+00 : f32
    %201 = vector.broadcast %cst_94 : f32 to vector<8x128xf32>
    %202 = arith.addf %201, %200 : vector<8x128xf32>
    %203 = arith.divf %201, %202 : vector<8x128xf32>
    %204 = vector.broadcast %160 : f32 to vector<8x128xf32>
    %205 = arith.mulf %204, %203 : vector<8x128xf32>
    %206 = arith.addf %197, %205 : vector<8x128xf32>
    %c16 = arith.constant 16 : index
    %207 = memref.load %arg1[%c16] : memref<36xf32, #tpu.memory_space<smem>>
    %c17 = arith.constant 17 : index
    %208 = memref.load %arg1[%c17] : memref<36xf32, #tpu.memory_space<smem>>
    %c18 = arith.constant 18 : index
    %209 = memref.load %arg1[%c18] : memref<36xf32, #tpu.memory_space<smem>>
    %c19 = arith.constant 19 : index
    %210 = memref.load %arg1[%c19] : memref<36xf32, #tpu.memory_space<smem>>
    %c4_95 = arith.constant 4 : index
    %c0_96 = arith.constant 0 : index
    %211 = vector.load %arg3[%c4_95, %c0_96] : memref<9x512xf32, #tpu.memory_space<vmem>>, vector<1x512xf32>
    %212 = vector.shape_cast %211 : vector<1x512xf32> to vector<512xf32>
    %c4_i32_97 = arith.constant 4 : i32
    %c0_i32_98 = arith.constant 0 : i32
    %c0_i32_99 = arith.constant 0 : i32
    %c0_i32_100 = arith.constant 0 : i32
    %c0_i32_101 = arith.constant 0 : i32
    %213 = tpu.memref_slice %arg4[%c4_i32_97, %c0_i32_100, %c0_i32_101] : memref<9x128x512xbf16, #tpu.memory_space<any>> -> memref<1x128x512xbf16, #tpu.memory_space<any>>
    %214 = tpu.memref_squeeze %213 : memref<1x128x512xbf16, #tpu.memory_space<any>> -> memref<128x512xbf16, #tpu.memory_space<any>>
    %c0_i32_102 = arith.constant 0 : i32
    %c0_i32_103 = arith.constant 0 : i32
    %215 = tpu.memref_slice %arg6[%c0_i32_98, %c0_i32_102, %c0_i32_103] : memref<2x128x512xbf16, #tpu.memory_space<vmem>> -> memref<1x128x512xbf16, #tpu.memory_space<vmem>>
    %216 = tpu.memref_squeeze %215 : memref<1x128x512xbf16, #tpu.memory_space<vmem>> -> memref<128x512xbf16, #tpu.memory_space<vmem>>
    %217 = tpu.memref_slice %arg7[%c0_i32_99] : memref<2x!tpu.dma_semaphore, #tpu.memory_space<semaphore_mem>> -> memref<1x!tpu.dma_semaphore, #tpu.memory_space<semaphore_mem>>
    %218 = tpu.memref_squeeze %217 : memref<1x!tpu.dma_semaphore, #tpu.memory_space<semaphore_mem>> -> memref<!tpu.dma_semaphore, #tpu.memory_space<semaphore_mem>>
    tpu.wait_dma2 semaphore(%218 : memref<!tpu.dma_semaphore, #tpu.memory_space<semaphore_mem>>) src(%214 : memref<128x512xbf16, #tpu.memory_space<any>>) dst(%216 : memref<128x512xbf16, #tpu.memory_space<vmem>>)
    %c5_i32 = arith.constant 5 : i32
    %c1_i32_104 = arith.constant 1 : i32
    %c1_i32_105 = arith.constant 1 : i32
    %c0_i32_106 = arith.constant 0 : i32
    %c0_i32_107 = arith.constant 0 : i32
    %219 = tpu.memref_slice %arg4[%c5_i32, %c0_i32_106, %c0_i32_107] : memref<9x128x512xbf16, #tpu.memory_space<any>> -> memref<1x128x512xbf16, #tpu.memory_space<any>>
    %220 = tpu.memref_squeeze %219 : memref<1x128x512xbf16, #tpu.memory_space<any>> -> memref<128x512xbf16, #tpu.memory_space<any>>
    %c0_i32_108 = arith.constant 0 : i32
    %c0_i32_109 = arith.constant 0 : i32
    %221 = tpu.memref_slice %arg6[%c1_i32_104, %c0_i32_108, %c0_i32_109] : memref<2x128x512xbf16, #tpu.memory_space<vmem>> -> memref<1x128x512xbf16, #tpu.memory_space<vmem>>
    %222 = tpu.memref_squeeze %221 : memref<1x128x512xbf16, #tpu.memory_space<vmem>> -> memref<128x512xbf16, #tpu.memory_space<vmem>>
    %223 = tpu.memref_slice %arg7[%c1_i32_105] : memref<2x!tpu.dma_semaphore, #tpu.memory_space<semaphore_mem>> -> memref<1x!tpu.dma_semaphore, #tpu.memory_space<semaphore_mem>>
    %224 = tpu.memref_squeeze %223 : memref<1x!tpu.dma_semaphore, #tpu.memory_space<semaphore_mem>> -> memref<!tpu.dma_semaphore, #tpu.memory_space<semaphore_mem>>
    tpu.enqueue_dma source(%220 : memref<128x512xbf16, #tpu.memory_space<any>>) target(%222 : memref<128x512xbf16, #tpu.memory_space<vmem>>) target_semaphore(%224 : memref<!tpu.dma_semaphore, #tpu.memory_space<semaphore_mem>>)
    %225 = arith.truncf %206 : vector<8x128xf32> to vector<8x128xbf16>
    %c0_110 = arith.constant 0 : index
    %c0_111 = arith.constant 0 : index
    %c0_112 = arith.constant 0 : index
    %226 = vector.load %arg6[%c0_110, %c0_111, %c0_112] : memref<2x128x512xbf16, #tpu.memory_space<vmem>>, vector<1x128x512xbf16>
    %227 = vector.shape_cast %226 : vector<1x128x512xbf16> to vector<128x512xbf16>
    %cst_113 = arith.constant dense<0.000000e+00> : vector<8x512xf32>
    %228 = tpu.matmul %225, %227, %cst_113 {dimension_numbers = #tpu.dot_dimension_numbers<[1], [0], [0], [1], [0, 0, 1, 1], [], []>} : vector<8x128xbf16>, vector<128x512xbf16>, vector<8x512xf32> -> vector<8x512xf32>
    %229 = vector.shape_cast %212 : vector<512xf32> to vector<1x512xf32>
    %230 = vector.broadcast %229 : vector<1x512xf32> to vector<8x512xf32>
    %231 = arith.addf %228, %230 : vector<8x512xf32>
    %cst_114 = arith.constant 0.000000e+00 : f32
    %232 = vector.broadcast %cst_114 : f32 to vector<8x128xf32>
    %233 = vector.extract_strided_slice %231 {offsets = [0, 0], sizes = [8, 128], strides = [1, 1]} : vector<8x512xf32> to vector<8x128xf32>
    %234 = vector.broadcast %207 : f32 to vector<8x128xf32>
    %235 = arith.mulf %234, %233 : vector<8x128xf32>
    %236 = arith.addf %232, %235 : vector<8x128xf32>
    %237 = vector.extract_strided_slice %231 {offsets = [0, 128], sizes = [8, 128], strides = [1, 1]} : vector<8x512xf32> to vector<8x128xf32>
    %cst_115 = arith.constant 0.000000e+00 : f32
    %238 = vector.broadcast %cst_115 : f32 to vector<8x128xf32>
    %239 = arith.maximumf %237, %238 : vector<8x128xf32>
    %240 = vector.broadcast %208 : f32 to vector<8x128xf32>
    %241 = arith.mulf %240, %239 : vector<8x128xf32>
    %242 = arith.addf %236, %241 : vector<8x128xf32>
    %243 = vector.extract_strided_slice %231 {offsets = [0, 256], sizes = [8, 128], strides = [1, 1]} : vector<8x512xf32> to vector<8x128xf32>
    %244 = math.tanh %243 : vector<8x128xf32>
    %245 = vector.broadcast %209 : f32 to vector<8x128xf32>
    %246 = arith.mulf %245, %244 : vector<8x128xf32>
    %247 = arith.addf %242, %246 : vector<8x128xf32>
    %248 = vector.extract_strided_slice %231 {offsets = [0, 384], sizes = [8, 128], strides = [1, 1]} : vector<8x512xf32> to vector<8x128xf32>
    %249 = arith.negf %248 : vector<8x128xf32>
    %250 = math.exp %249 : vector<8x128xf32>
    %cst_116 = arith.constant 1.000000e+00 : f32
    %251 = vector.broadcast %cst_116 : f32 to vector<8x128xf32>
    %252 = arith.addf %251, %250 : vector<8x128xf32>
    %253 = arith.divf %251, %252 : vector<8x128xf32>
    %254 = vector.broadcast %210 : f32 to vector<8x128xf32>
    %255 = arith.mulf %254, %253 : vector<8x128xf32>
    %256 = arith.addf %247, %255 : vector<8x128xf32>
    %c20 = arith.constant 20 : index
    %257 = memref.load %arg1[%c20] : memref<36xf32, #tpu.memory_space<smem>>
    %c21 = arith.constant 21 : index
    %258 = memref.load %arg1[%c21] : memref<36xf32, #tpu.memory_space<smem>>
    %c22 = arith.constant 22 : index
    %259 = memref.load %arg1[%c22] : memref<36xf32, #tpu.memory_space<smem>>
    %c23 = arith.constant 23 : index
    %260 = memref.load %arg1[%c23] : memref<36xf32, #tpu.memory_space<smem>>
    %c5_117 = arith.constant 5 : index
    %c0_118 = arith.constant 0 : index
    %261 = vector.load %arg3[%c5_117, %c0_118] : memref<9x512xf32, #tpu.memory_space<vmem>>, vector<1x512xf32>
    %262 = vector.shape_cast %261 : vector<1x512xf32> to vector<512xf32>
    %c5_i32_119 = arith.constant 5 : i32
    %c1_i32_120 = arith.constant 1 : i32
    %c1_i32_121 = arith.constant 1 : i32
    %c0_i32_122 = arith.constant 0 : i32
    %c0_i32_123 = arith.constant 0 : i32
    %263 = tpu.memref_slice %arg4[%c5_i32_119, %c0_i32_122, %c0_i32_123] : memref<9x128x512xbf16, #tpu.memory_space<any>> -> memref<1x128x512xbf16, #tpu.memory_space<any>>
    %264 = tpu.memref_squeeze %263 : memref<1x128x512xbf16, #tpu.memory_space<any>> -> memref<128x512xbf16, #tpu.memory_space<any>>
    %c0_i32_124 = arith.constant 0 : i32
    %c0_i32_125 = arith.constant 0 : i32
    %265 = tpu.memref_slice %arg6[%c1_i32_120, %c0_i32_124, %c0_i32_125] : memref<2x128x512xbf16, #tpu.memory_space<vmem>> -> memref<1x128x512xbf16, #tpu.memory_space<vmem>>
    %266 = tpu.memref_squeeze %265 : memref<1x128x512xbf16, #tpu.memory_space<vmem>> -> memref<128x512xbf16, #tpu.memory_space<vmem>>
    %267 = tpu.memref_slice %arg7[%c1_i32_121] : memref<2x!tpu.dma_semaphore, #tpu.memory_space<semaphore_mem>> -> memref<1x!tpu.dma_semaphore, #tpu.memory_space<semaphore_mem>>
    %268 = tpu.memref_squeeze %267 : memref<1x!tpu.dma_semaphore, #tpu.memory_space<semaphore_mem>> -> memref<!tpu.dma_semaphore, #tpu.memory_space<semaphore_mem>>
    tpu.wait_dma2 semaphore(%268 : memref<!tpu.dma_semaphore, #tpu.memory_space<semaphore_mem>>) src(%264 : memref<128x512xbf16, #tpu.memory_space<any>>) dst(%266 : memref<128x512xbf16, #tpu.memory_space<vmem>>)
    %c6_i32 = arith.constant 6 : i32
    %c0_i32_126 = arith.constant 0 : i32
    %c0_i32_127 = arith.constant 0 : i32
    %c0_i32_128 = arith.constant 0 : i32
    %c0_i32_129 = arith.constant 0 : i32
    %269 = tpu.memref_slice %arg4[%c6_i32, %c0_i32_128, %c0_i32_129] : memref<9x128x512xbf16, #tpu.memory_space<any>> -> memref<1x128x512xbf16, #tpu.memory_space<any>>
    %270 = tpu.memref_squeeze %269 : memref<1x128x512xbf16, #tpu.memory_space<any>> -> memref<128x512xbf16, #tpu.memory_space<any>>
    %c0_i32_130 = arith.constant 0 : i32
    %c0_i32_131 = arith.constant 0 : i32
    %271 = tpu.memref_slice %arg6[%c0_i32_126, %c0_i32_130, %c0_i32_131] : memref<2x128x512xbf16, #tpu.memory_space<vmem>> -> memref<1x128x512xbf16, #tpu.memory_space<vmem>>
    %272 = tpu.memref_squeeze %271 : memref<1x128x512xbf16, #tpu.memory_space<vmem>> -> memref<128x512xbf16, #tpu.memory_space<vmem>>
    %273 = tpu.memref_slice %arg7[%c0_i32_127] : memref<2x!tpu.dma_semaphore, #tpu.memory_space<semaphore_mem>> -> memref<1x!tpu.dma_semaphore, #tpu.memory_space<semaphore_mem>>
    %274 = tpu.memref_squeeze %273 : memref<1x!tpu.dma_semaphore, #tpu.memory_space<semaphore_mem>> -> memref<!tpu.dma_semaphore, #tpu.memory_space<semaphore_mem>>
    tpu.enqueue_dma source(%270 : memref<128x512xbf16, #tpu.memory_space<any>>) target(%272 : memref<128x512xbf16, #tpu.memory_space<vmem>>) target_semaphore(%274 : memref<!tpu.dma_semaphore, #tpu.memory_space<semaphore_mem>>)
    %275 = arith.truncf %256 : vector<8x128xf32> to vector<8x128xbf16>
    %c1_132 = arith.constant 1 : index
    %c0_133 = arith.constant 0 : index
    %c0_134 = arith.constant 0 : index
    %276 = vector.load %arg6[%c1_132, %c0_133, %c0_134] : memref<2x128x512xbf16, #tpu.memory_space<vmem>>, vector<1x128x512xbf16>
    %277 = vector.shape_cast %276 : vector<1x128x512xbf16> to vector<128x512xbf16>
    %cst_135 = arith.constant dense<0.000000e+00> : vector<8x512xf32>
    %278 = tpu.matmul %275, %277, %cst_135 {dimension_numbers = #tpu.dot_dimension_numbers<[1], [0], [0], [1], [0, 0, 1, 1], [], []>} : vector<8x128xbf16>, vector<128x512xbf16>, vector<8x512xf32> -> vector<8x512xf32>
    %279 = vector.shape_cast %262 : vector<512xf32> to vector<1x512xf32>
    %280 = vector.broadcast %279 : vector<1x512xf32> to vector<8x512xf32>
    %281 = arith.addf %278, %280 : vector<8x512xf32>
    %cst_136 = arith.constant 0.000000e+00 : f32
    %282 = vector.broadcast %cst_136 : f32 to vector<8x128xf32>
    %283 = vector.extract_strided_slice %281 {offsets = [0, 0], sizes = [8, 128], strides = [1, 1]} : vector<8x512xf32> to vector<8x128xf32>
    %284 = vector.broadcast %257 : f32 to vector<8x128xf32>
    %285 = arith.mulf %284, %283 : vector<8x128xf32>
    %286 = arith.addf %282, %285 : vector<8x128xf32>
    %287 = vector.extract_strided_slice %281 {offsets = [0, 128], sizes = [8, 128], strides = [1, 1]} : vector<8x512xf32> to vector<8x128xf32>
    %cst_137 = arith.constant 0.000000e+00 : f32
    %288 = vector.broadcast %cst_137 : f32 to vector<8x128xf32>
    %289 = arith.maximumf %287, %288 : vector<8x128xf32>
    %290 = vector.broadcast %258 : f32 to vector<8x128xf32>
    %291 = arith.mulf %290, %289 : vector<8x128xf32>
    %292 = arith.addf %286, %291 : vector<8x128xf32>
    %293 = vector.extract_strided_slice %281 {offsets = [0, 256], sizes = [8, 128], strides = [1, 1]} : vector<8x512xf32> to vector<8x128xf32>
    %294 = math.tanh %293 : vector<8x128xf32>
    %295 = vector.broadcast %259 : f32 to vector<8x128xf32>
    %296 = arith.mulf %295, %294 : vector<8x128xf32>
    %297 = arith.addf %292, %296 : vector<8x128xf32>
    %298 = vector.extract_strided_slice %281 {offsets = [0, 384], sizes = [8, 128], strides = [1, 1]} : vector<8x512xf32> to vector<8x128xf32>
    %299 = arith.negf %298 : vector<8x128xf32>
    %300 = math.exp %299 : vector<8x128xf32>
    %cst_138 = arith.constant 1.000000e+00 : f32
    %301 = vector.broadcast %cst_138 : f32 to vector<8x128xf32>
    %302 = arith.addf %301, %300 : vector<8x128xf32>
    %303 = arith.divf %301, %302 : vector<8x128xf32>
    %304 = vector.broadcast %260 : f32 to vector<8x128xf32>
    %305 = arith.mulf %304, %303 : vector<8x128xf32>
    %306 = arith.addf %297, %305 : vector<8x128xf32>
    %c24 = arith.constant 24 : index
    %307 = memref.load %arg1[%c24] : memref<36xf32, #tpu.memory_space<smem>>
    %c25 = arith.constant 25 : index
    %308 = memref.load %arg1[%c25] : memref<36xf32, #tpu.memory_space<smem>>
    %c26 = arith.constant 26 : index
    %309 = memref.load %arg1[%c26] : memref<36xf32, #tpu.memory_space<smem>>
    %c27 = arith.constant 27 : index
    %310 = memref.load %arg1[%c27] : memref<36xf32, #tpu.memory_space<smem>>
    %c6_139 = arith.constant 6 : index
    %c0_140 = arith.constant 0 : index
    %311 = vector.load %arg3[%c6_139, %c0_140] : memref<9x512xf32, #tpu.memory_space<vmem>>, vector<1x512xf32>
    %312 = vector.shape_cast %311 : vector<1x512xf32> to vector<512xf32>
    %c6_i32_141 = arith.constant 6 : i32
    %c0_i32_142 = arith.constant 0 : i32
    %c0_i32_143 = arith.constant 0 : i32
    %c0_i32_144 = arith.constant 0 : i32
    %c0_i32_145 = arith.constant 0 : i32
    %313 = tpu.memref_slice %arg4[%c6_i32_141, %c0_i32_144, %c0_i32_145] : memref<9x128x512xbf16, #tpu.memory_space<any>> -> memref<1x128x512xbf16, #tpu.memory_space<any>>
    %314 = tpu.memref_squeeze %313 : memref<1x128x512xbf16, #tpu.memory_space<any>> -> memref<128x512xbf16, #tpu.memory_space<any>>
    %c0_i32_146 = arith.constant 0 : i32
    %c0_i32_147 = arith.constant 0 : i32
    %315 = tpu.memref_slice %arg6[%c0_i32_142, %c0_i32_146, %c0_i32_147] : memref<2x128x512xbf16, #tpu.memory_space<vmem>> -> memref<1x128x512xbf16, #tpu.memory_space<vmem>>
    %316 = tpu.memref_squeeze %315 : memref<1x128x512xbf16, #tpu.memory_space<vmem>> -> memref<128x512xbf16, #tpu.memory_space<vmem>>
    %317 = tpu.memref_slice %arg7[%c0_i32_143] : memref<2x!tpu.dma_semaphore, #tpu.memory_space<semaphore_mem>> -> memref<1x!tpu.dma_semaphore, #tpu.memory_space<semaphore_mem>>
    %318 = tpu.memref_squeeze %317 : memref<1x!tpu.dma_semaphore, #tpu.memory_space<semaphore_mem>> -> memref<!tpu.dma_semaphore, #tpu.memory_space<semaphore_mem>>
    tpu.wait_dma2 semaphore(%318 : memref<!tpu.dma_semaphore, #tpu.memory_space<semaphore_mem>>) src(%314 : memref<128x512xbf16, #tpu.memory_space<any>>) dst(%316 : memref<128x512xbf16, #tpu.memory_space<vmem>>)
    %c7_i32 = arith.constant 7 : i32
    %c1_i32_148 = arith.constant 1 : i32
    %c1_i32_149 = arith.constant 1 : i32
    %c0_i32_150 = arith.constant 0 : i32
    %c0_i32_151 = arith.constant 0 : i32
    %319 = tpu.memref_slice %arg4[%c7_i32, %c0_i32_150, %c0_i32_151] : memref<9x128x512xbf16, #tpu.memory_space<any>> -> memref<1x128x512xbf16, #tpu.memory_space<any>>
    %320 = tpu.memref_squeeze %319 : memref<1x128x512xbf16, #tpu.memory_space<any>> -> memref<128x512xbf16, #tpu.memory_space<any>>
    %c0_i32_152 = arith.constant 0 : i32
    %c0_i32_153 = arith.constant 0 : i32
    %321 = tpu.memref_slice %arg6[%c1_i32_148, %c0_i32_152, %c0_i32_153] : memref<2x128x512xbf16, #tpu.memory_space<vmem>> -> memref<1x128x512xbf16, #tpu.memory_space<vmem>>
    %322 = tpu.memref_squeeze %321 : memref<1x128x512xbf16, #tpu.memory_space<vmem>> -> memref<128x512xbf16, #tpu.memory_space<vmem>>
    %323 = tpu.memref_slice %arg7[%c1_i32_149] : memref<2x!tpu.dma_semaphore, #tpu.memory_space<semaphore_mem>> -> memref<1x!tpu.dma_semaphore, #tpu.memory_space<semaphore_mem>>
    %324 = tpu.memref_squeeze %323 : memref<1x!tpu.dma_semaphore, #tpu.memory_space<semaphore_mem>> -> memref<!tpu.dma_semaphore, #tpu.memory_space<semaphore_mem>>
    tpu.enqueue_dma source(%320 : memref<128x512xbf16, #tpu.memory_space<any>>) target(%322 : memref<128x512xbf16, #tpu.memory_space<vmem>>) target_semaphore(%324 : memref<!tpu.dma_semaphore, #tpu.memory_space<semaphore_mem>>)
    %325 = arith.truncf %306 : vector<8x128xf32> to vector<8x128xbf16>
    %c0_154 = arith.constant 0 : index
    %c0_155 = arith.constant 0 : index
    %c0_156 = arith.constant 0 : index
    %326 = vector.load %arg6[%c0_154, %c0_155, %c0_156] : memref<2x128x512xbf16, #tpu.memory_space<vmem>>, vector<1x128x512xbf16>
    %327 = vector.shape_cast %326 : vector<1x128x512xbf16> to vector<128x512xbf16>
    %cst_157 = arith.constant dense<0.000000e+00> : vector<8x512xf32>
    %328 = tpu.matmul %325, %327, %cst_157 {dimension_numbers = #tpu.dot_dimension_numbers<[1], [0], [0], [1], [0, 0, 1, 1], [], []>} : vector<8x128xbf16>, vector<128x512xbf16>, vector<8x512xf32> -> vector<8x512xf32>
    %329 = vector.shape_cast %312 : vector<512xf32> to vector<1x512xf32>
    %330 = vector.broadcast %329 : vector<1x512xf32> to vector<8x512xf32>
    %331 = arith.addf %328, %330 : vector<8x512xf32>
    %cst_158 = arith.constant 0.000000e+00 : f32
    %332 = vector.broadcast %cst_158 : f32 to vector<8x128xf32>
    %333 = vector.extract_strided_slice %331 {offsets = [0, 0], sizes = [8, 128], strides = [1, 1]} : vector<8x512xf32> to vector<8x128xf32>
    %334 = vector.broadcast %307 : f32 to vector<8x128xf32>
    %335 = arith.mulf %334, %333 : vector<8x128xf32>
    %336 = arith.addf %332, %335 : vector<8x128xf32>
    %337 = vector.extract_strided_slice %331 {offsets = [0, 128], sizes = [8, 128], strides = [1, 1]} : vector<8x512xf32> to vector<8x128xf32>
    %cst_159 = arith.constant 0.000000e+00 : f32
    %338 = vector.broadcast %cst_159 : f32 to vector<8x128xf32>
    %339 = arith.maximumf %337, %338 : vector<8x128xf32>
    %340 = vector.broadcast %308 : f32 to vector<8x128xf32>
    %341 = arith.mulf %340, %339 : vector<8x128xf32>
    %342 = arith.addf %336, %341 : vector<8x128xf32>
    %343 = vector.extract_strided_slice %331 {offsets = [0, 256], sizes = [8, 128], strides = [1, 1]} : vector<8x512xf32> to vector<8x128xf32>
    %344 = math.tanh %343 : vector<8x128xf32>
    %345 = vector.broadcast %309 : f32 to vector<8x128xf32>
    %346 = arith.mulf %345, %344 : vector<8x128xf32>
    %347 = arith.addf %342, %346 : vector<8x128xf32>
    %348 = vector.extract_strided_slice %331 {offsets = [0, 384], sizes = [8, 128], strides = [1, 1]} : vector<8x512xf32> to vector<8x128xf32>
    %349 = arith.negf %348 : vector<8x128xf32>
    %350 = math.exp %349 : vector<8x128xf32>
    %cst_160 = arith.constant 1.000000e+00 : f32
    %351 = vector.broadcast %cst_160 : f32 to vector<8x128xf32>
    %352 = arith.addf %351, %350 : vector<8x128xf32>
    %353 = arith.divf %351, %352 : vector<8x128xf32>
    %354 = vector.broadcast %310 : f32 to vector<8x128xf32>
    %355 = arith.mulf %354, %353 : vector<8x128xf32>
    %356 = arith.addf %347, %355 : vector<8x128xf32>
    %c28 = arith.constant 28 : index
    %357 = memref.load %arg1[%c28] : memref<36xf32, #tpu.memory_space<smem>>
    %c29 = arith.constant 29 : index
    %358 = memref.load %arg1[%c29] : memref<36xf32, #tpu.memory_space<smem>>
    %c30 = arith.constant 30 : index
    %359 = memref.load %arg1[%c30] : memref<36xf32, #tpu.memory_space<smem>>
    %c31 = arith.constant 31 : index
    %360 = memref.load %arg1[%c31] : memref<36xf32, #tpu.memory_space<smem>>
    %c7_161 = arith.constant 7 : index
    %c0_162 = arith.constant 0 : index
    %361 = vector.load %arg3[%c7_161, %c0_162] : memref<9x512xf32, #tpu.memory_space<vmem>>, vector<1x512xf32>
    %362 = vector.shape_cast %361 : vector<1x512xf32> to vector<512xf32>
    %c7_i32_163 = arith.constant 7 : i32
    %c1_i32_164 = arith.constant 1 : i32
    %c1_i32_165 = arith.constant 1 : i32
    %c0_i32_166 = arith.constant 0 : i32
    %c0_i32_167 = arith.constant 0 : i32
    %363 = tpu.memref_slice %arg4[%c7_i32_163, %c0_i32_166, %c0_i32_167] : memref<9x128x512xbf16, #tpu.memory_space<any>> -> memref<1x128x512xbf16, #tpu.memory_space<any>>
    %364 = tpu.memref_squeeze %363 : memref<1x128x512xbf16, #tpu.memory_space<any>> -> memref<128x512xbf16, #tpu.memory_space<any>>
    %c0_i32_168 = arith.constant 0 : i32
    %c0_i32_169 = arith.constant 0 : i32
    %365 = tpu.memref_slice %arg6[%c1_i32_164, %c0_i32_168, %c0_i32_169] : memref<2x128x512xbf16, #tpu.memory_space<vmem>> -> memref<1x128x512xbf16, #tpu.memory_space<vmem>>
    %366 = tpu.memref_squeeze %365 : memref<1x128x512xbf16, #tpu.memory_space<vmem>> -> memref<128x512xbf16, #tpu.memory_space<vmem>>
    %367 = tpu.memref_slice %arg7[%c1_i32_165] : memref<2x!tpu.dma_semaphore, #tpu.memory_space<semaphore_mem>> -> memref<1x!tpu.dma_semaphore, #tpu.memory_space<semaphore_mem>>
    %368 = tpu.memref_squeeze %367 : memref<1x!tpu.dma_semaphore, #tpu.memory_space<semaphore_mem>> -> memref<!tpu.dma_semaphore, #tpu.memory_space<semaphore_mem>>
    tpu.wait_dma2 semaphore(%368 : memref<!tpu.dma_semaphore, #tpu.memory_space<semaphore_mem>>) src(%364 : memref<128x512xbf16, #tpu.memory_space<any>>) dst(%366 : memref<128x512xbf16, #tpu.memory_space<vmem>>)
    %c8_i32 = arith.constant 8 : i32
    %c0_i32_170 = arith.constant 0 : i32
    %c0_i32_171 = arith.constant 0 : i32
    %c0_i32_172 = arith.constant 0 : i32
    %c0_i32_173 = arith.constant 0 : i32
    %369 = tpu.memref_slice %arg4[%c8_i32, %c0_i32_172, %c0_i32_173] : memref<9x128x512xbf16, #tpu.memory_space<any>> -> memref<1x128x512xbf16, #tpu.memory_space<any>>
    %370 = tpu.memref_squeeze %369 : memref<1x128x512xbf16, #tpu.memory_space<any>> -> memref<128x512xbf16, #tpu.memory_space<any>>
    %c0_i32_174 = arith.constant 0 : i32
    %c0_i32_175 = arith.constant 0 : i32
    %371 = tpu.memref_slice %arg6[%c0_i32_170, %c0_i32_174, %c0_i32_175] : memref<2x128x512xbf16, #tpu.memory_space<vmem>> -> memref<1x128x512xbf16, #tpu.memory_space<vmem>>
    %372 = tpu.memref_squeeze %371 : memref<1x128x512xbf16, #tpu.memory_space<vmem>> -> memref<128x512xbf16, #tpu.memory_space<vmem>>
    %373 = tpu.memref_slice %arg7[%c0_i32_171] : memref<2x!tpu.dma_semaphore, #tpu.memory_space<semaphore_mem>> -> memref<1x!tpu.dma_semaphore, #tpu.memory_space<semaphore_mem>>
    %374 = tpu.memref_squeeze %373 : memref<1x!tpu.dma_semaphore, #tpu.memory_space<semaphore_mem>> -> memref<!tpu.dma_semaphore, #tpu.memory_space<semaphore_mem>>
    tpu.enqueue_dma source(%370 : memref<128x512xbf16, #tpu.memory_space<any>>) target(%372 : memref<128x512xbf16, #tpu.memory_space<vmem>>) target_semaphore(%374 : memref<!tpu.dma_semaphore, #tpu.memory_space<semaphore_mem>>)
    %375 = arith.truncf %356 : vector<8x128xf32> to vector<8x128xbf16>
    %c1_176 = arith.constant 1 : index
    %c0_177 = arith.constant 0 : index
    %c0_178 = arith.constant 0 : index
    %376 = vector.load %arg6[%c1_176, %c0_177, %c0_178] : memref<2x128x512xbf16, #tpu.memory_space<vmem>>, vector<1x128x512xbf16>
    %377 = vector.shape_cast %376 : vector<1x128x512xbf16> to vector<128x512xbf16>
    %cst_179 = arith.constant dense<0.000000e+00> : vector<8x512xf32>
    %378 = tpu.matmul %375, %377, %cst_179 {dimension_numbers = #tpu.dot_dimension_numbers<[1], [0], [0], [1], [0, 0, 1, 1], [], []>} : vector<8x128xbf16>, vector<128x512xbf16>, vector<8x512xf32> -> vector<8x512xf32>
    %379 = vector.shape_cast %362 : vector<512xf32> to vector<1x512xf32>
    %380 = vector.broadcast %379 : vector<1x512xf32> to vector<8x512xf32>
    %381 = arith.addf %378, %380 : vector<8x512xf32>
    %cst_180 = arith.constant 0.000000e+00 : f32
    %382 = vector.broadcast %cst_180 : f32 to vector<8x128xf32>
    %383 = vector.extract_strided_slice %381 {offsets = [0, 0], sizes = [8, 128], strides = [1, 1]} : vector<8x512xf32> to vector<8x128xf32>
    %384 = vector.broadcast %357 : f32 to vector<8x128xf32>
    %385 = arith.mulf %384, %383 : vector<8x128xf32>
    %386 = arith.addf %382, %385 : vector<8x128xf32>
    %387 = vector.extract_strided_slice %381 {offsets = [0, 128], sizes = [8, 128], strides = [1, 1]} : vector<8x512xf32> to vector<8x128xf32>
    %cst_181 = arith.constant 0.000000e+00 : f32
    %388 = vector.broadcast %cst_181 : f32 to vector<8x128xf32>
    %389 = arith.maximumf %387, %388 : vector<8x128xf32>
    %390 = vector.broadcast %358 : f32 to vector<8x128xf32>
    %391 = arith.mulf %390, %389 : vector<8x128xf32>
    %392 = arith.addf %386, %391 : vector<8x128xf32>
    %393 = vector.extract_strided_slice %381 {offsets = [0, 256], sizes = [8, 128], strides = [1, 1]} : vector<8x512xf32> to vector<8x128xf32>
    %394 = math.tanh %393 : vector<8x128xf32>
    %395 = vector.broadcast %359 : f32 to vector<8x128xf32>
    %396 = arith.mulf %395, %394 : vector<8x128xf32>
    %397 = arith.addf %392, %396 : vector<8x128xf32>
    %398 = vector.extract_strided_slice %381 {offsets = [0, 384], sizes = [8, 128], strides = [1, 1]} : vector<8x512xf32> to vector<8x128xf32>
    %399 = arith.negf %398 : vector<8x128xf32>
    %400 = math.exp %399 : vector<8x128xf32>
    %cst_182 = arith.constant 1.000000e+00 : f32
    %401 = vector.broadcast %cst_182 : f32 to vector<8x128xf32>
    %402 = arith.addf %401, %400 : vector<8x128xf32>
    %403 = arith.divf %401, %402 : vector<8x128xf32>
    %404 = vector.broadcast %360 : f32 to vector<8x128xf32>
    %405 = arith.mulf %404, %403 : vector<8x128xf32>
    %406 = arith.addf %397, %405 : vector<8x128xf32>
    %c32 = arith.constant 32 : index
    %407 = memref.load %arg1[%c32] : memref<36xf32, #tpu.memory_space<smem>>
    %c33 = arith.constant 33 : index
    %408 = memref.load %arg1[%c33] : memref<36xf32, #tpu.memory_space<smem>>
    %c34 = arith.constant 34 : index
    %409 = memref.load %arg1[%c34] : memref<36xf32, #tpu.memory_space<smem>>
    %c35 = arith.constant 35 : index
    %410 = memref.load %arg1[%c35] : memref<36xf32, #tpu.memory_space<smem>>
    %c8_183 = arith.constant 8 : index
    %c0_184 = arith.constant 0 : index
    %411 = vector.load %arg3[%c8_183, %c0_184] : memref<9x512xf32, #tpu.memory_space<vmem>>, vector<1x512xf32>
    %412 = vector.shape_cast %411 : vector<1x512xf32> to vector<512xf32>
    %c8_i32_185 = arith.constant 8 : i32
    %c0_i32_186 = arith.constant 0 : i32
    %c0_i32_187 = arith.constant 0 : i32
    %c0_i32_188 = arith.constant 0 : i32
    %c0_i32_189 = arith.constant 0 : i32
    %413 = tpu.memref_slice %arg4[%c8_i32_185, %c0_i32_188, %c0_i32_189] : memref<9x128x512xbf16, #tpu.memory_space<any>> -> memref<1x128x512xbf16, #tpu.memory_space<any>>
    %414 = tpu.memref_squeeze %413 : memref<1x128x512xbf16, #tpu.memory_space<any>> -> memref<128x512xbf16, #tpu.memory_space<any>>
    %c0_i32_190 = arith.constant 0 : i32
    %c0_i32_191 = arith.constant 0 : i32
    %415 = tpu.memref_slice %arg6[%c0_i32_186, %c0_i32_190, %c0_i32_191] : memref<2x128x512xbf16, #tpu.memory_space<vmem>> -> memref<1x128x512xbf16, #tpu.memory_space<vmem>>
    %416 = tpu.memref_squeeze %415 : memref<1x128x512xbf16, #tpu.memory_space<vmem>> -> memref<128x512xbf16, #tpu.memory_space<vmem>>
    %417 = tpu.memref_slice %arg7[%c0_i32_187] : memref<2x!tpu.dma_semaphore, #tpu.memory_space<semaphore_mem>> -> memref<1x!tpu.dma_semaphore, #tpu.memory_space<semaphore_mem>>
    %418 = tpu.memref_squeeze %417 : memref<1x!tpu.dma_semaphore, #tpu.memory_space<semaphore_mem>> -> memref<!tpu.dma_semaphore, #tpu.memory_space<semaphore_mem>>
    tpu.wait_dma2 semaphore(%418 : memref<!tpu.dma_semaphore, #tpu.memory_space<semaphore_mem>>) src(%414 : memref<128x512xbf16, #tpu.memory_space<any>>) dst(%416 : memref<128x512xbf16, #tpu.memory_space<vmem>>)
    %419 = arith.truncf %406 : vector<8x128xf32> to vector<8x128xbf16>
    %c0_192 = arith.constant 0 : index
    %c0_193 = arith.constant 0 : index
    %c0_194 = arith.constant 0 : index
    %420 = vector.load %arg6[%c0_192, %c0_193, %c0_194] : memref<2x128x512xbf16, #tpu.memory_space<vmem>>, vector<1x128x512xbf16>
    %421 = vector.shape_cast %420 : vector<1x128x512xbf16> to vector<128x512xbf16>
    %cst_195 = arith.constant dense<0.000000e+00> : vector<8x512xf32>
    %422 = tpu.matmul %419, %421, %cst_195 {dimension_numbers = #tpu.dot_dimension_numbers<[1], [0], [0], [1], [0, 0, 1, 1], [], []>} : vector<8x128xbf16>, vector<128x512xbf16>, vector<8x512xf32> -> vector<8x512xf32>
    %423 = vector.shape_cast %412 : vector<512xf32> to vector<1x512xf32>
    %424 = vector.broadcast %423 : vector<1x512xf32> to vector<8x512xf32>
    %425 = arith.addf %422, %424 : vector<8x512xf32>
    %cst_196 = arith.constant 0.000000e+00 : f32
    %426 = vector.broadcast %cst_196 : f32 to vector<8x128xf32>
    %427 = vector.extract_strided_slice %425 {offsets = [0, 0], sizes = [8, 128], strides = [1, 1]} : vector<8x512xf32> to vector<8x128xf32>
    %428 = vector.broadcast %407 : f32 to vector<8x128xf32>
    %429 = arith.mulf %428, %427 : vector<8x128xf32>
    %430 = arith.addf %426, %429 : vector<8x128xf32>
    %431 = vector.extract_strided_slice %425 {offsets = [0, 128], sizes = [8, 128], strides = [1, 1]} : vector<8x512xf32> to vector<8x128xf32>
    %cst_197 = arith.constant 0.000000e+00 : f32
    %432 = vector.broadcast %cst_197 : f32 to vector<8x128xf32>
    %433 = arith.maximumf %431, %432 : vector<8x128xf32>
    %434 = vector.broadcast %408 : f32 to vector<8x128xf32>
    %435 = arith.mulf %434, %433 : vector<8x128xf32>
    %436 = arith.addf %430, %435 : vector<8x128xf32>
    %437 = vector.extract_strided_slice %425 {offsets = [0, 256], sizes = [8, 128], strides = [1, 1]} : vector<8x512xf32> to vector<8x128xf32>
    %438 = math.tanh %437 : vector<8x128xf32>
    %439 = vector.broadcast %409 : f32 to vector<8x128xf32>
    %440 = arith.mulf %439, %438 : vector<8x128xf32>
    %441 = arith.addf %436, %440 : vector<8x128xf32>
    %442 = vector.extract_strided_slice %425 {offsets = [0, 384], sizes = [8, 128], strides = [1, 1]} : vector<8x512xf32> to vector<8x128xf32>
    %443 = arith.negf %442 : vector<8x128xf32>
    %444 = math.exp %443 : vector<8x128xf32>
    %cst_198 = arith.constant 1.000000e+00 : f32
    %445 = vector.broadcast %cst_198 : f32 to vector<8x128xf32>
    %446 = arith.addf %445, %444 : vector<8x128xf32>
    %447 = arith.divf %445, %446 : vector<8x128xf32>
    %448 = vector.broadcast %410 : f32 to vector<8x128xf32>
    %449 = arith.mulf %448, %447 : vector<8x128xf32>
    %450 = arith.addf %441, %449 : vector<8x128xf32>
    %c0_199 = arith.constant 0 : index
    %c0_200 = arith.constant 0 : index
    %451 = vector.load %arg5[%c0_199, %c0_200] : memref<8x128xf32, #tpu.memory_space<vmem>>, vector<8x128xf32>
    tpu.vector_store %arg5[%c0_199, %c0_200], %450 {strides = array<i32>} : memref<8x128xf32, #tpu.memory_space<vmem>>, vector<8x128xf32>,
    return
  }
  func.func @transform_0(%arg0: i32) -> i32 {
    %c0_i32 = arith.constant 0 : i32
    %c0_i32_0 = arith.constant 0 : i32
    return %c0_i32 : i32
  }
  func.func @transform_1(%arg0: i32) -> (i32, i32) {
    %c0_i32 = arith.constant 0 : i32
    %c0_i32_0 = arith.constant 0 : i32
    return %arg0, %c0_i32 : i32, i32
  }
  func.func @transform_2(%arg0: i32) -> (i32, i32) {
    %c0_i32 = arith.constant 0 : i32
    %c0_i32_0 = arith.constant 0 : i32
    %c0_i32_1 = arith.constant 0 : i32
    return %c0_i32, %c0_i32_0 : i32, i32
  }
  func.func @transform_4(%arg0: i32) -> (i32, i32) {
    %c0_i32 = arith.constant 0 : i32
    %c0_i32_0 = arith.constant 0 : i32
    return %arg0, %c0_i32 : i32, i32
  }
}

</mosaic_0001>

<bundles_post_ra>
// kernel: search_cell_forward.1
= control target key start
LH: loop header
LB: loop body
LE: loop exit
PB: predicated region body
PF: predicated region fallthrough
CT: control target
= control target key end

     0   :  { %9 = vsyncpa [#allocation7], 0  ;;  %s5033_s0 = inlined_call_operand.vmem [shape: f32[36], index: 0, kind: input, shape index: {}]   ;;  %s5034_s1 = inlined_call_operand.hbm [shape: f32[8,128], index: 1, kind: input, shape index: {}]   ;;  %s5035_s2 = inlined_call_operand.hbm [shape: f32[9,512], index: 2, kind: input, shape index: {}]   ;;  %s5036_s3 = inlined_call_operand.hbm [shape: bf16[9,128,512], index: 3, kind: input, shape index: {}]   ;;  %s5037_s4 = inlined_call_operand.hbm [shape: f32[8,128], index: 4, kind: output, shape index: {}]  }
   0x1   :  { %10 = vsyncpa [#allocation5], 0 }
   0x2   :  { %11 = vsyncpa [#allocation10], 0 }
   0x3   :  { %12 = vsyncpa [#allocation6], 0  ;;  %s18_s17 = sshll.u32 %s5033_s0, 4  ;;  %s27_s20 = sshll.u32 %s5034_s1, 4  ;;  %s19_s17 = int_to_ptr.vmem [resolvable:$true] %s18_s17  ;;  %s28_s20 = int_to_ptr.hbm [resolvable:$true] %s27_s20 }
   0x4   :  { %s4750_s21 = smov [#allocation4]   ;;  %s4751_s22 = smov [#allocation8]  }
   0x5   :  { %21 = dma.vmem_to_smem %s19_s17, 16, %s4750_s21, [#allocation7]  }
   0x6   :  { %s29_s23 = sshll.u32 %s4751_s22, 4  ;;  %s37_s26 = sshll.u32 %s5035_s2, 4  ;;  %s30_s23 = int_to_ptr.vmem [resolvable:$true] %s29_s23  ;;  %s38_s26 = int_to_ptr.hbm [resolvable:$true] %s37_s26 }
   0x7   :  { %32 = dma.hbm_to_vmem [thread:$0]  %s28_s20, 128, %s30_s23, [#allocation5]  }
   0x8   :  { %s4752_s27 = smov [#allocation9]   ;;  %s4753_s0 = smov 512  }
   0x9   :  { %s39_s28 = sshll.u32 %s4752_s27, 4  ;;  %s4754_s29 = smov 32   ;;  %s40_s28 = int_to_ptr.vmem [resolvable:$true] %s39_s28 }
   0xa   :  { %45 = dma.hbm_to_vmem [thread:$0]  %s38_s26, 1024, %s40_s28, [#allocation10], %s4753_s0, %s4753_s0, %s4754_s29  }
   0xb   :  { %4724 = dma.done.wait [#allocation7], 16  }
   0xc   :  { %4725 = vsyncadd [#allocation7], 4294967280 }
   0xd   :  { %4726 = dma.done.wait [#allocation5], 128  }
   0xe   :  { %4727 = vsyncadd [#allocation5], 4294967168 }
   0xf   :  { %4728 = dma.done.wait [#allocation10], 1024  }
  0x10   :  { %4729 = vsyncadd [#allocation10], 4294966272 }
  0x11   :  { %58 = sfence }
  0x12   :  { %s66_s2 = sshll.u32 %s5036_s3, 4  ;;  %v4795_v0 = vld [vmem:[#allocation8] sm:$0xff]  ;;  %s4755_s5 = smov [#allocation2]   ;;  %s67_s2 = int_to_ptr.hbm [resolvable:$true] %s66_s2 }
  0x13   :  { %v4797_v1 = vld [vmem:[#allocation9] ss:$8 sm:$0xf]  ;;  %s68_s6 = sshll.u32 %s4755_s5, 4  ;;  %s4801_s7 = sld [smem:[#allocation4]]  ;;  %s4799_s6 = int_to_ptr.vmem [resolvable:$true] %s68_s6 }
  0x14   :  { %71 = dma.hbm_to_vmem [thread:$0]  %s67_s2, 4096, %s4799_s6, [#allocation3] }
  0x15   :  { %s4804_s8 = sld [smem:[#allocation4 + $0x1]] }
  0x16   :  { %s4806_s9 = sld [smem:[#allocation4 + $0x2]] }
  0x17   :  { %s4808_s10 = sld [smem:[#allocation4 + $0x3]] }
  0x18   :  { %4730 = dma.done.wait [#allocation3], 4096 }
  0x19   :  { %4731 = vsyncadd [#allocation3], 4294963200  ;;  %s82_s13 = scalar_lea.hbm %s5036_s3, 256  ;;  %s4813_s14 = sld [smem:[#allocation4 + $0x4]] }
  0x1a   :  { %s92_s15 = sshll.u32 %s82_s13, 4  ;;  %s4815_s16 = sld [smem:[#allocation4 + $0x5]]  ;;  %v4824_v2 = vld [vmem:[#allocation9 + $0x1] ss:$8 sm:$0xf]  ;;  %s93_s15 = int_to_ptr.hbm [resolvable:$true] %s92_s15 }
  0x1b   :  { %s4817_s17 = sld [smem:[#allocation4 + $0x6]]  ;;  %s4756_s18 = smov [#allocation2 + $0x100]  }
  0x1c   :  { %s94_s19 = sshll.u32 %s4756_s18, 4  ;;  %s4819_s20 = sld [smem:[#allocation4 + $0x7]]  ;;  %s4821_s19 = int_to_ptr.vmem [resolvable:$true] %s94_s19 }
  0x1d   :  { %97 = dma.hbm_to_vmem [thread:$0]  %s93_s15, 4096, %s4821_s19, [#allocation3 + $0x1] }
  0x1e   :  { %v4103_v3 = vld [vmem:[#allocation2 + $0xec] sm:$0xf]  ;;  %v3003_v4 = vld [vmem:[#allocation2 + $0xf8] sm:$0xf0]  ;;  %v3001_v8 = vld [vmem:[#allocation2 + $0xe8] sm:$0xf] }
  0x1f   :  { %v4099_v5 = vld [vmem:[#allocation2 + $0xcc] sm:$0xf]  ;;  %v3006_v6 = vor.u32 %v4103_v3, %v3003_v4  ;;  %v2987_v7 = vld [vmem:[#allocation2 + $0xd8] sm:$0xf0]  ;;  %v4105_v9 = vld [vmem:[#allocation2 + $0xf4] sm:$0xf0] }
  0x20   :  { %v2990_v10 = vor.u32 %v4099_v5, %v2987_v7  ;;  %v3002_v11 = vor.u32 %v4105_v9, %v3001_v8  ;;  %v2985_v12 = vld [vmem:[#allocation2 + $0xc8] sm:$0xf]  ;;  %v4101_v13 = vld [vmem:[#allocation2 + $0xd4] sm:$0xf0]  ;;  %v4095_v14 = vld [vmem:[#allocation2 + $0xac] sm:$0xf] }
  0x21   :  { %339 = vmatpush.bf16.msra.mxu3 %v3006_v6  ;;  %v2971_v15 = vld [vmem:[#allocation2 + $0xb8] sm:$0xf0]  ;;  %v2986_v16 = vor.u32 %v4101_v13, %v2985_v12  ;;  %v4102_v17 = vld [vmem:[#allocation2 + $0xe4] sm:$0xf]  ;;  %v2995_v18 = vld [vmem:[#allocation2 + $0xf0] sm:$0xf0] }
  0x22   :  { %326 = vmatpush.bf16.msra.mxu2 %v3002_v11  ;;  %v2969_v19 = vld [vmem:[#allocation2 + $0xa8] sm:$0xf]  ;;  %v4097_v20 = vld [vmem:[#allocation2 + $0xb4] sm:$0xf0]  ;;  %v2998_v21 = vor.u32 %v4102_v17, %v2995_v18  ;;  %v2993_v22 = vld [vmem:[#allocation2 + $0xe0] sm:$0xf]  ;;  %v2974_v23 = vor.u32 %v4095_v14, %v2971_v15 }
  0x23   :  { %v4091_v24 = vld [vmem:[#allocation2 + $0x8c] sm:$0xf]  ;;  %v4104_v25 = vld [vmem:[#allocation2 + $0xec] sm:$0xf0]  ;;  %v2955_v26 = vld [vmem:[#allocation2 + $0x98] sm:$0xf0]  ;;  %v2970_v30 = vor.u32 %v4097_v20, %v2969_v19 }
  0x24   :  { %313 = vmatpush.bf16.msra.mxu1 %v2998_v21  ;;  %v2994_v27 = vor.u32 %v4104_v25, %v2993_v22  ;;  %v4098_v28 = vld [vmem:[#allocation2 + $0xc4] sm:$0xf]  ;;  %v2979_v29 = vld [vmem:[#allocation2 + $0xd0] sm:$0xf0]  ;;  %v2977_v32 = vld [vmem:[#allocation2 + $0xc0] sm:$0xf]  ;;  %v2958_v38 = vor.u32 %v4091_v24, %v2955_v26 }
  0x25   :  { %340 = vmatpush.bf16.msra.mxu3 %v2990_v10  ;;  %v2982_v31 = vor.u32 %v4098_v28, %v2979_v29  ;;  %v4100_v33 = vld [vmem:[#allocation2 + $0xcc] sm:$0xf0]  ;;  %v2953_v34 = vld [vmem:[#allocation2 + $0x88] sm:$0xf]  ;;  %v4093_v35 = vld [vmem:[#allocation2 + $0x94] sm:$0xf0] }
  0x26   :  { %327 = vmatpush.bf16.msra.mxu2 %v2986_v16  ;;  %300 = vmatpush.bf16.msra.mxu0 %v2994_v27  ;;  %v2978_v36 = vor.u32 %v4100_v33, %v2977_v32  ;;  %v4094_v37 = vld [vmem:[#allocation2 + $0xa4] sm:$0xf]  ;;  %v4087_v39 = vld [vmem:[#allocation2 + $0x6c] sm:$0xf]  ;;  %v2963_v40 = vld [vmem:[#allocation2 + $0xb0] sm:$0xf0]  ;;  %v2954_v45 = vor.u32 %v4093_v35, %v2953_v34  ;;  %v98_v33 = vpack.c.bf16 %v4795_v0, %v4795_v0 }
  0x27   :  { %v2939_v41 = vld [vmem:[#allocation2 + $0x78] sm:$0xf0]  ;;  %v2966_v42 = vor.u32 %v4094_v37, %v2963_v40  ;;  %v2961_v43 = vld [vmem:[#allocation2 + $0xa0] sm:$0xf]  ;;  %v4096_v44 = vld [vmem:[#allocation2 + $0xac] sm:$0xf0] }
  0x28   :  { %314 = vmatpush.bf16.msra.mxu1 %v2982_v31  ;;  %v4090_v46 = vld [vmem:[#allocation2 + $0x84] sm:$0xf]  ;;  %v2947_v47 = vld [vmem:[#allocation2 + $0x90] sm:$0xf0]  ;;  %v2937_v48 = vld [vmem:[#allocation2 + $0x68] sm:$0xf]  ;;  %v2962_v50 = vor.u32 %v4096_v44, %v2961_v43  ;;  %v2942_v51 = vor.u32 %v4087_v39, %v2939_v41 }
  0x29   :  { %341 = vmatpush.bf16.msra.mxu3 %v2974_v23  ;;  %v4089_v49 = vld [vmem:[#allocation2 + $0x74] sm:$0xf0]  ;;  %v2945_v52 = vld [vmem:[#allocation2 + $0x80] sm:$0xf]  ;;  %v4092_v53 = vld [vmem:[#allocation2 + $0x8c] sm:$0xf0]  ;;  %v2950_v56 = vor.u32 %v4090_v46, %v2947_v47 }
  0x2a   :  { %328 = vmatpush.bf16.msra.mxu2 %v2970_v30  ;;  %301 = vmatpush.bf16.msra.mxu0 %v2978_v36  ;;  %v4083_v54 = vld [vmem:[#allocation2 + $0x4c] sm:$0xf]  ;;  %v2923_v55 = vld [vmem:[#allocation2 + $0x58] sm:$0xf0]  ;;  %v2938_v57 = vor.u32 %v4089_v49, %v2937_v48  ;;  %v4086_v58 = vld [vmem:[#allocation2 + $0x64] sm:$0xf]  ;;  %v2946_v62 = vor.u32 %v4092_v53, %v2945_v52 }
  0x2b   :  { %v2931_v59 = vld [vmem:[#allocation2 + $0x70] sm:$0xf0]  ;;  %v2921_v60 = vld [vmem:[#allocation2 + $0x48] sm:$0xf]  ;;  %v4085_v61 = vld [vmem:[#allocation2 + $0x54] sm:$0xf0]  ;;  %v2926_v63 = vor.u32 %v4083_v54, %v2923_v55 }
  0x2c   :  { %315 = vmatpush.bf16.msra.mxu1 %v2966_v42  ;;  %v2929_v3 = vld [vmem:[#allocation2 + $0x60] sm:$0xf]  ;;  %v4088_v4 = vld [vmem:[#allocation2 + $0x6c] sm:$0xf0]  ;;  %v4079_v5 = vld [vmem:[#allocation2 + $0x2c] sm:$0xf]  ;;  %v2934_v7 = vor.u32 %v4086_v58, %v2931_v59  ;;  %v2922_v8 = vor.u32 %v4085_v61, %v2921_v60  ;;  %v356_v58 = vstv %s4804_s8  ;;  %v352_v59 = vstv %s4801_s7 }
  0x2d   :  { %342 = vmatpush.bf16.msra.mxu3 %v2958_v38  ;;  %v2907_v6 = vld [vmem:[#allocation2 + $0x38] sm:$0xf0]  ;;  %v4082_v9 = vld [vmem:[#allocation2 + $0x44] sm:$0xf]  ;;  %v2915_v10 = vld [vmem:[#allocation2 + $0x50] sm:$0xf0]  ;;  %v2930_v13 = vor.u32 %v4088_v4, %v2929_v3  ;;  %v360_v4 = vstv %s4806_s9 }
  0x2e   :  { %329 = vmatpush.bf16.msra.mxu2 %v2954_v45  ;;  %302 = vmatpush.bf16.msra.mxu0 %v2962_v50  ;;  %v2905_v11 = vld [vmem:[#allocation2 + $0x28] sm:$0xf]  ;;  %v4081_v12 = vld [vmem:[#allocation2 + $0x34] sm:$0xf0]  ;;  %v2910_v14 = vor.u32 %v4079_v5, %v2907_v6  ;;  %v2913_v15 = vld [vmem:[#allocation2 + $0x40] sm:$0xf]  ;;  %v2918_v19 = vor.u32 %v4082_v9, %v2915_v10 }
  0x2f   :  { %v4084_v16 = vld [vmem:[#allocation2 + $0x4c] sm:$0xf0]  ;;  %v4075_v17 = vld [vmem:[#allocation2 + $0xc] sm:$0xf]  ;;  %v2891_v18 = vld [vmem:[#allocation2 + $0x18] sm:$0xf0]  ;;  %v2906_v20 = vor.u32 %v4081_v12, %v2905_v11  ;;  %v382_v12 = vstv %s4808_s10 }
  0x30   :  { %316 = vmatpush.bf16.msra.mxu1 %v2950_v56  ;;  %v4078_v21 = vld [vmem:[#allocation2 + $0x24] sm:$0xf]  ;;  %v2899_v22 = vld [vmem:[#allocation2 + $0x30] sm:$0xf0]  ;;  %v2889_v23 = vld [vmem:[#allocation2 + $0x8] sm:$0xf]  ;;  %v2914_v25 = vor.u32 %v4084_v16, %v2913_v15  ;;  %v2894_v26 = vor.u32 %v4075_v17, %v2891_v18 }
  0x31   :  { %343 = vmatpush.bf16.msra.mxu3 %v2942_v51  ;;  %v4077_v24 = vld [vmem:[#allocation2 + $0x14] sm:$0xf0]  ;;  %v2897_v27 = vld [vmem:[#allocation2 + $0x20] sm:$0xf]  ;;  %v4080_v28 = vld [vmem:[#allocation2 + $0x2c] sm:$0xf0]  ;;  %v2902_v29 = vor.u32 %v4078_v21, %v2899_v22 }
  0x32   :  { %330 = vmatpush.bf16.msra.mxu2 %v2938_v57  ;;  %303 = vmatpush.bf16.msra.mxu0 %v2946_v62  ;;  %v2890_v30 = vor.u32 %v4077_v24, %v2889_v23  ;;  %v4074_v31 = vld [vmem:[#allocation2 + $0x4] sm:$0xf]  ;;  %v2883_v32 = vld [vmem:[#allocation2 + $0x10] sm:$0xf0]  ;;  %v2898_v34 = vor.u32 %v4080_v28, %v2897_v27  ;;  %v2881_v35 = vld [vmem:[#allocation2] sm:$0xf] }
  0x33   :  { %v4076_v36 = vld [vmem:[#allocation2 + $0xc] sm:$0xf0]  ;;  %v2886_v37 = vor.u32 %v4074_v31, %v2883_v32  ;;  %v135_v39 = vperm.slane %v4797_v1, 3  ;;  %v134_v47 = vperm.slane %v4797_v1, 2  ;;  %v133_v48 = vperm.slane %v4797_v1, 1 }
  0x34   :  { %317 = vmatpush.bf16.msra.mxu1 %v2934_v7  ;;  %v2882_v38 = vor.u32 %v4076_v36, %v2881_v35  ;;  %v132_v55 = vperm.slane %v4797_v1, 0 }
  0x35   :  { %344 = vmatpush.bf16.msra.mxu3 %v2926_v63 }
  0x36   :  { %331 = vmatpush.bf16.msra.mxu2 %v2922_v8  ;;  %304 = vmatpush.bf16.msra.mxu0 %v2930_v13 }
  0x38   :  { %318 = vmatpush.bf16.msra.mxu1 %v2918_v19 }
  0x39   :  { %345 = vmatpush.bf16.msra.mxu3 %v2910_v14 }
  0x3a   :  { %332 = vmatpush.bf16.msra.mxu2 %v2906_v20  ;;  %305 = vmatpush.bf16.msra.mxu0 %v2914_v25 }
  0x3c   :  { %319 = vmatpush.bf16.msra.mxu1 %v2902_v29 }
  0x3d   :  { %346 = vmatpush.bf16.msra.mxu3 %v2894_v26 }
  0x3e   :  { %333 = vmatpush.bf16.msra.mxu2 %v2890_v30  ;;  %306 = vmatpush.bf16.msra.mxu0 %v2898_v34 }
  0x40   :  { %347 = vmatmul.bf16.vlgmr.msra.gmra.mxu3 %v98_v33  ;;  %320 = vmatpush.bf16.msra.mxu1 %v2886_v37 }
  0x41   :  { %334 = vmatmul.bf16.vlgmr.msra.gmra.mxu2 %v98_v33 }
  0x42   :  { %307 = vmatpush.bf16.msra.mxu0 %v2882_v38 }
  0x43   :  { %321 = vmatmul.bf16.vlgmr.msra.gmra.mxu1 %v98_v33 }
  0x45   :  { %308 = vmatmul.bf16.vlgmr.msra.gmra.mxu0 %v98_v33 }
  0xc0   :  { %v322_v40 = vpop.f32.mrf.mxu1 }
  0xc1   :  { %v323_v54 = vadd.f32 %v322_v40, %v133_v48 }
  0xc2   :  { %v309_v42 = vpop.f32.mrf.mxu0 }
  0xc3   :  { %v348_v0 = vpop.f32.mrf.mxu3  ;;  %v355_v56 = vmax.f32 %v323_v54, 0.0  ;;  %v310_v57 = vadd.f32 %v309_v42, %v132_v55 }
  0xc4   :  { %v349_v41 = vadd.f32 %v348_v0, %v135_v39  ;;  %v335_v43 = vpop.f32.mrf.mxu2 }
  0xc5   :  { %v336_v53 = vadd.f32 %v335_v43, %v134_v47  ;;  %v357_v61 = vmul.f32 %v356_v58, %v355_v56  ;;  %v353_v62 = vmul.f32 %v352_v59, %v310_v57 }
  0xc6   :  { %v3007_v44 = vmul.f32 -1.442695, %v349_v41 }
  0xc7   :  { %v358_v7 = vadd.f32 %v357_v61, %v353_v62 }
  0xc8   :  { %4370 = vpow2.f32 %v3007_v44  ;;  %v324_v45 = vpop.f32.mrf.mxu1 }
  0xca   :  { %v311_v49 = vpop.f32.mrf.mxu0 }
  0xcb   :  { %v350_v46 = vpop.f32.mrf.mxu3 }
  0xcc   :  { %v337_v50 = vpop.f32.mrf.mxu2 }
  0xce   :  { %v4371_v51 = vpop.eup %4370 }
  0xcf   :  { %v366_v52 = vadd.f32 1.0, %v4371_v51 }
  0xd1   :  { %4372 = vrcp.f32 %v366_v52  ;;  %v378_v6 = vand.u32 2147483648, %v366_v52  ;;  %v376_v1 = vand.u32 2147483647, %v366_v52  ;;  %vm372_vm1 = vweird.f32 %v366_v52 }
  0xd2   :  { %4374 = vtanh.f32 %v336_v53 }
  0xd3   :  { %v379_v11 = vor.u32 1.1754944e-38, %v378_v6  ;;  %vm377_vm3 = vcmp.eq.f32.partialorder %v376_v1, 8.507059e+37 }
  0xd7   :  { %v4373_v60 = vpop.eup %4372 }
  0xd8   :  { %v368_v63 = vmul.f32 %v4373_v60, %v366_v52  ;;  %v4375_v3 = vpop.eup %4374  ;;  %vm373_vm0 = vweird.f32 %v4373_v60 }
  0xd9   :  { %v361_v9 = vmul.f32 %v4375_v3, %v360_v4  ;;  %vm374_vm2 = vmor %vm372_vm1, %vm373_vm0 }
  0xda   :  { %v369_v5 = vsub.f32 1.0, %v368_v63 }
  0xdb   :  { %v362_v13 = vadd.f32 %v361_v9, %v358_v7 }
  0xdc   :  { %v370_v8 = vmul.f32 %v4373_v60, %v369_v5 }
  0xde   :  { %v371_v10 = vadd.f32 %v4373_v60, %v370_v8 }
  0xe0   :  { %v375_v14 = vsel %vm374_vm2, %v4373_v60, %v371_v10 }
  0xe1   :  { %v380_v15 = vsel %vm377_vm3, %v379_v11, %v375_v14 }
  0xe2   :  { %v383_v16 = vmul.f32 %v382_v12, %v380_v15 }
  0xe4   :  { %v4836_v17 = vadd.f32 %v383_v16, %v362_v13 }
  0xe5   :  { %4732 = dma.done.wait [#allocation3 + $0x1], 4096 }
  0xe6   :  { %4733 = vsyncadd [#allocation3 + $0x1], 4294963200  ;;  %s393_s23 = scalar_lea.hbm %s5036_s3, 512  ;;  %s4841_s24 = sld [smem:[#allocation4 + $0x8]] }
  0xe7   :  { %s401_s25 = sshll.u32 %s393_s23, 4  ;;  %s4843_s26 = sld [smem:[#allocation4 + $0x9]]  ;;  %v4850_v18 = vld [vmem:[#allocation9 + $0x2] ss:$8 sm:$0xf]  ;;  %s402_s25 = int_to_ptr.hbm [resolvable:$true] %s401_s25 }
  0xe8   :  { %s4845_s27 = sld [smem:[#allocation4 + $0xa]] }
  0xe9   :  { %s4847_s28 = sld [smem:[#allocation4 + $0xb]] }
  0xea   :  { %406 = dma.hbm_to_vmem [thread:$0]  %s402_s25, 4096, %s4799_s6, [#allocation3] }
  0xeb   :  { %v4135_v19 = vld [vmem:[#allocation2 + $0x1ec] sm:$0xf]  ;;  %v3136_v20 = vld [vmem:[#allocation2 + $0x1f8] sm:$0xf0]  ;;  %v3134_v24 = vld [vmem:[#allocation2 + $0x1e8] sm:$0xf] }
  0xec   :  { %v4131_v21 = vld [vmem:[#allocation2 + $0x1cc] sm:$0xf]  ;;  %v3139_v22 = vor.u32 %v4135_v19, %v3136_v20  ;;  %v3120_v23 = vld [vmem:[#allocation2 + $0x1d8] sm:$0xf0]  ;;  %v4137_v25 = vld [vmem:[#allocation2 + $0x1f4] sm:$0xf0] }
  0xed   :  { %v3123_v26 = vor.u32 %v4131_v21, %v3120_v23  ;;  %v3135_v27 = vor.u32 %v4137_v25, %v3134_v24  ;;  %v3118_v28 = vld [vmem:[#allocation2 + $0x1c8] sm:$0xf]  ;;  %v4133_v29 = vld [vmem:[#allocation2 + $0x1d4] sm:$0xf0]  ;;  %v4127_v30 = vld [vmem:[#allocation2 + $0x1ac] sm:$0xf] }
  0xee   :  { %648 = vmatpush.bf16.msrb.mxu3 %v3139_v22  ;;  %v3104_v31 = vld [vmem:[#allocation2 + $0x1b8] sm:$0xf0]  ;;  %v3119_v32 = vor.u32 %v4133_v29, %v3118_v28  ;;  %v4134_v33 = vld [vmem:[#allocation2 + $0x1e4] sm:$0xf]  ;;  %v3128_v34 = vld [vmem:[#allocation2 + $0x1f0] sm:$0xf0] }
  0xef   :  { %635 = vmatpush.bf16.msrb.mxu2 %v3135_v27  ;;  %v3102_v35 = vld [vmem:[#allocation2 + $0x1a8] sm:$0xf]  ;;  %v4129_v36 = vld [vmem:[#allocation2 + $0x1b4] sm:$0xf0]  ;;  %v3131_v37 = vor.u32 %v4134_v33, %v3128_v34  ;;  %v3126_v38 = vld [vmem:[#allocation2 + $0x1e0] sm:$0xf]  ;;  %v3107_v39 = vor.u32 %v4127_v30, %v3104_v31 }
  0xf0   :  { %v4123_v40 = vld [vmem:[#allocation2 + $0x18c] sm:$0xf]  ;;  %v4136_v0 = vld [vmem:[#allocation2 + $0x1ec] sm:$0xf0]  ;;  %v3088_v41 = vld [vmem:[#allocation2 + $0x198] sm:$0xf0]  ;;  %v3103_v45 = vor.u32 %v4129_v36, %v3102_v35 }
  0xf1   :  { %622 = vmatpush.bf16.msrb.mxu1 %v3131_v37  ;;  %v3127_v42 = vor.u32 %v4136_v0, %v3126_v38  ;;  %v4130_v43 = vld [vmem:[#allocation2 + $0x1c4] sm:$0xf]  ;;  %v3112_v44 = vld [vmem:[#allocation2 + $0x1d0] sm:$0xf0]  ;;  %v3110_v47 = vld [vmem:[#allocation2 + $0x1c0] sm:$0xf]  ;;  %v3091_v53 = vor.u32 %v4123_v40, %v3088_v41 }
  0xf2   :  { %649 = vmatpush.bf16.msrb.mxu3 %v3123_v26  ;;  %v3115_v46 = vor.u32 %v4130_v43, %v3112_v44  ;;  %v4132_v48 = vld [vmem:[#allocation2 + $0x1cc] sm:$0xf0]  ;;  %v3086_v49 = vld [vmem:[#allocation2 + $0x188] sm:$0xf]  ;;  %v4125_v50 = vld [vmem:[#allocation2 + $0x194] sm:$0xf0] }
  0xf3   :  { %636 = vmatpush.bf16.msrb.mxu2 %v3119_v32  ;;  %609 = vmatpush.bf16.msrb.mxu0 %v3127_v42  ;;  %v3111_v51 = vor.u32 %v4132_v48, %v3110_v47  ;;  %v4126_v52 = vld [vmem:[#allocation2 + $0x1a4] sm:$0xf]  ;;  %v4119_v54 = vld [vmem:[#allocation2 + $0x16c] sm:$0xf]  ;;  %v3096_v55 = vld [vmem:[#allocation2 + $0x1b0] sm:$0xf0]  ;;  %v3087_v60 = vor.u32 %v4125_v50, %v3086_v49  ;;  %v407_v48 = vpack.c.bf16 %v4836_v17, %v4836_v17 }
  0xf4   :  { %v3072_v56 = vld [vmem:[#allocation2 + $0x178] sm:$0xf0]  ;;  %v3099_v57 = vor.u32 %v4126_v52, %v3096_v55  ;;  %v3094_v58 = vld [vmem:[#allocation2 + $0x1a0] sm:$0xf]  ;;  %v4128_v59 = vld [vmem:[#allocation2 + $0x1ac] sm:$0xf0] }
  0xf5   :  { %623 = vmatpush.bf16.msrb.mxu1 %v3115_v46  ;;  %v4122_v61 = vld [vmem:[#allocation2 + $0x184] sm:$0xf]  ;;  %v3080_v62 = vld [vmem:[#allocation2 + $0x190] sm:$0xf0]  ;;  %v3070_v63 = vld [vmem:[#allocation2 + $0x168] sm:$0xf]  ;;  %v3095_v4 = vor.u32 %v4128_v59, %v3094_v58  ;;  %v3075_v5 = vor.u32 %v4119_v54, %v3072_v56 }
  0xf6   :  { %650 = vmatpush.bf16.msrb.mxu3 %v3107_v39  ;;  %v4121_v3 = vld [vmem:[#allocation2 + $0x174] sm:$0xf0]  ;;  %v3078_v6 = vld [vmem:[#allocation2 + $0x180] sm:$0xf]  ;;  %v4124_v7 = vld [vmem:[#allocation2 + $0x18c] sm:$0xf0]  ;;  %v3083_v1 = vor.u32 %v4122_v61, %v3080_v62 }
  0xf7   :  { %637 = vmatpush.bf16.msrb.mxu2 %v3103_v45  ;;  %610 = vmatpush.bf16.msrb.mxu0 %v3111_v51  ;;  %v4115_v8 = vld [vmem:[#allocation2 + $0x14c] sm:$0xf]  ;;  %v3056_v9 = vld [vmem:[#allocation2 + $0x158] sm:$0xf0]  ;;  %v3071_v10 = vor.u32 %v4121_v3, %v3070_v63  ;;  %v4118_v11 = vld [vmem:[#allocation2 + $0x164] sm:$0xf]  ;;  %v3079_v15 = vor.u32 %v4124_v7, %v3078_v6 }
  0xf8   :  { %v3064_v12 = vld [vmem:[#allocation2 + $0x170] sm:$0xf0]  ;;  %v3054_v13 = vld [vmem:[#allocation2 + $0x148] sm:$0xf]  ;;  %v4117_v14 = vld [vmem:[#allocation2 + $0x154] sm:$0xf0]  ;;  %v3059_v16 = vor.u32 %v4115_v8, %v3056_v9 }
  0xf9   :  { %624 = vmatpush.bf16.msrb.mxu1 %v3099_v57  ;;  %v3062_v19 = vld [vmem:[#allocation2 + $0x160] sm:$0xf]  ;;  %v4120_v20 = vld [vmem:[#allocation2 + $0x16c] sm:$0xf0]  ;;  %v4111_v21 = vld [vmem:[#allocation2 + $0x12c] sm:$0xf]  ;;  %v3067_v23 = vor.u32 %v4118_v11, %v3064_v12  ;;  %v3055_v24 = vor.u32 %v4117_v14, %v3054_v13  ;;  %v665_v11 = vstv %s4815_s16  ;;  %v661_v12 = vstv %s4813_s14 }
  0xfa   :  { %651 = vmatpush.bf16.msrb.mxu3 %v3091_v53  ;;  %v3040_v22 = vld [vmem:[#allocation2 + $0x138] sm:$0xf0]  ;;  %v4114_v25 = vld [vmem:[#allocation2 + $0x144] sm:$0xf]  ;;  %v3048_v26 = vld [vmem:[#allocation2 + $0x150] sm:$0xf0]  ;;  %v3063_v29 = vor.u32 %v4120_v20, %v3062_v19  ;;  %v669_v20 = vstv %s4817_s17 }
  0xfb   :  { %638 = vmatpush.bf16.msrb.mxu2 %v3087_v60  ;;  %611 = vmatpush.bf16.msrb.mxu0 %v3095_v4  ;;  %v3038_v27 = vld [vmem:[#allocation2 + $0x128] sm:$0xf]  ;;  %v4113_v28 = vld [vmem:[#allocation2 + $0x134] sm:$0xf0]  ;;  %v3043_v30 = vor.u32 %v4111_v21, %v3040_v22  ;;  %v3046_v31 = vld [vmem:[#allocation2 + $0x140] sm:$0xf]  ;;  %v3051_v35 = vor.u32 %v4114_v25, %v3048_v26 }
  0xfc   :  { %v4116_v32 = vld [vmem:[#allocation2 + $0x14c] sm:$0xf0]  ;;  %v4107_v33 = vld [vmem:[#allocation2 + $0x10c] sm:$0xf]  ;;  %v3024_v34 = vld [vmem:[#allocation2 + $0x118] sm:$0xf0]  ;;  %v3039_v36 = vor.u32 %v4113_v28, %v3038_v27  ;;  %v691_v28 = vstv %s4819_s20 }
  0xfd   :  { %625 = vmatpush.bf16.msrb.mxu1 %v3083_v1  ;;  %v4110_v37 = vld [vmem:[#allocation2 + $0x124] sm:$0xf]  ;;  %v3032_v38 = vld [vmem:[#allocation2 + $0x130] sm:$0xf0]  ;;  %v3022_v39 = vld [vmem:[#allocation2 + $0x108] sm:$0xf]  ;;  %v3047_v0 = vor.u32 %v4116_v32, %v3046_v31  ;;  %v3027_v41 = vor.u32 %v4107_v33, %v3024_v34 }
  0xfe   :  { %652 = vmatpush.bf16.msrb.mxu3 %v3075_v5  ;;  %v4109_v40 = vld [vmem:[#allocation2 + $0x114] sm:$0xf0]  ;;  %v3030_v42 = vld [vmem:[#allocation2 + $0x120] sm:$0xf]  ;;  %v4112_v43 = vld [vmem:[#allocation2 + $0x12c] sm:$0xf0]  ;;  %v3035_v44 = vor.u32 %v4110_v37, %v3032_v38 }
  0xff   :  { %639 = vmatpush.bf16.msrb.mxu2 %v3071_v10  ;;  %612 = vmatpush.bf16.msrb.mxu0 %v3079_v15  ;;  %v3023_v45 = vor.u32 %v4109_v40, %v3022_v39  ;;  %v4106_v46 = vld [vmem:[#allocation2 + $0x104] sm:$0xf]  ;;  %v3016_v47 = vld [vmem:[#allocation2 + $0x110] sm:$0xf0]  ;;  %v3031_v49 = vor.u32 %v4112_v43, %v3030_v42  ;;  %v3014_v50 = vld [vmem:[#allocation2 + $0x100] sm:$0xf] }
 0x100   :  { %v4108_v51 = vld [vmem:[#allocation2 + $0x10c] sm:$0xf0]  ;;  %v3019_v52 = vor.u32 %v4106_v46, %v3016_v47  ;;  %v444_v54 = vperm.slane %v4824_v2, 3  ;;  %v443_v62 = vperm.slane %v4824_v2, 2  ;;  %v442_v63 = vperm.slane %v4824_v2, 1 }
 0x101   :  { %626 = vmatpush.bf16.msrb.mxu1 %v3067_v23  ;;  %v3015_v53 = vor.u32 %v4108_v51, %v3014_v50  ;;  %v441_v9 = vperm.slane %v4824_v2, 0 }
 0x102   :  { %653 = vmatpush.bf16.msrb.mxu3 %v3059_v16 }
 0x103   :  { %640 = vmatpush.bf16.msrb.mxu2 %v3055_v24  ;;  %613 = vmatpush.bf16.msrb.mxu0 %v3063_v29 }
 0x105   :  { %627 = vmatpush.bf16.msrb.mxu1 %v3051_v35 }
 0x106   :  { %654 = vmatpush.bf16.msrb.mxu3 %v3043_v30 }
 0x107   :  { %641 = vmatpush.bf16.msrb.mxu2 %v3039_v36  ;;  %614 = vmatpush.bf16.msrb.mxu0 %v3047_v0 }
 0x109   :  { %628 = vmatpush.bf16.msrb.mxu1 %v3035_v44 }
 0x10a   :  { %655 = vmatpush.bf16.msrb.mxu3 %v3027_v41 }
 0x10b   :  { %642 = vmatpush.bf16.msrb.mxu2 %v3023_v45  ;;  %615 = vmatpush.bf16.msrb.mxu0 %v3031_v49 }
 0x10d   :  { %656 = vmatmul.bf16.vlgmr.msrb.gmra.mxu3 %v407_v48  ;;  %629 = vmatpush.bf16.msrb.mxu1 %v3019_v52 }
 0x10e   :  { %643 = vmatmul.bf16.vlgmr.msrb.gmra.mxu2 %v407_v48 }
 0x10f   :  { %616 = vmatpush.bf16.msrb.mxu0 %v3015_v53 }
 0x110   :  { %630 = vmatmul.bf16.vlgmr.msrb.gmra.mxu1 %v407_v48 }
 0x112   :  { %617 = vmatmul.bf16.vlgmr.msrb.gmra.mxu0 %v407_v48 }
 0x18d   :  { %v631_v55 = vpop.f32.mrf.mxu1 }
 0x18e   :  { %v632_v8 = vadd.f32 %v631_v55, %v442_v63 }
 0x18f   :  { %v618_v57 = vpop.f32.mrf.mxu0 }
 0x190   :  { %v657_v17 = vpop.f32.mrf.mxu3  ;;  %v664_v1 = vmax.f32 %v632_v8, 0.0  ;;  %v619_v10 = vadd.f32 %v618_v57, %v441_v9 }
 0x191   :  { %v658_v56 = vadd.f32 %v657_v17, %v444_v54  ;;  %v644_v58 = vpop.f32.mrf.mxu2 }
 0x192   :  { %v645_v7 = vadd.f32 %v644_v58, %v443_v62  ;;  %v666_v14 = vmul.f32 %v665_v11, %v664_v1  ;;  %v662_v15 = vmul.f32 %v661_v12, %v619_v10 }
 0x193   :  { %v3140_v59 = vmul.f32 -1.442695, %v658_v56 }
 0x194   :  { %v667_v23 = vadd.f32 %v666_v14, %v662_v15 }
 0x195   :  { %4376 = vpow2.f32 %v3140_v59  ;;  %v633_v60 = vpop.f32.mrf.mxu1 }
 0x197   :  { %v620_v3 = vpop.f32.mrf.mxu0 }
 0x198   :  { %v659_v61 = vpop.f32.mrf.mxu3 }
 0x199   :  { %v646_v4 = vpop.f32.mrf.mxu2 }
 0x19b   :  { %v4377_v5 = vpop.eup %4376 }
 0x19c   :  { %v675_v6 = vadd.f32 1.0, %v4377_v5 }
 0x19e   :  { %4378 = vrcp.f32 %v675_v6  ;;  %v687_v22 = vand.u32 2147483648, %v675_v6  ;;  %v685_v2 = vand.u32 2147483647, %v675_v6  ;;  %vm681_vm5 = vweird.f32 %v675_v6 }
 0x19f   :  { %4380 = vtanh.f32 %v645_v7 }
 0x1a0   :  { %v688_v27 = vor.u32 1.1754944e-38, %v687_v22  ;;  %vm686_vm7 = vcmp.eq.f32.partialorder %v685_v2, 8.507059e+37 }
 0x1a4   :  { %v4379_v13 = vpop.eup %4378 }
 0x1a5   :  { %v677_v16 = vmul.f32 %v4379_v13, %v675_v6  ;;  %v4381_v19 = vpop.eup %4380  ;;  %vm682_vm4 = vweird.f32 %v4379_v13 }
 0x1a6   :  { %v670_v25 = vmul.f32 %v4381_v19, %v669_v20  ;;  %vm683_vm6 = vmor %vm681_vm5, %vm682_vm4 }
 0x1a7   :  { %v678_v21 = vsub.f32 1.0, %v677_v16 }
 0x1a8   :  { %v671_v29 = vadd.f32 %v670_v25, %v667_v23 }
 0x1a9   :  { %v679_v24 = vmul.f32 %v4379_v13, %v678_v21 }
 0x1ab   :  { %v680_v26 = vadd.f32 %v4379_v13, %v679_v24 }
 0x1ad   :  { %v684_v30 = vsel %vm683_vm6, %v4379_v13, %v680_v26 }
 0x1ae   :  { %v689_v31 = vsel %vm686_vm7, %v688_v27, %v684_v30 }
 0x1af   :  { %v692_v32 = vmul.f32 %v691_v28, %v689_v31 }
 0x1b1   :  { %v4862_v33 = vadd.f32 %v692_v32, %v671_v29 }
 0x1b2   :  { %4734 = dma.done.wait [#allocation3], 4096 }
 0x1b3   :  { %4735 = vsyncadd [#allocation3], 4294963200  ;;  %s702_s1 = scalar_lea.hbm %s5036_s3, 768  ;;  %s4867_s30 = sld [smem:[#allocation4 + $0xc]] }
 0x1b4   :  { %s710_s2 = sshll.u32 %s702_s1, 4  ;;  %s4869_s5 = sld [smem:[#allocation4 + $0xd]]  ;;  %v4876_v34 = vld [vmem:[#allocation9 + $0x3] ss:$8 sm:$0xf]  ;;  %s711_s2 = int_to_ptr.hbm [resolvable:$true] %s710_s2 }
 0x1b5   :  { %s4871_s7 = sld [smem:[#allocation4 + $0xe]] }
 0x1b6   :  { %s4873_s8 = sld [smem:[#allocation4 + $0xf]] }
 0x1b7   :  { %715 = dma.hbm_to_vmem [thread:$0]  %s711_s2, 4096, %s4821_s19, [#allocation3 + $0x1] }
 0x1b8   :  { %v4167_v35 = vld [vmem:[#allocation2 + $0xec] sm:$0xf]  ;;  %v3269_v36 = vld [vmem:[#allocation2 + $0xf8] sm:$0xf0]  ;;  %v3267_v40 = vld [vmem:[#allocation2 + $0xe8] sm:$0xf] }
 0x1b9   :  { %v4163_v37 = vld [vmem:[#allocation2 + $0xcc] sm:$0xf]  ;;  %v3272_v38 = vor.u32 %v4167_v35, %v3269_v36  ;;  %v3253_v39 = vld [vmem:[#allocation2 + $0xd8] sm:$0xf0]  ;;  %v4169_v0 = vld [vmem:[#allocation2 + $0xf4] sm:$0xf0] }
 0x1ba   :  { %v3256_v41 = vor.u32 %v4163_v37, %v3253_v39  ;;  %v3268_v42 = vor.u32 %v4169_v0, %v3267_v40  ;;  %v3251_v43 = vld [vmem:[#allocation2 + $0xc8] sm:$0xf]  ;;  %v4165_v44 = vld [vmem:[#allocation2 + $0xd4] sm:$0xf0]  ;;  %v4159_v45 = vld [vmem:[#allocation2 + $0xac] sm:$0xf] }
 0x1bb   :  { %957 = vmatpush.bf16.msra.mxu3 %v3272_v38  ;;  %v3237_v46 = vld [vmem:[#allocation2 + $0xb8] sm:$0xf0]  ;;  %v3252_v47 = vor.u32 %v4165_v44, %v3251_v43  ;;  %v4166_v48 = vld [vmem:[#allocation2 + $0xe4] sm:$0xf]  ;;  %v3261_v49 = vld [vmem:[#allocation2 + $0xf0] sm:$0xf0] }
 0x1bc   :  { %944 = vmatpush.bf16.msra.mxu2 %v3268_v42  ;;  %v3235_v50 = vld [vmem:[#allocation2 + $0xa8] sm:$0xf]  ;;  %v4161_v51 = vld [vmem:[#allocation2 + $0xb4] sm:$0xf0]  ;;  %v3264_v52 = vor.u32 %v4166_v48, %v3261_v49  ;;  %v3259_v53 = vld [vmem:[#allocation2 + $0xe0] sm:$0xf]  ;;  %v3240_v54 = vor.u32 %v4159_v45, %v3237_v46 }
 0x1bd   :  { %v4155_v55 = vld [vmem:[#allocation2 + $0x8c] sm:$0xf]  ;;  %v4168_v17 = vld [vmem:[#allocation2 + $0xec] sm:$0xf0]  ;;  %v3221_v56 = vld [vmem:[#allocation2 + $0x98] sm:$0xf0]  ;;  %v3236_v60 = vor.u32 %v4161_v51, %v3235_v50 }
 0x1be   :  { %931 = vmatpush.bf16.msra.mxu1 %v3264_v52  ;;  %v3260_v57 = vor.u32 %v4168_v17, %v3259_v53  ;;  %v4162_v58 = vld [vmem:[#allocation2 + $0xc4] sm:$0xf]  ;;  %v3245_v59 = vld [vmem:[#allocation2 + $0xd0] sm:$0xf0]  ;;  %v3243_v62 = vld [vmem:[#allocation2 + $0xc0] sm:$0xf]  ;;  %v3224_v7 = vor.u32 %v4155_v55, %v3221_v56 }
 0x1bf   :  { %958 = vmatpush.bf16.msra.mxu3 %v3256_v41  ;;  %v3248_v61 = vor.u32 %v4162_v58, %v3245_v59  ;;  %v4164_v63 = vld [vmem:[#allocation2 + $0xcc] sm:$0xf0]  ;;  %v3219_v3 = vld [vmem:[#allocation2 + $0x88] sm:$0xf]  ;;  %v4157_v4 = vld [vmem:[#allocation2 + $0x94] sm:$0xf0] }
 0x1c0   :  { %945 = vmatpush.bf16.msra.mxu2 %v3252_v47  ;;  %918 = vmatpush.bf16.msra.mxu0 %v3260_v57  ;;  %v3244_v5 = vor.u32 %v4164_v63, %v3243_v62  ;;  %v4158_v6 = vld [vmem:[#allocation2 + $0xa4] sm:$0xf]  ;;  %v4151_v8 = vld [vmem:[#allocation2 + $0x6c] sm:$0xf]  ;;  %v3229_v9 = vld [vmem:[#allocation2 + $0xb0] sm:$0xf0]  ;;  %v3220_v13 = vor.u32 %v4157_v4, %v3219_v3  ;;  %v716_v63 = vpack.c.bf16 %v4862_v33, %v4862_v33 }
 0x1c1   :  { %v3205_v1 = vld [vmem:[#allocation2 + $0x78] sm:$0xf0]  ;;  %v3232_v10 = vor.u32 %v4158_v6, %v3229_v9  ;;  %v3227_v11 = vld [vmem:[#allocation2 + $0xa0] sm:$0xf]  ;;  %v4160_v12 = vld [vmem:[#allocation2 + $0xac] sm:$0xf0] }
 0x1c2   :  { %932 = vmatpush.bf16.msra.mxu1 %v3248_v61  ;;  %v4154_v14 = vld [vmem:[#allocation2 + $0x84] sm:$0xf]  ;;  %v3213_v15 = vld [vmem:[#allocation2 + $0x90] sm:$0xf0]  ;;  %v3203_v16 = vld [vmem:[#allocation2 + $0x68] sm:$0xf]  ;;  %v3228_v20 = vor.u32 %v4160_v12, %v3227_v11  ;;  %v3208_v21 = vor.u32 %v4151_v8, %v3205_v1 }
 0x1c3   :  { %959 = vmatpush.bf16.msra.mxu3 %v3240_v54  ;;  %v4153_v19 = vld [vmem:[#allocation2 + $0x74] sm:$0xf0]  ;;  %v3211_v22 = vld [vmem:[#allocation2 + $0x80] sm:$0xf]  ;;  %v4156_v23 = vld [vmem:[#allocation2 + $0x8c] sm:$0xf0]  ;;  %v3216_v2 = vor.u32 %v4154_v14, %v3213_v15 }
 0x1c4   :  { %946 = vmatpush.bf16.msra.mxu2 %v3236_v60  ;;  %919 = vmatpush.bf16.msra.mxu0 %v3244_v5  ;;  %v4147_v24 = vld [vmem:[#allocation2 + $0x4c] sm:$0xf]  ;;  %v3189_v25 = vld [vmem:[#allocation2 + $0x58] sm:$0xf0]  ;;  %v3204_v26 = vor.u32 %v4153_v19, %v3203_v16  ;;  %v4150_v27 = vld [vmem:[#allocation2 + $0x64] sm:$0xf]  ;;  %v3212_v31 = vor.u32 %v4156_v23, %v3211_v22 }
 0x1c5   :  { %v3197_v28 = vld [vmem:[#allocation2 + $0x70] sm:$0xf0]  ;;  %v3187_v29 = vld [vmem:[#allocation2 + $0x48] sm:$0xf]  ;;  %v4149_v30 = vld [vmem:[#allocation2 + $0x54] sm:$0xf0]  ;;  %v3192_v32 = vor.u32 %v4147_v24, %v3189_v25 }
 0x1c6   :  { %933 = vmatpush.bf16.msra.mxu1 %v3232_v10  ;;  %v3195_v35 = vld [vmem:[#allocation2 + $0x60] sm:$0xf]  ;;  %v4152_v36 = vld [vmem:[#allocation2 + $0x6c] sm:$0xf0]  ;;  %v4143_v37 = vld [vmem:[#allocation2 + $0x2c] sm:$0xf]  ;;  %v3200_v39 = vor.u32 %v4150_v27, %v3197_v28  ;;  %v3188_v40 = vor.u32 %v4149_v30, %v3187_v29  ;;  %v974_v27 = vstv %s4843_s26  ;;  %v970_v28 = vstv %s4841_s24 }
 0x1c7   :  { %960 = vmatpush.bf16.msra.mxu3 %v3224_v7  ;;  %v3173_v38 = vld [vmem:[#allocation2 + $0x38] sm:$0xf0]  ;;  %v4146_v0 = vld [vmem:[#allocation2 + $0x44] sm:$0xf]  ;;  %v3181_v41 = vld [vmem:[#allocation2 + $0x50] sm:$0xf0]  ;;  %v3196_v44 = vor.u32 %v4152_v36, %v3195_v35  ;;  %v978_v36 = vstv %s4845_s27 }
 0x1c8   :  { %947 = vmatpush.bf16.msra.mxu2 %v3220_v13  ;;  %920 = vmatpush.bf16.msra.mxu0 %v3228_v20  ;;  %v3171_v42 = vld [vmem:[#allocation2 + $0x28] sm:$0xf]  ;;  %v4145_v43 = vld [vmem:[#allocation2 + $0x34] sm:$0xf0]  ;;  %v3176_v45 = vor.u32 %v4143_v37, %v3173_v38  ;;  %v3179_v46 = vld [vmem:[#allocation2 + $0x40] sm:$0xf]  ;;  %v3184_v50 = vor.u32 %v4146_v0, %v3181_v41 }
 0x1c9   :  { %v4148_v47 = vld [vmem:[#allocation2 + $0x4c] sm:$0xf0]  ;;  %v4139_v48 = vld [vmem:[#allocation2 + $0xc] sm:$0xf]  ;;  %v3157_v49 = vld [vmem:[#allocation2 + $0x18] sm:$0xf0]  ;;  %v3172_v51 = vor.u32 %v4145_v43, %v3171_v42  ;;  %v1000_v43 = vstv %s4847_s28 }
 0x1ca   :  { %934 = vmatpush.bf16.msra.mxu1 %v3216_v2  ;;  %v4142_v52 = vld [vmem:[#allocation2 + $0x24] sm:$0xf]  ;;  %v3165_v53 = vld [vmem:[#allocation2 + $0x30] sm:$0xf0]  ;;  %v3155_v54 = vld [vmem:[#allocation2 + $0x8] sm:$0xf]  ;;  %v3180_v17 = vor.u32 %v4148_v47, %v3179_v46  ;;  %v3160_v56 = vor.u32 %v4139_v48, %v3157_v49 }
 0x1cb   :  { %961 = vmatpush.bf16.msra.mxu3 %v3208_v21  ;;  %v4141_v55 = vld [vmem:[#allocation2 + $0x14] sm:$0xf0]  ;;  %v3163_v57 = vld [vmem:[#allocation2 + $0x20] sm:$0xf]  ;;  %v4144_v58 = vld [vmem:[#allocation2 + $0x2c] sm:$0xf0]  ;;  %v3168_v59 = vor.u32 %v4142_v52, %v3165_v53 }
 0x1cc   :  { %948 = vmatpush.bf16.msra.mxu2 %v3204_v26  ;;  %921 = vmatpush.bf16.msra.mxu0 %v3212_v31  ;;  %v3156_v60 = vor.u32 %v4141_v55, %v3155_v54  ;;  %v4138_v61 = vld [vmem:[#allocation2 + $0x4] sm:$0xf]  ;;  %v3149_v62 = vld [vmem:[#allocation2 + $0x10] sm:$0xf0]  ;;  %v3164_v3 = vor.u32 %v4144_v58, %v3163_v57  ;;  %v3147_v4 = vld [vmem:[#allocation2] sm:$0xf] }
 0x1cd   :  { %v4140_v5 = vld [vmem:[#allocation2 + $0xc] sm:$0xf0]  ;;  %v3152_v6 = vor.u32 %v4138_v61, %v3149_v62  ;;  %v753_v8 = vperm.slane %v4850_v18, 3  ;;  %v752_v15 = vperm.slane %v4850_v18, 2  ;;  %v751_v16 = vperm.slane %v4850_v18, 1 }
 0x1ce   :  { %935 = vmatpush.bf16.msra.mxu1 %v3200_v39  ;;  %v3148_v7 = vor.u32 %v4140_v5, %v3147_v4  ;;  %v750_v25 = vperm.slane %v4850_v18, 0 }
 0x1cf   :  { %962 = vmatpush.bf16.msra.mxu3 %v3192_v32 }
 0x1d0   :  { %949 = vmatpush.bf16.msra.mxu2 %v3188_v40  ;;  %922 = vmatpush.bf16.msra.mxu0 %v3196_v44 }
 0x1d2   :  { %936 = vmatpush.bf16.msra.mxu1 %v3184_v50 }
 0x1d3   :  { %963 = vmatpush.bf16.msra.mxu3 %v3176_v45 }
 0x1d4   :  { %950 = vmatpush.bf16.msra.mxu2 %v3172_v51  ;;  %923 = vmatpush.bf16.msra.mxu0 %v3180_v17 }
 0x1d6   :  { %937 = vmatpush.bf16.msra.mxu1 %v3168_v59 }
 0x1d7   :  { %964 = vmatpush.bf16.msra.mxu3 %v3160_v56 }
 0x1d8   :  { %951 = vmatpush.bf16.msra.mxu2 %v3156_v60  ;;  %924 = vmatpush.bf16.msra.mxu0 %v3164_v3 }
 0x1da   :  { %965 = vmatmul.bf16.vlgmr.msra.gmra.mxu3 %v716_v63  ;;  %938 = vmatpush.bf16.msra.mxu1 %v3152_v6 }
 0x1db   :  { %952 = vmatmul.bf16.vlgmr.msra.gmra.mxu2 %v716_v63 }
 0x1dc   :  { %925 = vmatpush.bf16.msra.mxu0 %v3148_v7 }
 0x1dd   :  { %939 = vmatmul.bf16.vlgmr.msra.gmra.mxu1 %v716_v63 }
 0x1df   :  { %926 = vmatmul.bf16.vlgmr.msra.gmra.mxu0 %v716_v63 }
 0x25a   :  { %v940_v9 = vpop.f32.mrf.mxu1 }
 0x25b   :  { %v941_v24 = vadd.f32 %v940_v9, %v751_v16 }
 0x25c   :  { %v927_v10 = vpop.f32.mrf.mxu0 }
 0x25d   :  { %v966_v33 = vpop.f32.mrf.mxu3  ;;  %v973_v2 = vmax.f32 %v941_v24, 0.0  ;;  %v928_v26 = vadd.f32 %v927_v10, %v750_v25 }
 0x25e   :  { %v967_v1 = vadd.f32 %v966_v33, %v753_v8  ;;  %v953_v11 = vpop.f32.mrf.mxu2 }
 0x25f   :  { %v954_v23 = vadd.f32 %v953_v11, %v752_v15  ;;  %v975_v30 = vmul.f32 %v974_v27, %v973_v2  ;;  %v971_v31 = vmul.f32 %v970_v28, %v928_v26 }
 0x260   :  { %v3273_v12 = vmul.f32 -1.442695, %v967_v1 }
 0x261   :  { %v976_v39 = vadd.f32 %v975_v30, %v971_v31 }
 0x262   :  { %4382 = vpow2.f32 %v3273_v12  ;;  %v942_v13 = vpop.f32.mrf.mxu1 }
 0x264   :  { %v929_v19 = vpop.f32.mrf.mxu0 }
 0x265   :  { %v968_v14 = vpop.f32.mrf.mxu3 }
 0x266   :  { %v955_v20 = vpop.f32.mrf.mxu2 }
 0x268   :  { %v4383_v21 = vpop.eup %4382 }
 0x269   :  { %v984_v22 = vadd.f32 1.0, %v4383_v21 }
 0x26b   :  { %4384 = vrcp.f32 %v984_v22  ;;  %v996_v38 = vand.u32 2147483648, %v984_v22  ;;  %v994_v18 = vand.u32 2147483647, %v984_v22  ;;  %vm990_vm9 = vweird.f32 %v984_v22 }
 0x26c   :  { %4386 = vtanh.f32 %v954_v23 }
 0x26d   :  { %v997_v42 = vor.u32 1.1754944e-38, %v996_v38  ;;  %vm995_vm11 = vcmp.eq.f32.partialorder %v994_v18, 8.507059e+37 }
 0x271   :  { %v4385_v29 = vpop.eup %4384 }
 0x272   :  { %v986_v32 = vmul.f32 %v4385_v29, %v984_v22  ;;  %v4387_v35 = vpop.eup %4386  ;;  %vm991_vm8 = vweird.f32 %v4385_v29 }
 0x273   :  { %v979_v0 = vmul.f32 %v4387_v35, %v978_v36  ;;  %vm992_vm10 = vmor %vm990_vm9, %vm991_vm8 }
 0x274   :  { %v987_v37 = vsub.f32 1.0, %v986_v32 }
 0x275   :  { %v980_v44 = vadd.f32 %v979_v0, %v976_v39 }
 0x276   :  { %v988_v40 = vmul.f32 %v4385_v29, %v987_v37 }
 0x278   :  { %v989_v41 = vadd.f32 %v4385_v29, %v988_v40 }
 0x27a   :  { %v993_v45 = vsel %vm992_vm10, %v4385_v29, %v989_v41 }
 0x27b   :  { %v998_v46 = vsel %vm995_vm11, %v997_v42, %v993_v45 }
 0x27c   :  { %v1001_v47 = vmul.f32 %v1000_v43, %v998_v46 }
 0x27e   :  { %v4888_v48 = vadd.f32 %v1001_v47, %v980_v44 }
 0x27f   :  { %4736 = dma.done.wait [#allocation3 + $0x1], 4096 }
 0x280   :  { %4737 = vsyncadd [#allocation3 + $0x1], 4294963200  ;;  %s1011_s11 = scalar_lea.hbm %s5036_s3, 1024  ;;  %s4893_s12 = sld [smem:[#allocation4 + $0x10]] }
 0x281   :  { %s1019_s13 = sshll.u32 %s1011_s11, 4  ;;  %s4895_s14 = sld [smem:[#allocation4 + $0x11]]  ;;  %v4902_v49 = vld [vmem:[#allocation9 + $0x4] ss:$8 sm:$0xf]  ;;  %s1020_s13 = int_to_ptr.hbm [resolvable:$true] %s1019_s13 }
 0x282   :  { %s4897_s15 = sld [smem:[#allocation4 + $0x12]] }
 0x283   :  { %s4899_s16 = sld [smem:[#allocation4 + $0x13]] }
 0x284   :  { %1024 = dma.hbm_to_vmem [thread:$0]  %s1020_s13, 4096, %s4799_s6, [#allocation3] }
 0x285   :  { %v4199_v50 = vld [vmem:[#allocation2 + $0x1ec] sm:$0xf]  ;;  %v3402_v51 = vld [vmem:[#allocation2 + $0x1f8] sm:$0xf0]  ;;  %v3400_v55 = vld [vmem:[#allocation2 + $0x1e8] sm:$0xf] }
 0x286   :  { %v4195_v52 = vld [vmem:[#allocation2 + $0x1cc] sm:$0xf]  ;;  %v3405_v53 = vor.u32 %v4199_v50, %v3402_v51  ;;  %v3386_v54 = vld [vmem:[#allocation2 + $0x1d8] sm:$0xf0]  ;;  %v4201_v17 = vld [vmem:[#allocation2 + $0x1f4] sm:$0xf0] }
 0x287   :  { %v3389_v56 = vor.u32 %v4195_v52, %v3386_v54  ;;  %v3401_v57 = vor.u32 %v4201_v17, %v3400_v55  ;;  %v3384_v58 = vld [vmem:[#allocation2 + $0x1c8] sm:$0xf]  ;;  %v4197_v59 = vld [vmem:[#allocation2 + $0x1d4] sm:$0xf0]  ;;  %v4191_v60 = vld [vmem:[#allocation2 + $0x1ac] sm:$0xf] }
 0x288   :  { %1266 = vmatpush.bf16.msrb.mxu3 %v3405_v53  ;;  %v3370_v61 = vld [vmem:[#allocation2 + $0x1b8] sm:$0xf0]  ;;  %v3385_v62 = vor.u32 %v4197_v59, %v3384_v58  ;;  %v4198_v63 = vld [vmem:[#allocation2 + $0x1e4] sm:$0xf]  ;;  %v3394_v3 = vld [vmem:[#allocation2 + $0x1f0] sm:$0xf0] }
 0x289   :  { %1253 = vmatpush.bf16.msrb.mxu2 %v3401_v57  ;;  %v3368_v4 = vld [vmem:[#allocation2 + $0x1a8] sm:$0xf]  ;;  %v4193_v5 = vld [vmem:[#allocation2 + $0x1b4] sm:$0xf0]  ;;  %v3397_v6 = vor.u32 %v4198_v63, %v3394_v3  ;;  %v3392_v7 = vld [vmem:[#allocation2 + $0x1e0] sm:$0xf]  ;;  %v3373_v8 = vor.u32 %v4191_v60, %v3370_v61 }
 0x28a   :  { %v4187_v9 = vld [vmem:[#allocation2 + $0x18c] sm:$0xf]  ;;  %v4200_v33 = vld [vmem:[#allocation2 + $0x1ec] sm:$0xf0]  ;;  %v3354_v1 = vld [vmem:[#allocation2 + $0x198] sm:$0xf0]  ;;  %v3369_v13 = vor.u32 %v4193_v5, %v3368_v4 }
 0x28b   :  { %1240 = vmatpush.bf16.msrb.mxu1 %v3397_v6  ;;  %v3393_v10 = vor.u32 %v4200_v33, %v3392_v7  ;;  %v4194_v11 = vld [vmem:[#allocation2 + $0x1c4] sm:$0xf]  ;;  %v3378_v12 = vld [vmem:[#allocation2 + $0x1d0] sm:$0xf0]  ;;  %v3376_v15 = vld [vmem:[#allocation2 + $0x1c0] sm:$0xf]  ;;  %v3357_v23 = vor.u32 %v4187_v9, %v3354_v1 }
 0x28c   :  { %1267 = vmatpush.bf16.msrb.mxu3 %v3389_v56  ;;  %v3381_v14 = vor.u32 %v4194_v11, %v3378_v12  ;;  %v4196_v16 = vld [vmem:[#allocation2 + $0x1cc] sm:$0xf0]  ;;  %v3352_v19 = vld [vmem:[#allocation2 + $0x188] sm:$0xf]  ;;  %v4189_v20 = vld [vmem:[#allocation2 + $0x194] sm:$0xf0] }
 0x28d   :  { %1254 = vmatpush.bf16.msrb.mxu2 %v3385_v62  ;;  %1227 = vmatpush.bf16.msrb.mxu0 %v3393_v10  ;;  %v3377_v21 = vor.u32 %v4196_v16, %v3376_v15  ;;  %v4190_v22 = vld [vmem:[#allocation2 + $0x1a4] sm:$0xf]  ;;  %v4183_v24 = vld [vmem:[#allocation2 + $0x16c] sm:$0xf]  ;;  %v3362_v25 = vld [vmem:[#allocation2 + $0x1b0] sm:$0xf0]  ;;  %v3353_v29 = vor.u32 %v4189_v20, %v3352_v19  ;;  %v1025_v16 = vpack.c.bf16 %v4888_v48, %v4888_v48 }
 0x28e   :  { %v3338_v2 = vld [vmem:[#allocation2 + $0x178] sm:$0xf0]  ;;  %v3365_v26 = vor.u32 %v4190_v22, %v3362_v25  ;;  %v3360_v27 = vld [vmem:[#allocation2 + $0x1a0] sm:$0xf]  ;;  %v4192_v28 = vld [vmem:[#allocation2 + $0x1ac] sm:$0xf0] }
 0x28f   :  { %1241 = vmatpush.bf16.msrb.mxu1 %v3381_v14  ;;  %v4186_v30 = vld [vmem:[#allocation2 + $0x184] sm:$0xf]  ;;  %v3346_v31 = vld [vmem:[#allocation2 + $0x190] sm:$0xf0]  ;;  %v3336_v32 = vld [vmem:[#allocation2 + $0x168] sm:$0xf]  ;;  %v3361_v36 = vor.u32 %v4192_v28, %v3360_v27  ;;  %v3341_v37 = vor.u32 %v4183_v24, %v3338_v2 }
 0x290   :  { %1268 = vmatpush.bf16.msrb.mxu3 %v3373_v8  ;;  %v4185_v35 = vld [vmem:[#allocation2 + $0x174] sm:$0xf0]  ;;  %v3344_v38 = vld [vmem:[#allocation2 + $0x180] sm:$0xf]  ;;  %v4188_v39 = vld [vmem:[#allocation2 + $0x18c] sm:$0xf0]  ;;  %v3349_v18 = vor.u32 %v4186_v30, %v3346_v31 }
 0x291   :  { %1255 = vmatpush.bf16.msrb.mxu2 %v3369_v13  ;;  %1228 = vmatpush.bf16.msrb.mxu0 %v3377_v21  ;;  %v4179_v40 = vld [vmem:[#allocation2 + $0x14c] sm:$0xf]  ;;  %v3322_v0 = vld [vmem:[#allocation2 + $0x158] sm:$0xf0]  ;;  %v3337_v41 = vor.u32 %v4185_v35, %v3336_v32  ;;  %v4182_v42 = vld [vmem:[#allocation2 + $0x164] sm:$0xf]  ;;  %v3345_v46 = vor.u32 %v4188_v39, %v3344_v38 }
 0x292   :  { %v3330_v43 = vld [vmem:[#allocation2 + $0x170] sm:$0xf0]  ;;  %v3320_v44 = vld [vmem:[#allocation2 + $0x148] sm:$0xf]  ;;  %v4181_v45 = vld [vmem:[#allocation2 + $0x154] sm:$0xf0]  ;;  %v3325_v47 = vor.u32 %v4179_v40, %v3322_v0 }
 0x293   :  { %1242 = vmatpush.bf16.msrb.mxu1 %v3365_v26  ;;  %v3328_v50 = vld [vmem:[#allocation2 + $0x160] sm:$0xf]  ;;  %v4184_v51 = vld [vmem:[#allocation2 + $0x16c] sm:$0xf0]  ;;  %v4175_v52 = vld [vmem:[#allocation2 + $0x12c] sm:$0xf]  ;;  %v3333_v54 = vor.u32 %v4182_v42, %v3330_v43  ;;  %v3321_v55 = vor.u32 %v4181_v45, %v3320_v44  ;;  %v1283_v42 = vstv %s4869_s5  ;;  %v1279_v43 = vstv %s4867_s30 }
 0x294   :  { %1269 = vmatpush.bf16.msrb.mxu3 %v3357_v23  ;;  %v3306_v53 = vld [vmem:[#allocation2 + $0x138] sm:$0xf0]  ;;  %v4178_v17 = vld [vmem:[#allocation2 + $0x144] sm:$0xf]  ;;  %v3314_v56 = vld [vmem:[#allocation2 + $0x150] sm:$0xf0]  ;;  %v3329_v59 = vor.u32 %v4184_v51, %v3328_v50  ;;  %v1287_v51 = vstv %s4871_s7 }
 0x295   :  { %1256 = vmatpush.bf16.msrb.mxu2 %v3353_v29  ;;  %1229 = vmatpush.bf16.msrb.mxu0 %v3361_v36  ;;  %v3304_v57 = vld [vmem:[#allocation2 + $0x128] sm:$0xf]  ;;  %v4177_v58 = vld [vmem:[#allocation2 + $0x134] sm:$0xf0]  ;;  %v3309_v60 = vor.u32 %v4175_v52, %v3306_v53  ;;  %v3312_v61 = vld [vmem:[#allocation2 + $0x140] sm:$0xf]  ;;  %v3317_v4 = vor.u32 %v4178_v17, %v3314_v56 }
 0x296   :  { %v4180_v62 = vld [vmem:[#allocation2 + $0x14c] sm:$0xf0]  ;;  %v4171_v63 = vld [vmem:[#allocation2 + $0x10c] sm:$0xf]  ;;  %v3290_v3 = vld [vmem:[#allocation2 + $0x118] sm:$0xf0]  ;;  %v3305_v5 = vor.u32 %v4177_v58, %v3304_v57  ;;  %v1309_v58 = vstv %s4873_s8 }
 0x297   :  { %1243 = vmatpush.bf16.msrb.mxu1 %v3349_v18  ;;  %v4174_v6 = vld [vmem:[#allocation2 + $0x124] sm:$0xf]  ;;  %v3298_v7 = vld [vmem:[#allocation2 + $0x130] sm:$0xf0]  ;;  %v3288_v8 = vld [vmem:[#allocation2 + $0x108] sm:$0xf]  ;;  %v3313_v33 = vor.u32 %v4180_v62, %v3312_v61  ;;  %v3293_v1 = vor.u32 %v4171_v63, %v3290_v3 }
 0x298   :  { %1270 = vmatpush.bf16.msrb.mxu3 %v3341_v37  ;;  %v4173_v9 = vld [vmem:[#allocation2 + $0x114] sm:$0xf0]  ;;  %v3296_v10 = vld [vmem:[#allocation2 + $0x120] sm:$0xf]  ;;  %v4176_v11 = vld [vmem:[#allocation2 + $0x12c] sm:$0xf0]  ;;  %v3301_v12 = vor.u32 %v4174_v6, %v3298_v7 }
 0x299   :  { %1257 = vmatpush.bf16.msrb.mxu2 %v3337_v41  ;;  %1230 = vmatpush.bf16.msrb.mxu0 %v3345_v46  ;;  %v3289_v13 = vor.u32 %v4173_v9, %v3288_v8  ;;  %v4170_v14 = vld [vmem:[#allocation2 + $0x104] sm:$0xf]  ;;  %v3282_v15 = vld [vmem:[#allocation2 + $0x110] sm:$0xf0]  ;;  %v3297_v19 = vor.u32 %v4176_v11, %v3296_v10  ;;  %v3280_v20 = vld [vmem:[#allocation2 + $0x100] sm:$0xf] }
 0x29a   :  { %v4172_v21 = vld [vmem:[#allocation2 + $0x10c] sm:$0xf0]  ;;  %v3285_v22 = vor.u32 %v4170_v14, %v3282_v15  ;;  %v1062_v24 = vperm.slane %v4876_v34, 3  ;;  %v1061_v31 = vperm.slane %v4876_v34, 2  ;;  %v1060_v32 = vperm.slane %v4876_v34, 1 }
 0x29b   :  { %1244 = vmatpush.bf16.msrb.mxu1 %v3333_v54  ;;  %v3281_v23 = vor.u32 %v4172_v21, %v3280_v20  ;;  %v1059_v0 = vperm.slane %v4876_v34, 0 }
 0x29c   :  { %1271 = vmatpush.bf16.msrb.mxu3 %v3325_v47 }
 0x29d   :  { %1258 = vmatpush.bf16.msrb.mxu2 %v3321_v55  ;;  %1231 = vmatpush.bf16.msrb.mxu0 %v3329_v59 }
 0x29f   :  { %1245 = vmatpush.bf16.msrb.mxu1 %v3317_v4 }
 0x2a0   :  { %1272 = vmatpush.bf16.msrb.mxu3 %v3309_v60 }
 0x2a1   :  { %1259 = vmatpush.bf16.msrb.mxu2 %v3305_v5  ;;  %1232 = vmatpush.bf16.msrb.mxu0 %v3313_v33 }
 0x2a3   :  { %1246 = vmatpush.bf16.msrb.mxu1 %v3301_v12 }
 0x2a4   :  { %1273 = vmatpush.bf16.msrb.mxu3 %v3293_v1 }
 0x2a5   :  { %1260 = vmatpush.bf16.msrb.mxu2 %v3289_v13  ;;  %1233 = vmatpush.bf16.msrb.mxu0 %v3297_v19 }
 0x2a7   :  { %1274 = vmatmul.bf16.vlgmr.msrb.gmra.mxu3 %v1025_v16  ;;  %1247 = vmatpush.bf16.msrb.mxu1 %v3285_v22 }
 0x2a8   :  { %1261 = vmatmul.bf16.vlgmr.msrb.gmra.mxu2 %v1025_v16 }
 0x2a9   :  { %1234 = vmatpush.bf16.msrb.mxu0 %v3281_v23 }
 0x2aa   :  { %1248 = vmatmul.bf16.vlgmr.msrb.gmra.mxu1 %v1025_v16 }
 0x2ac   :  { %1235 = vmatmul.bf16.vlgmr.msrb.gmra.mxu0 %v1025_v16 }
 0x327   :  { %v1249_v25 = vpop.f32.mrf.mxu1 }
 0x328   :  { %v1250_v40 = vadd.f32 %v1249_v25, %v1060_v32 }
 0x329   :  { %v1236_v26 = vpop.f32.mrf.mxu0 }
 0x32a   :  { %v1275_v48 = vpop.f32.mrf.mxu3  ;;  %v1282_v18 = vmax.f32 %v1250_v40, 0.0  ;;  %v1237_v41 = vadd.f32 %v1236_v26, %v1059_v0 }
 0x32b   :  { %v1276_v2 = vadd.f32 %v1275_v48, %v1062_v24  ;;  %v1262_v27 = vpop.f32.mrf.mxu2 }
 0x32c   :  { %v1263_v39 = vadd.f32 %v1262_v27, %v1061_v31  ;;  %v1284_v45 = vmul.f32 %v1283_v42, %v1282_v18  ;;  %v1280_v46 = vmul.f32 %v1279_v43, %v1237_v41 }
 0x32d   :  { %v3406_v28 = vmul.f32 -1.442695, %v1276_v2 }
 0x32e   :  { %v1285_v54 = vadd.f32 %v1284_v45, %v1280_v46 }
 0x32f   :  { %4388 = vpow2.f32 %v3406_v28  ;;  %v1251_v29 = vpop.f32.mrf.mxu1 }
 0x331   :  { %v1238_v35 = vpop.f32.mrf.mxu0 }
 0x332   :  { %v1277_v30 = vpop.f32.mrf.mxu3 }
 0x333   :  { %v1264_v36 = vpop.f32.mrf.mxu2 }
 0x335   :  { %v4389_v37 = vpop.eup %4388 }
 0x336   :  { %v1293_v38 = vadd.f32 1.0, %v4389_v37 }
 0x338   :  { %4390 = vrcp.f32 %v1293_v38  ;;  %v1305_v53 = vand.u32 2147483648, %v1293_v38  ;;  %v1303_v34 = vand.u32 2147483647, %v1293_v38  ;;  %vm1299_vm13 = vweird.f32 %v1293_v38 }
 0x339   :  { %4392 = vtanh.f32 %v1263_v39 }
 0x33a   :  { %v1306_v57 = vor.u32 1.1754944e-38, %v1305_v53  ;;  %vm1304_vm15 = vcmp.eq.f32.partialorder %v1303_v34, 8.507059e+37 }
 0x33e   :  { %v4391_v44 = vpop.eup %4390 }
 0x33f   :  { %v1295_v47 = vmul.f32 %v4391_v44, %v1293_v38  ;;  %v4393_v50 = vpop.eup %4392  ;;  %vm1300_vm12 = vweird.f32 %v4391_v44 }
 0x340   :  { %v1288_v17 = vmul.f32 %v4393_v50, %v1287_v51  ;;  %vm1301_vm14 = vmor %vm1299_vm13, %vm1300_vm12 }
 0x341   :  { %v1296_v52 = vsub.f32 1.0, %v1295_v47 }
 0x342   :  { %v1289_v59 = vadd.f32 %v1288_v17, %v1285_v54 }
 0x343   :  { %v1297_v55 = vmul.f32 %v4391_v44, %v1296_v52 }
 0x345   :  { %v1298_v56 = vadd.f32 %v4391_v44, %v1297_v55 }
 0x347   :  { %v1302_v60 = vsel %vm1301_vm14, %v4391_v44, %v1298_v56 }
 0x348   :  { %v1307_v61 = vsel %vm1304_vm15, %v1306_v57, %v1302_v60 }
 0x349   :  { %v1310_v62 = vmul.f32 %v1309_v58, %v1307_v61 }
 0x34b   :  { %v4914_v63 = vadd.f32 %v1310_v62, %v1289_v59 }
 0x34c   :  { %4738 = dma.done.wait [#allocation3], 4096 }
 0x34d   :  { %4739 = vsyncadd [#allocation3], 4294963200  ;;  %s1320_s20 = scalar_lea.hbm %s5036_s3, 1280  ;;  %s4919_s21 = sld [smem:[#allocation4 + $0x14]] }
 0x34e   :  { %s1328_s22 = sshll.u32 %s1320_s20, 4  ;;  %s4921_s23 = sld [smem:[#allocation4 + $0x15]]  ;;  %v4928_v3 = vld [vmem:[#allocation9 + $0x5] ss:$8 sm:$0xf]  ;;  %s1329_s22 = int_to_ptr.hbm [resolvable:$true] %s1328_s22 }
 0x34f   :  { %s4923_s24 = sld [smem:[#allocation4 + $0x16]] }
 0x350   :  { %s4925_s25 = sld [smem:[#allocation4 + $0x17]] }
 0x351   :  { %1333 = dma.hbm_to_vmem [thread:$0]  %s1329_s22, 4096, %s4821_s19, [#allocation3 + $0x1] }
 0x352   :  { %v4231_v4 = vld [vmem:[#allocation2 + $0xec] sm:$0xf]  ;;  %v3535_v5 = vld [vmem:[#allocation2 + $0xf8] sm:$0xf0]  ;;  %v3533_v9 = vld [vmem:[#allocation2 + $0xe8] sm:$0xf] }
 0x353   :  { %v4227_v6 = vld [vmem:[#allocation2 + $0xcc] sm:$0xf]  ;;  %v3538_v7 = vor.u32 %v4231_v4, %v3535_v5  ;;  %v3519_v8 = vld [vmem:[#allocation2 + $0xd8] sm:$0xf0]  ;;  %v4233_v33 = vld [vmem:[#allocation2 + $0xf4] sm:$0xf0] }
 0x354   :  { %v3522_v1 = vor.u32 %v4227_v6, %v3519_v8  ;;  %v3534_v10 = vor.u32 %v4233_v33, %v3533_v9  ;;  %v3517_v11 = vld [vmem:[#allocation2 + $0xc8] sm:$0xf]  ;;  %v4229_v12 = vld [vmem:[#allocation2 + $0xd4] sm:$0xf0]  ;;  %v4223_v13 = vld [vmem:[#allocation2 + $0xac] sm:$0xf] }
 0x355   :  { %1575 = vmatpush.bf16.msra.mxu3 %v3538_v7  ;;  %v3503_v14 = vld [vmem:[#allocation2 + $0xb8] sm:$0xf0]  ;;  %v3518_v15 = vor.u32 %v4229_v12, %v3517_v11  ;;  %v4230_v16 = vld [vmem:[#allocation2 + $0xe4] sm:$0xf]  ;;  %v3527_v19 = vld [vmem:[#allocation2 + $0xf0] sm:$0xf0] }
 0x356   :  { %1562 = vmatpush.bf16.msra.mxu2 %v3534_v10  ;;  %v3501_v20 = vld [vmem:[#allocation2 + $0xa8] sm:$0xf]  ;;  %v4225_v21 = vld [vmem:[#allocation2 + $0xb4] sm:$0xf0]  ;;  %v3530_v22 = vor.u32 %v4230_v16, %v3527_v19  ;;  %v3525_v23 = vld [vmem:[#allocation2 + $0xe0] sm:$0xf]  ;;  %v3506_v24 = vor.u32 %v4223_v13, %v3503_v14 }
 0x357   :  { %v4219_v25 = vld [vmem:[#allocation2 + $0x8c] sm:$0xf]  ;;  %v4232_v48 = vld [vmem:[#allocation2 + $0xec] sm:$0xf0]  ;;  %v3487_v2 = vld [vmem:[#allocation2 + $0x98] sm:$0xf0]  ;;  %v3502_v29 = vor.u32 %v4225_v21, %v3501_v20 }
 0x358   :  { %1549 = vmatpush.bf16.msra.mxu1 %v3530_v22  ;;  %v3526_v26 = vor.u32 %v4232_v48, %v3525_v23  ;;  %v4226_v27 = vld [vmem:[#allocation2 + $0xc4] sm:$0xf]  ;;  %v3511_v28 = vld [vmem:[#allocation2 + $0xd0] sm:$0xf0]  ;;  %v3509_v31 = vld [vmem:[#allocation2 + $0xc0] sm:$0xf]  ;;  %v3490_v39 = vor.u32 %v4219_v25, %v3487_v2 }
 0x359   :  { %1576 = vmatpush.bf16.msra.mxu3 %v3522_v1  ;;  %v3514_v30 = vor.u32 %v4226_v27, %v3511_v28  ;;  %v4228_v32 = vld [vmem:[#allocation2 + $0xcc] sm:$0xf0]  ;;  %v3485_v35 = vld [vmem:[#allocation2 + $0x88] sm:$0xf]  ;;  %v4221_v36 = vld [vmem:[#allocation2 + $0x94] sm:$0xf0] }
 0x35a   :  { %1563 = vmatpush.bf16.msra.mxu2 %v3518_v15  ;;  %1536 = vmatpush.bf16.msra.mxu0 %v3526_v26  ;;  %v3510_v37 = vor.u32 %v4228_v32, %v3509_v31  ;;  %v4222_v38 = vld [vmem:[#allocation2 + $0xa4] sm:$0xf]  ;;  %v4215_v40 = vld [vmem:[#allocation2 + $0x6c] sm:$0xf]  ;;  %v3495_v0 = vld [vmem:[#allocation2 + $0xb0] sm:$0xf0]  ;;  %v3486_v44 = vor.u32 %v4221_v36, %v3485_v35  ;;  %v1334_v32 = vpack.c.bf16 %v4914_v63, %v4914_v63 }
 0x35b   :  { %v3471_v18 = vld [vmem:[#allocation2 + $0x78] sm:$0xf0]  ;;  %v3498_v41 = vor.u32 %v4222_v38, %v3495_v0  ;;  %v3493_v42 = vld [vmem:[#allocation2 + $0xa0] sm:$0xf]  ;;  %v4224_v43 = vld [vmem:[#allocation2 + $0xac] sm:$0xf0] }
 0x35c   :  { %1550 = vmatpush.bf16.msra.mxu1 %v3514_v30  ;;  %v4218_v45 = vld [vmem:[#allocation2 + $0x84] sm:$0xf]  ;;  %v3479_v46 = vld [vmem:[#allocation2 + $0x90] sm:$0xf0]  ;;  %v3469_v47 = vld [vmem:[#allocation2 + $0x68] sm:$0xf]  ;;  %v3494_v51 = vor.u32 %v4224_v43, %v3493_v42  ;;  %v3474_v52 = vor.u32 %v4215_v40, %v3471_v18 }
 0x35d   :  { %1577 = vmatpush.bf16.msra.mxu3 %v3506_v24  ;;  %v4217_v50 = vld [vmem:[#allocation2 + $0x74] sm:$0xf0]  ;;  %v3477_v53 = vld [vmem:[#allocation2 + $0x80] sm:$0xf]  ;;  %v4220_v54 = vld [vmem:[#allocation2 + $0x8c] sm:$0xf0]  ;;  %v3482_v34 = vor.u32 %v4218_v45, %v3479_v46 }
 0x35e   :  { %1564 = vmatpush.bf16.msra.mxu2 %v3502_v29  ;;  %1537 = vmatpush.bf16.msra.mxu0 %v3510_v37  ;;  %v4211_v55 = vld [vmem:[#allocation2 + $0x4c] sm:$0xf]  ;;  %v3455_v17 = vld [vmem:[#allocation2 + $0x58] sm:$0xf0]  ;;  %v3470_v56 = vor.u32 %v4217_v50, %v3469_v47  ;;  %v4214_v57 = vld [vmem:[#allocation2 + $0x64] sm:$0xf]  ;;  %v3478_v61 = vor.u32 %v4220_v54, %v3477_v53 }
 0x35f   :  { %v3463_v58 = vld [vmem:[#allocation2 + $0x70] sm:$0xf0]  ;;  %v3453_v59 = vld [vmem:[#allocation2 + $0x48] sm:$0xf]  ;;  %v4213_v60 = vld [vmem:[#allocation2 + $0x54] sm:$0xf0]  ;;  %v3458_v62 = vor.u32 %v4211_v55, %v3455_v17 }
 0x360   :  { %1551 = vmatpush.bf16.msra.mxu1 %v3498_v41  ;;  %v3461_v4 = vld [vmem:[#allocation2 + $0x60] sm:$0xf]  ;;  %v4216_v5 = vld [vmem:[#allocation2 + $0x6c] sm:$0xf0]  ;;  %v4207_v6 = vld [vmem:[#allocation2 + $0x2c] sm:$0xf]  ;;  %v3466_v8 = vor.u32 %v4214_v57, %v3463_v58  ;;  %v3454_v9 = vor.u32 %v4213_v60, %v3453_v59  ;;  %v1592_v57 = vstv %s4895_s14  ;;  %v1588_v58 = vstv %s4893_s12 }
 0x361   :  { %1578 = vmatpush.bf16.msra.mxu3 %v3490_v39  ;;  %v3439_v7 = vld [vmem:[#allocation2 + $0x38] sm:$0xf0]  ;;  %v4210_v33 = vld [vmem:[#allocation2 + $0x44] sm:$0xf]  ;;  %v3447_v1 = vld [vmem:[#allocation2 + $0x50] sm:$0xf0]  ;;  %v3462_v12 = vor.u32 %v4216_v5, %v3461_v4  ;;  %v1596_v5 = vstv %s4897_s15 }
 0x362   :  { %1565 = vmatpush.bf16.msra.mxu2 %v3486_v44  ;;  %1538 = vmatpush.bf16.msra.mxu0 %v3494_v51  ;;  %v3437_v10 = vld [vmem:[#allocation2 + $0x28] sm:$0xf]  ;;  %v4209_v11 = vld [vmem:[#allocation2 + $0x34] sm:$0xf0]  ;;  %v3442_v13 = vor.u32 %v4207_v6, %v3439_v7  ;;  %v3445_v14 = vld [vmem:[#allocation2 + $0x40] sm:$0xf]  ;;  %v3450_v20 = vor.u32 %v4210_v33, %v3447_v1 }
 0x363   :  { %v4212_v15 = vld [vmem:[#allocation2 + $0x4c] sm:$0xf0]  ;;  %v4203_v16 = vld [vmem:[#allocation2 + $0xc] sm:$0xf]  ;;  %v3423_v19 = vld [vmem:[#allocation2 + $0x18] sm:$0xf0]  ;;  %v3438_v21 = vor.u32 %v4209_v11, %v3437_v10  ;;  %v1618_v11 = vstv %s4899_s16 }
 0x364   :  { %1552 = vmatpush.bf16.msra.mxu1 %v3482_v34  ;;  %v4206_v22 = vld [vmem:[#allocation2 + $0x24] sm:$0xf]  ;;  %v3431_v23 = vld [vmem:[#allocation2 + $0x30] sm:$0xf0]  ;;  %v3421_v24 = vld [vmem:[#allocation2 + $0x8] sm:$0xf]  ;;  %v3446_v48 = vor.u32 %v4212_v15, %v3445_v14  ;;  %v3426_v2 = vor.u32 %v4203_v16, %v3423_v19 }
 0x365   :  { %1579 = vmatpush.bf16.msra.mxu3 %v3474_v52  ;;  %v4205_v25 = vld [vmem:[#allocation2 + $0x14] sm:$0xf0]  ;;  %v3429_v26 = vld [vmem:[#allocation2 + $0x20] sm:$0xf]  ;;  %v4208_v27 = vld [vmem:[#allocation2 + $0x2c] sm:$0xf0]  ;;  %v3434_v28 = vor.u32 %v4206_v22, %v3431_v23 }
 0x366   :  { %1566 = vmatpush.bf16.msra.mxu2 %v3470_v56  ;;  %1539 = vmatpush.bf16.msra.mxu0 %v3478_v61  ;;  %v3422_v29 = vor.u32 %v4205_v25, %v3421_v24  ;;  %v4202_v30 = vld [vmem:[#allocation2 + $0x4] sm:$0xf]  ;;  %v3415_v31 = vld [vmem:[#allocation2 + $0x10] sm:$0xf0]  ;;  %v3430_v35 = vor.u32 %v4208_v27, %v3429_v26  ;;  %v3413_v36 = vld [vmem:[#allocation2] sm:$0xf] }
 0x367   :  { %v4204_v37 = vld [vmem:[#allocation2 + $0xc] sm:$0xf0]  ;;  %v3418_v38 = vor.u32 %v4202_v30, %v3415_v31  ;;  %v1371_v40 = vperm.slane %v4902_v49, 3  ;;  %v1370_v46 = vperm.slane %v4902_v49, 2  ;;  %v1369_v47 = vperm.slane %v4902_v49, 1 }
 0x368   :  { %1553 = vmatpush.bf16.msra.mxu1 %v3466_v8  ;;  %v3414_v39 = vor.u32 %v4204_v37, %v3413_v36  ;;  %v1368_v17 = vperm.slane %v4902_v49, 0 }
 0x369   :  { %1580 = vmatpush.bf16.msra.mxu3 %v3458_v62 }
 0x36a   :  { %1567 = vmatpush.bf16.msra.mxu2 %v3454_v9  ;;  %1540 = vmatpush.bf16.msra.mxu0 %v3462_v12 }
 0x36c   :  { %1554 = vmatpush.bf16.msra.mxu1 %v3450_v20 }
 0x36d   :  { %1581 = vmatpush.bf16.msra.mxu3 %v3442_v13 }
 0x36e   :  { %1568 = vmatpush.bf16.msra.mxu2 %v3438_v21  ;;  %1541 = vmatpush.bf16.msra.mxu0 %v3446_v48 }
 0x370   :  { %1555 = vmatpush.bf16.msra.mxu1 %v3434_v28 }
 0x371   :  { %1582 = vmatpush.bf16.msra.mxu3 %v3426_v2 }
 0x372   :  { %1569 = vmatpush.bf16.msra.mxu2 %v3422_v29  ;;  %1542 = vmatpush.bf16.msra.mxu0 %v3430_v35 }
 0x374   :  { %1583 = vmatmul.bf16.vlgmr.msra.gmra.mxu3 %v1334_v32  ;;  %1556 = vmatpush.bf16.msra.mxu1 %v3418_v38 }
 0x375   :  { %1570 = vmatmul.bf16.vlgmr.msra.gmra.mxu2 %v1334_v32 }
 0x376   :  { %1543 = vmatpush.bf16.msra.mxu0 %v3414_v39 }
 0x377   :  { %1557 = vmatmul.bf16.vlgmr.msra.gmra.mxu1 %v1334_v32 }
 0x379   :  { %1544 = vmatmul.bf16.vlgmr.msra.gmra.mxu0 %v1334_v32 }
 0x3f4   :  { %v1558_v0 = vpop.f32.mrf.mxu1 }
 0x3f5   :  { %v1559_v55 = vadd.f32 %v1558_v0, %v1369_v47 }
 0x3f6   :  { %v1545_v41 = vpop.f32.mrf.mxu0 }
 0x3f7   :  { %v1584_v63 = vpop.f32.mrf.mxu3  ;;  %v1591_v34 = vmax.f32 %v1559_v55, 0.0  ;;  %v1546_v56 = vadd.f32 %v1545_v41, %v1368_v17 }
 0x3f8   :  { %v1585_v18 = vadd.f32 %v1584_v63, %v1371_v40  ;;  %v1571_v42 = vpop.f32.mrf.mxu2 }
 0x3f9   :  { %v1572_v54 = vadd.f32 %v1571_v42, %v1370_v46  ;;  %v1593_v60 = vmul.f32 %v1592_v57, %v1591_v34  ;;  %v1589_v61 = vmul.f32 %v1588_v58, %v1546_v56 }
 0x3fa   :  { %v3539_v43 = vmul.f32 -1.442695, %v1585_v18 }
 0x3fb   :  { %v1594_v8 = vadd.f32 %v1593_v60, %v1589_v61 }
 0x3fc   :  { %4394 = vpow2.f32 %v3539_v43  ;;  %v1560_v44 = vpop.f32.mrf.mxu1 }
 0x3fe   :  { %v1547_v50 = vpop.f32.mrf.mxu0 }
 0x3ff   :  { %v1586_v45 = vpop.f32.mrf.mxu3 }
 0x400   :  { %v1573_v51 = vpop.f32.mrf.mxu2 }
 0x402   :  { %v4395_v52 = vpop.eup %4394 }
 0x403   :  { %v1602_v53 = vadd.f32 1.0, %v4395_v52 }
 0x405   :  { %4396 = vrcp.f32 %v1602_v53  ;;  %v1614_v7 = vand.u32 2147483648, %v1602_v53  ;;  %v1612_v49 = vand.u32 2147483647, %v1602_v53  ;;  %vm1608_vm1 = vweird.f32 %v1602_v53 }
 0x406   :  { %4398 = vtanh.f32 %v1572_v54 }
 0x407   :  { %v1615_v10 = vor.u32 1.1754944e-38, %v1614_v7  ;;  %vm1613_vm3 = vcmp.eq.f32.partialorder %v1612_v49, 8.507059e+37 }
 0x40b   :  { %v4397_v59 = vpop.eup %4396 }
 0x40c   :  { %v1604_v62 = vmul.f32 %v4397_v59, %v1602_v53  ;;  %v4399_v4 = vpop.eup %4398  ;;  %vm1609_vm0 = vweird.f32 %v4397_v59 }
 0x40d   :  { %v1597_v33 = vmul.f32 %v4399_v4, %v1596_v5  ;;  %vm1610_vm2 = vmor %vm1608_vm1, %vm1609_vm0 }
 0x40e   :  { %v1605_v6 = vsub.f32 1.0, %v1604_v62 }
 0x40f   :  { %v1598_v12 = vadd.f32 %v1597_v33, %v1594_v8 }
 0x410   :  { %v1606_v9 = vmul.f32 %v4397_v59, %v1605_v6 }
 0x412   :  { %v1607_v1 = vadd.f32 %v4397_v59, %v1606_v9 }
 0x414   :  { %v1611_v13 = vsel %vm1610_vm2, %v4397_v59, %v1607_v1 }
 0x415   :  { %v1616_v14 = vsel %vm1613_vm3, %v1615_v10, %v1611_v13 }
 0x416   :  { %v1619_v15 = vmul.f32 %v1618_v11, %v1616_v14 }
 0x418   :  { %v4940_v16 = vadd.f32 %v1619_v15, %v1598_v12 }
 0x419   :  { %4740 = dma.done.wait [#allocation3 + $0x1], 4096 }
 0x41a   :  { %4741 = vsyncadd [#allocation3 + $0x1], 4294963200  ;;  %s1629_s28 = scalar_lea.hbm %s5036_s3, 1536  ;;  %s4945_s0 = sld [smem:[#allocation4 + $0x18]] }
 0x41b   :  { %s1637_s29 = sshll.u32 %s1629_s28, 4  ;;  %s4947_s1 = sld [smem:[#allocation4 + $0x19]]  ;;  %v4954_v19 = vld [vmem:[#allocation9 + $0x6] ss:$8 sm:$0xf]  ;;  %s1638_s29 = int_to_ptr.hbm [resolvable:$true] %s1637_s29 }
 0x41c   :  { %s4949_s30 = sld [smem:[#allocation4 + $0x1a]] }
 0x41d   :  { %s4951_s2 = sld [smem:[#allocation4 + $0x1b]] }
 0x41e   :  { %1642 = dma.hbm_to_vmem [thread:$0]  %s1638_s29, 4096, %s4799_s6, [#allocation3] }
 0x41f   :  { %v4263_v20 = vld [vmem:[#allocation2 + $0x1ec] sm:$0xf]  ;;  %v3668_v21 = vld [vmem:[#allocation2 + $0x1f8] sm:$0xf0]  ;;  %v3666_v25 = vld [vmem:[#allocation2 + $0x1e8] sm:$0xf] }
 0x420   :  { %v4259_v22 = vld [vmem:[#allocation2 + $0x1cc] sm:$0xf]  ;;  %v3671_v23 = vor.u32 %v4263_v20, %v3668_v21  ;;  %v3652_v24 = vld [vmem:[#allocation2 + $0x1d8] sm:$0xf0]  ;;  %v4265_v48 = vld [vmem:[#allocation2 + $0x1f4] sm:$0xf0] }
 0x421   :  { %v3655_v2 = vor.u32 %v4259_v22, %v3652_v24  ;;  %v3667_v26 = vor.u32 %v4265_v48, %v3666_v25  ;;  %v3650_v27 = vld [vmem:[#allocation2 + $0x1c8] sm:$0xf]  ;;  %v4261_v28 = vld [vmem:[#allocation2 + $0x1d4] sm:$0xf0]  ;;  %v4255_v29 = vld [vmem:[#allocation2 + $0x1ac] sm:$0xf] }
 0x422   :  { %1884 = vmatpush.bf16.msrb.mxu3 %v3671_v23  ;;  %v3636_v30 = vld [vmem:[#allocation2 + $0x1b8] sm:$0xf0]  ;;  %v3651_v31 = vor.u32 %v4261_v28, %v3650_v27  ;;  %v4262_v32 = vld [vmem:[#allocation2 + $0x1e4] sm:$0xf]  ;;  %v3660_v35 = vld [vmem:[#allocation2 + $0x1f0] sm:$0xf0] }
 0x423   :  { %1871 = vmatpush.bf16.msrb.mxu2 %v3667_v26  ;;  %v3634_v36 = vld [vmem:[#allocation2 + $0x1a8] sm:$0xf]  ;;  %v4257_v37 = vld [vmem:[#allocation2 + $0x1b4] sm:$0xf0]  ;;  %v3663_v38 = vor.u32 %v4262_v32, %v3660_v35  ;;  %v3658_v39 = vld [vmem:[#allocation2 + $0x1e0] sm:$0xf]  ;;  %v3639_v40 = vor.u32 %v4255_v29, %v3636_v30 }
 0x424   :  { %v4251_v0 = vld [vmem:[#allocation2 + $0x18c] sm:$0xf]  ;;  %v4264_v63 = vld [vmem:[#allocation2 + $0x1ec] sm:$0xf0]  ;;  %v3620_v18 = vld [vmem:[#allocation2 + $0x198] sm:$0xf0]  ;;  %v3635_v44 = vor.u32 %v4257_v37, %v3634_v36 }
 0x425   :  { %1858 = vmatpush.bf16.msrb.mxu1 %v3663_v38  ;;  %v3659_v41 = vor.u32 %v4264_v63, %v3658_v39  ;;  %v4258_v42 = vld [vmem:[#allocation2 + $0x1c4] sm:$0xf]  ;;  %v3644_v43 = vld [vmem:[#allocation2 + $0x1d0] sm:$0xf0]  ;;  %v3642_v46 = vld [vmem:[#allocation2 + $0x1c0] sm:$0xf]  ;;  %v3623_v54 = vor.u32 %v4251_v0, %v3620_v18 }
 0x426   :  { %1885 = vmatpush.bf16.msrb.mxu3 %v3655_v2  ;;  %v3647_v45 = vor.u32 %v4258_v42, %v3644_v43  ;;  %v4260_v47 = vld [vmem:[#allocation2 + $0x1cc] sm:$0xf0]  ;;  %v3618_v50 = vld [vmem:[#allocation2 + $0x188] sm:$0xf]  ;;  %v4253_v51 = vld [vmem:[#allocation2 + $0x194] sm:$0xf0] }
 0x427   :  { %1872 = vmatpush.bf16.msrb.mxu2 %v3651_v31  ;;  %1845 = vmatpush.bf16.msrb.mxu0 %v3659_v41  ;;  %v3643_v52 = vor.u32 %v4260_v47, %v3642_v46  ;;  %v4254_v53 = vld [vmem:[#allocation2 + $0x1a4] sm:$0xf]  ;;  %v4247_v55 = vld [vmem:[#allocation2 + $0x16c] sm:$0xf]  ;;  %v3628_v17 = vld [vmem:[#allocation2 + $0x1b0] sm:$0xf0]  ;;  %v3619_v59 = vor.u32 %v4253_v51, %v3618_v50  ;;  %v1643_v47 = vpack.c.bf16 %v4940_v16, %v4940_v16 }
 0x428   :  { %v3604_v34 = vld [vmem:[#allocation2 + $0x178] sm:$0xf0]  ;;  %v3631_v56 = vor.u32 %v4254_v53, %v3628_v17  ;;  %v3626_v57 = vld [vmem:[#allocation2 + $0x1a0] sm:$0xf]  ;;  %v4256_v58 = vld [vmem:[#allocation2 + $0x1ac] sm:$0xf0] }
 0x429   :  { %1859 = vmatpush.bf16.msrb.mxu1 %v3647_v45  ;;  %v4250_v60 = vld [vmem:[#allocation2 + $0x184] sm:$0xf]  ;;  %v3612_v61 = vld [vmem:[#allocation2 + $0x190] sm:$0xf0]  ;;  %v3602_v62 = vld [vmem:[#allocation2 + $0x168] sm:$0xf]  ;;  %v3627_v5 = vor.u32 %v4256_v58, %v3626_v57  ;;  %v3607_v6 = vor.u32 %v4247_v55, %v3604_v34 }
 0x42a   :  { %1886 = vmatpush.bf16.msrb.mxu3 %v3639_v40  ;;  %v4249_v4 = vld [vmem:[#allocation2 + $0x174] sm:$0xf0]  ;;  %v3610_v7 = vld [vmem:[#allocation2 + $0x180] sm:$0xf]  ;;  %v4252_v8 = vld [vmem:[#allocation2 + $0x18c] sm:$0xf0]  ;;  %v3615_v49 = vor.u32 %v4250_v60, %v3612_v61 }
 0x42b   :  { %1873 = vmatpush.bf16.msrb.mxu2 %v3635_v44  ;;  %1846 = vmatpush.bf16.msrb.mxu0 %v3643_v52  ;;  %v4243_v9 = vld [vmem:[#allocation2 + $0x14c] sm:$0xf]  ;;  %v3588_v33 = vld [vmem:[#allocation2 + $0x158] sm:$0xf0]  ;;  %v3603_v1 = vor.u32 %v4249_v4, %v3602_v62  ;;  %v4246_v10 = vld [vmem:[#allocation2 + $0x164] sm:$0xf]  ;;  %v3611_v14 = vor.u32 %v4252_v8, %v3610_v7 }
 0x42c   :  { %v3596_v11 = vld [vmem:[#allocation2 + $0x170] sm:$0xf0]  ;;  %v3586_v12 = vld [vmem:[#allocation2 + $0x148] sm:$0xf]  ;;  %v4245_v13 = vld [vmem:[#allocation2 + $0x154] sm:$0xf0]  ;;  %v3591_v15 = vor.u32 %v4243_v9, %v3588_v33 }
 0x42d   :  { %1860 = vmatpush.bf16.msrb.mxu1 %v3631_v56  ;;  %v3594_v20 = vld [vmem:[#allocation2 + $0x160] sm:$0xf]  ;;  %v4248_v21 = vld [vmem:[#allocation2 + $0x16c] sm:$0xf0]  ;;  %v4239_v22 = vld [vmem:[#allocation2 + $0x12c] sm:$0xf]  ;;  %v3599_v24 = vor.u32 %v4246_v10, %v3596_v11  ;;  %v3587_v25 = vor.u32 %v4245_v13, %v3586_v12  ;;  %v1901_v10 = vstv %s4921_s23  ;;  %v1897_v11 = vstv %s4919_s21 }
 0x42e   :  { %1887 = vmatpush.bf16.msrb.mxu3 %v3623_v54  ;;  %v3572_v23 = vld [vmem:[#allocation2 + $0x138] sm:$0xf0]  ;;  %v4242_v48 = vld [vmem:[#allocation2 + $0x144] sm:$0xf]  ;;  %v3580_v2 = vld [vmem:[#allocation2 + $0x150] sm:$0xf0]  ;;  %v3595_v28 = vor.u32 %v4248_v21, %v3594_v20  ;;  %v1905_v21 = vstv %s4923_s24 }
 0x42f   :  { %1874 = vmatpush.bf16.msrb.mxu2 %v3619_v59  ;;  %1847 = vmatpush.bf16.msrb.mxu0 %v3627_v5  ;;  %v3570_v26 = vld [vmem:[#allocation2 + $0x128] sm:$0xf]  ;;  %v4241_v27 = vld [vmem:[#allocation2 + $0x134] sm:$0xf0]  ;;  %v3575_v29 = vor.u32 %v4239_v22, %v3572_v23  ;;  %v3578_v30 = vld [vmem:[#allocation2 + $0x140] sm:$0xf]  ;;  %v3583_v36 = vor.u32 %v4242_v48, %v3580_v2 }
 0x430   :  { %v4244_v31 = vld [vmem:[#allocation2 + $0x14c] sm:$0xf0]  ;;  %v4235_v32 = vld [vmem:[#allocation2 + $0x10c] sm:$0xf]  ;;  %v3556_v35 = vld [vmem:[#allocation2 + $0x118] sm:$0xf0]  ;;  %v3571_v37 = vor.u32 %v4241_v27, %v3570_v26  ;;  %v1927_v27 = vstv %s4925_s25 }
 0x431   :  { %1861 = vmatpush.bf16.msrb.mxu1 %v3615_v49  ;;  %v4238_v38 = vld [vmem:[#allocation2 + $0x124] sm:$0xf]  ;;  %v3564_v39 = vld [vmem:[#allocation2 + $0x130] sm:$0xf0]  ;;  %v3554_v40 = vld [vmem:[#allocation2 + $0x108] sm:$0xf]  ;;  %v3579_v63 = vor.u32 %v4244_v31, %v3578_v30  ;;  %v3559_v18 = vor.u32 %v4235_v32, %v3556_v35 }
 0x432   :  { %1888 = vmatpush.bf16.msrb.mxu3 %v3607_v6  ;;  %v4237_v0 = vld [vmem:[#allocation2 + $0x114] sm:$0xf0]  ;;  %v3562_v41 = vld [vmem:[#allocation2 + $0x120] sm:$0xf]  ;;  %v4240_v42 = vld [vmem:[#allocation2 + $0x12c] sm:$0xf0]  ;;  %v3567_v43 = vor.u32 %v4238_v38, %v3564_v39 }
 0x433   :  { %1875 = vmatpush.bf16.msrb.mxu2 %v3603_v1  ;;  %1848 = vmatpush.bf16.msrb.mxu0 %v3611_v14  ;;  %v3555_v44 = vor.u32 %v4237_v0, %v3554_v40  ;;  %v4234_v45 = vld [vmem:[#allocation2 + $0x104] sm:$0xf]  ;;  %v3548_v46 = vld [vmem:[#allocation2 + $0x110] sm:$0xf0]  ;;  %v3563_v50 = vor.u32 %v4240_v42, %v3562_v41  ;;  %v3546_v51 = vld [vmem:[#allocation2 + $0x100] sm:$0xf] }
 0x434   :  { %v4236_v52 = vld [vmem:[#allocation2 + $0x10c] sm:$0xf0]  ;;  %v3551_v53 = vor.u32 %v4234_v45, %v3548_v46  ;;  %v1680_v55 = vperm.slane %v4928_v3, 3  ;;  %v1679_v61 = vperm.slane %v4928_v3, 2  ;;  %v1678_v62 = vperm.slane %v4928_v3, 1 }
 0x435   :  { %1862 = vmatpush.bf16.msrb.mxu1 %v3599_v24  ;;  %v3547_v54 = vor.u32 %v4236_v52, %v3546_v51  ;;  %v1677_v33 = vperm.slane %v4928_v3, 0 }
 0x436   :  { %1889 = vmatpush.bf16.msrb.mxu3 %v3591_v15 }
 0x437   :  { %1876 = vmatpush.bf16.msrb.mxu2 %v3587_v25  ;;  %1849 = vmatpush.bf16.msrb.mxu0 %v3595_v28 }
 0x439   :  { %1863 = vmatpush.bf16.msrb.mxu1 %v3583_v36 }
 0x43a   :  { %1890 = vmatpush.bf16.msrb.mxu3 %v3575_v29 }
 0x43b   :  { %1877 = vmatpush.bf16.msrb.mxu2 %v3571_v37  ;;  %1850 = vmatpush.bf16.msrb.mxu0 %v3579_v63 }
 0x43d   :  { %1864 = vmatpush.bf16.msrb.mxu1 %v3567_v43 }
 0x43e   :  { %1891 = vmatpush.bf16.msrb.mxu3 %v3559_v18 }
 0x43f   :  { %1878 = vmatpush.bf16.msrb.mxu2 %v3555_v44  ;;  %1851 = vmatpush.bf16.msrb.mxu0 %v3563_v50 }
 0x441   :  { %1892 = vmatmul.bf16.vlgmr.msrb.gmra.mxu3 %v1643_v47  ;;  %1865 = vmatpush.bf16.msrb.mxu1 %v3551_v53 }
 0x442   :  { %1879 = vmatmul.bf16.vlgmr.msrb.gmra.mxu2 %v1643_v47 }
 0x443   :  { %1852 = vmatpush.bf16.msrb.mxu0 %v3547_v54 }
 0x444   :  { %1866 = vmatmul.bf16.vlgmr.msrb.gmra.mxu1 %v1643_v47 }
 0x446   :  { %1853 = vmatmul.bf16.vlgmr.msrb.gmra.mxu0 %v1643_v47 }
 0x4c1   :  { %v1867_v17 = vpop.f32.mrf.mxu1 }
 0x4c2   :  { %v1868_v9 = vadd.f32 %v1867_v17, %v1678_v62 }
 0x4c3   :  { %v1854_v56 = vpop.f32.mrf.mxu0 }
 0x4c4   :  { %v1893_v16 = vpop.f32.mrf.mxu3  ;;  %v1900_v49 = vmax.f32 %v1868_v9, 0.0  ;;  %v1855_v1 = vadd.f32 %v1854_v56, %v1677_v33 }
 0x4c5   :  { %v1894_v34 = vadd.f32 %v1893_v16, %v1680_v55  ;;  %v1880_v57 = vpop.f32.mrf.mxu2 }
 0x4c6   :  { %v1881_v8 = vadd.f32 %v1880_v57, %v1679_v61  ;;  %v1902_v13 = vmul.f32 %v1901_v10, %v1900_v49  ;;  %v1898_v14 = vmul.f32 %v1897_v11, %v1855_v1 }
 0x4c7   :  { %v3672_v58 = vmul.f32 -1.442695, %v1894_v34 }
 0x4c8   :  { %v1903_v24 = vadd.f32 %v1902_v13, %v1898_v14 }
 0x4c9   :  { %4400 = vpow2.f32 %v3672_v58  ;;  %v1869_v59 = vpop.f32.mrf.mxu1 }
 0x4cb   :  { %v1856_v4 = vpop.f32.mrf.mxu0 }
 0x4cc   :  { %v1895_v60 = vpop.f32.mrf.mxu3 }
 0x4cd   :  { %v1882_v5 = vpop.f32.mrf.mxu2 }
 0x4cf   :  { %v4401_v6 = vpop.eup %4400 }
 0x4d0   :  { %v1911_v7 = vadd.f32 1.0, %v4401_v6 }
 0x4d2   :  { %4402 = vrcp.f32 %v1911_v7  ;;  %v1923_v23 = vand.u32 2147483648, %v1911_v7  ;;  %v1921_v3 = vand.u32 2147483647, %v1911_v7  ;;  %vm1917_vm5 = vweird.f32 %v1911_v7 }
 0x4d3   :  { %4404 = vtanh.f32 %v1881_v8 }
 0x4d4   :  { %v1924_v26 = vor.u32 1.1754944e-38, %v1923_v23  ;;  %vm1922_vm7 = vcmp.eq.f32.partialorder %v1921_v3, 8.507059e+37 }
 0x4d8   :  { %v4403_v12 = vpop.eup %4402 }
 0x4d9   :  { %v1913_v15 = vmul.f32 %v4403_v12, %v1911_v7  ;;  %v4405_v20 = vpop.eup %4404  ;;  %vm1918_vm4 = vweird.f32 %v4403_v12 }
 0x4da   :  { %v1906_v48 = vmul.f32 %v4405_v20, %v1905_v21  ;;  %vm1919_vm6 = vmor %vm1917_vm5, %vm1918_vm4 }
 0x4db   :  { %v1914_v22 = vsub.f32 1.0, %v1913_v15 }
 0x4dc   :  { %v1907_v28 = vadd.f32 %v1906_v48, %v1903_v24 }
 0x4dd   :  { %v1915_v25 = vmul.f32 %v4403_v12, %v1914_v22 }
 0x4df   :  { %v1916_v2 = vadd.f32 %v4403_v12, %v1915_v25 }
 0x4e1   :  { %v1920_v29 = vsel %vm1919_vm6, %v4403_v12, %v1916_v2 }
 0x4e2   :  { %v1925_v30 = vsel %vm1922_vm7, %v1924_v26, %v1920_v29 }
 0x4e3   :  { %v1928_v31 = vmul.f32 %v1927_v27, %v1925_v30 }
 0x4e5   :  { %v4966_v32 = vadd.f32 %v1928_v31, %v1907_v28 }
 0x4e6   :  { %4742 = dma.done.wait [#allocation3], 4096 }
 0x4e7   :  { %4743 = vsyncadd [#allocation3], 4294963200  ;;  %s1938_s8 = scalar_lea.hbm %s5036_s3, 1792  ;;  %s4971_s9 = sld [smem:[#allocation4 + $0x1c]] }
 0x4e8   :  { %s1946_s10 = sshll.u32 %s1938_s8, 4  ;;  %s4973_s11 = sld [smem:[#allocation4 + $0x1d]]  ;;  %v4980_v35 = vld [vmem:[#allocation9 + $0x7] ss:$8 sm:$0xf]  ;;  %s1947_s10 = int_to_ptr.hbm [resolvable:$true] %s1946_s10 }
 0x4e9   :  { %s4975_s12 = sld [smem:[#allocation4 + $0x1e]] }
 0x4ea   :  { %s4977_s13 = sld [smem:[#allocation4 + $0x1f]] }
 0x4eb   :  { %1951 = dma.hbm_to_vmem [thread:$0]  %s1947_s10, 4096, %s4821_s19, [#allocation3 + $0x1] }
 0x4ec   :  { %v4295_v36 = vld [vmem:[#allocation2 + $0xec] sm:$0xf]  ;;  %v3801_v37 = vld [vmem:[#allocation2 + $0xf8] sm:$0xf0]  ;;  %v3799_v0 = vld [vmem:[#allocation2 + $0xe8] sm:$0xf] }
 0x4ed   :  { %v4291_v38 = vld [vmem:[#allocation2 + $0xcc] sm:$0xf]  ;;  %v3804_v39 = vor.u32 %v4295_v36, %v3801_v37  ;;  %v3785_v40 = vld [vmem:[#allocation2 + $0xd8] sm:$0xf0]  ;;  %v4297_v63 = vld [vmem:[#allocation2 + $0xf4] sm:$0xf0] }
 0x4ee   :  { %v3788_v18 = vor.u32 %v4291_v38, %v3785_v40  ;;  %v3800_v41 = vor.u32 %v4297_v63, %v3799_v0  ;;  %v3783_v42 = vld [vmem:[#allocation2 + $0xc8] sm:$0xf]  ;;  %v4293_v43 = vld [vmem:[#allocation2 + $0xd4] sm:$0xf0]  ;;  %v4287_v44 = vld [vmem:[#allocation2 + $0xac] sm:$0xf] }
 0x4ef   :  { %2193 = vmatpush.bf16.msra.mxu3 %v3804_v39  ;;  %v3769_v45 = vld [vmem:[#allocation2 + $0xb8] sm:$0xf0]  ;;  %v3784_v46 = vor.u32 %v4293_v43, %v3783_v42  ;;  %v4294_v47 = vld [vmem:[#allocation2 + $0xe4] sm:$0xf]  ;;  %v3793_v50 = vld [vmem:[#allocation2 + $0xf0] sm:$0xf0] }
 0x4f0   :  { %2180 = vmatpush.bf16.msra.mxu2 %v3800_v41  ;;  %v3767_v51 = vld [vmem:[#allocation2 + $0xa8] sm:$0xf]  ;;  %v4289_v52 = vld [vmem:[#allocation2 + $0xb4] sm:$0xf0]  ;;  %v3796_v53 = vor.u32 %v4294_v47, %v3793_v50  ;;  %v3791_v54 = vld [vmem:[#allocation2 + $0xe0] sm:$0xf]  ;;  %v3772_v55 = vor.u32 %v4287_v44, %v3769_v45 }
 0x4f1   :  { %v4283_v17 = vld [vmem:[#allocation2 + $0x8c] sm:$0xf]  ;;  %v4296_v16 = vld [vmem:[#allocation2 + $0xec] sm:$0xf0]  ;;  %v3753_v34 = vld [vmem:[#allocation2 + $0x98] sm:$0xf0]  ;;  %v3768_v59 = vor.u32 %v4289_v52, %v3767_v51 }
 0x4f2   :  { %2167 = vmatpush.bf16.msra.mxu1 %v3796_v53  ;;  %v3792_v56 = vor.u32 %v4296_v16, %v3791_v54  ;;  %v4290_v57 = vld [vmem:[#allocation2 + $0xc4] sm:$0xf]  ;;  %v3777_v58 = vld [vmem:[#allocation2 + $0xd0] sm:$0xf0]  ;;  %v3775_v61 = vld [vmem:[#allocation2 + $0xc0] sm:$0xf]  ;;  %v3756_v8 = vor.u32 %v4283_v17, %v3753_v34 }
 0x4f3   :  { %2194 = vmatpush.bf16.msra.mxu3 %v3788_v18  ;;  %v3780_v60 = vor.u32 %v4290_v57, %v3777_v58  ;;  %v4292_v62 = vld [vmem:[#allocation2 + $0xcc] sm:$0xf0]  ;;  %v3751_v4 = vld [vmem:[#allocation2 + $0x88] sm:$0xf]  ;;  %v4285_v5 = vld [vmem:[#allocation2 + $0x94] sm:$0xf0] }
 0x4f4   :  { %2181 = vmatpush.bf16.msra.mxu2 %v3784_v46  ;;  %2154 = vmatpush.bf16.msra.mxu0 %v3792_v56  ;;  %v3776_v6 = vor.u32 %v4292_v62, %v3775_v61  ;;  %v4286_v7 = vld [vmem:[#allocation2 + $0xa4] sm:$0xf]  ;;  %v4279_v9 = vld [vmem:[#allocation2 + $0x6c] sm:$0xf]  ;;  %v3761_v33 = vld [vmem:[#allocation2 + $0xb0] sm:$0xf0]  ;;  %v3752_v12 = vor.u32 %v4285_v5, %v3751_v4  ;;  %v1952_v62 = vpack.c.bf16 %v4966_v32, %v4966_v32 }
 0x4f5   :  { %v3737_v49 = vld [vmem:[#allocation2 + $0x78] sm:$0xf0]  ;;  %v3764_v1 = vor.u32 %v4286_v7, %v3761_v33  ;;  %v3759_v10 = vld [vmem:[#allocation2 + $0xa0] sm:$0xf]  ;;  %v4288_v11 = vld [vmem:[#allocation2 + $0xac] sm:$0xf0] }
 0x4f6   :  { %2168 = vmatpush.bf16.msra.mxu1 %v3780_v60  ;;  %v4282_v13 = vld [vmem:[#allocation2 + $0x84] sm:$0xf]  ;;  %v3745_v14 = vld [vmem:[#allocation2 + $0x90] sm:$0xf0]  ;;  %v3735_v15 = vld [vmem:[#allocation2 + $0x68] sm:$0xf]  ;;  %v3760_v21 = vor.u32 %v4288_v11, %v3759_v10  ;;  %v3740_v22 = vor.u32 %v4279_v9, %v3737_v49 }
 0x4f7   :  { %2195 = vmatpush.bf16.msra.mxu3 %v3772_v55  ;;  %v4281_v20 = vld [vmem:[#allocation2 + $0x74] sm:$0xf0]  ;;  %v3743_v23 = vld [vmem:[#allocation2 + $0x80] sm:$0xf]  ;;  %v4284_v24 = vld [vmem:[#allocation2 + $0x8c] sm:$0xf0]  ;;  %v3748_v3 = vor.u32 %v4282_v13, %v3745_v14 }
 0x4f8   :  { %2182 = vmatpush.bf16.msra.mxu2 %v3768_v59  ;;  %2155 = vmatpush.bf16.msra.mxu0 %v3776_v6  ;;  %v4275_v25 = vld [vmem:[#allocation2 + $0x4c] sm:$0xf]  ;;  %v3721_v48 = vld [vmem:[#allocation2 + $0x58] sm:$0xf0]  ;;  %v3736_v2 = vor.u32 %v4281_v20, %v3735_v15  ;;  %v4278_v26 = vld [vmem:[#allocation2 + $0x64] sm:$0xf]  ;;  %v3744_v30 = vor.u32 %v4284_v24, %v3743_v23 }
 0x4f9   :  { %v3729_v27 = vld [vmem:[#allocation2 + $0x70] sm:$0xf0]  ;;  %v3719_v28 = vld [vmem:[#allocation2 + $0x48] sm:$0xf]  ;;  %v4277_v29 = vld [vmem:[#allocation2 + $0x54] sm:$0xf0]  ;;  %v3724_v31 = vor.u32 %v4275_v25, %v3721_v48 }
 0x4fa   :  { %2169 = vmatpush.bf16.msra.mxu1 %v3764_v1  ;;  %v3727_v36 = vld [vmem:[#allocation2 + $0x60] sm:$0xf]  ;;  %v4280_v37 = vld [vmem:[#allocation2 + $0x6c] sm:$0xf0]  ;;  %v4271_v38 = vld [vmem:[#allocation2 + $0x2c] sm:$0xf]  ;;  %v3732_v40 = vor.u32 %v4278_v26, %v3729_v27  ;;  %v3720_v0 = vor.u32 %v4277_v29, %v3719_v28  ;;  %v2210_v26 = vstv %s4947_s1  ;;  %v2206_v27 = vstv %s4945_s0 }
 0x4fb   :  { %2196 = vmatpush.bf16.msra.mxu3 %v3756_v8  ;;  %v3705_v39 = vld [vmem:[#allocation2 + $0x38] sm:$0xf0]  ;;  %v4274_v63 = vld [vmem:[#allocation2 + $0x44] sm:$0xf]  ;;  %v3713_v18 = vld [vmem:[#allocation2 + $0x50] sm:$0xf0]  ;;  %v3728_v43 = vor.u32 %v4280_v37, %v3727_v36  ;;  %v2214_v37 = vstv %s4949_s30 }
 0x4fc   :  { %2183 = vmatpush.bf16.msra.mxu2 %v3752_v12  ;;  %2156 = vmatpush.bf16.msra.mxu0 %v3760_v21  ;;  %v3703_v41 = vld [vmem:[#allocation2 + $0x28] sm:$0xf]  ;;  %v4273_v42 = vld [vmem:[#allocation2 + $0x34] sm:$0xf0]  ;;  %v3708_v44 = vor.u32 %v4271_v38, %v3705_v39  ;;  %v3711_v45 = vld [vmem:[#allocation2 + $0x40] sm:$0xf]  ;;  %v3716_v51 = vor.u32 %v4274_v63, %v3713_v18 }
 0x4fd   :  { %v4276_v46 = vld [vmem:[#allocation2 + $0x4c] sm:$0xf0]  ;;  %v4267_v47 = vld [vmem:[#allocation2 + $0xc] sm:$0xf]  ;;  %v3689_v50 = vld [vmem:[#allocation2 + $0x18] sm:$0xf0]  ;;  %v3704_v52 = vor.u32 %v4273_v42, %v3703_v41  ;;  %v2236_v42 = vstv %s4951_s2 }
 0x4fe   :  { %2170 = vmatpush.bf16.msra.mxu1 %v3748_v3  ;;  %v4270_v53 = vld [vmem:[#allocation2 + $0x24] sm:$0xf]  ;;  %v3697_v54 = vld [vmem:[#allocation2 + $0x30] sm:$0xf0]  ;;  %v3687_v55 = vld [vmem:[#allocation2 + $0x8] sm:$0xf]  ;;  %v3712_v16 = vor.u32 %v4276_v46, %v3711_v45  ;;  %v3692_v34 = vor.u32 %v4267_v47, %v3689_v50 }
 0x4ff   :  { %2197 = vmatpush.bf16.msra.mxu3 %v3740_v22  ;;  %v4269_v17 = vld [vmem:[#allocation2 + $0x14] sm:$0xf0]  ;;  %v3695_v56 = vld [vmem:[#allocation2 + $0x20] sm:$0xf]  ;;  %v4272_v57 = vld [vmem:[#allocation2 + $0x2c] sm:$0xf0]  ;;  %v3700_v58 = vor.u32 %v4270_v53, %v3697_v54 }
 0x500   :  { %2184 = vmatpush.bf16.msra.mxu2 %v3736_v2  ;;  %2157 = vmatpush.bf16.msra.mxu0 %v3744_v30  ;;  %v3688_v59 = vor.u32 %v4269_v17, %v3687_v55  ;;  %v4266_v60 = vld [vmem:[#allocation2 + $0x4] sm:$0xf]  ;;  %v3681_v61 = vld [vmem:[#allocation2 + $0x10] sm:$0xf0]  ;;  %v3696_v4 = vor.u32 %v4272_v57, %v3695_v56  ;;  %v3679_v5 = vld [vmem:[#allocation2] sm:$0xf] }
 0x501   :  { %v4268_v6 = vld [vmem:[#allocation2 + $0xc] sm:$0xf0]  ;;  %v3684_v7 = vor.u32 %v4266_v60, %v3681_v61  ;;  %v1989_v9 = vperm.slane %v4954_v19, 3  ;;  %v1988_v14 = vperm.slane %v4954_v19, 2  ;;  %v1987_v15 = vperm.slane %v4954_v19, 1 }
 0x502   :  { %2171 = vmatpush.bf16.msra.mxu1 %v3732_v40  ;;  %v3680_v8 = vor.u32 %v4268_v6, %v3679_v5  ;;  %v1986_v48 = vperm.slane %v4954_v19, 0 }
 0x503   :  { %2198 = vmatpush.bf16.msra.mxu3 %v3724_v31 }
 0x504   :  { %2185 = vmatpush.bf16.msra.mxu2 %v3720_v0  ;;  %2158 = vmatpush.bf16.msra.mxu0 %v3728_v43 }
 0x506   :  { %2172 = vmatpush.bf16.msra.mxu1 %v3716_v51 }
 0x507   :  { %2199 = vmatpush.bf16.msra.mxu3 %v3708_v44 }
 0x508   :  { %2186 = vmatpush.bf16.msra.mxu2 %v3704_v52  ;;  %2159 = vmatpush.bf16.msra.mxu0 %v3712_v16 }
 0x50a   :  { %2173 = vmatpush.bf16.msra.mxu1 %v3700_v58 }
 0x50b   :  { %2200 = vmatpush.bf16.msra.mxu3 %v3692_v34 }
 0x50c   :  { %2187 = vmatpush.bf16.msra.mxu2 %v3688_v59  ;;  %2160 = vmatpush.bf16.msra.mxu0 %v3696_v4 }
 0x50e   :  { %2201 = vmatmul.bf16.vlgmr.msra.gmra.mxu3 %v1952_v62  ;;  %2174 = vmatpush.bf16.msra.mxu1 %v3684_v7 }
 0x50f   :  { %2188 = vmatmul.bf16.vlgmr.msra.gmra.mxu2 %v1952_v62 }
 0x510   :  { %2161 = vmatpush.bf16.msra.mxu0 %v3680_v8 }
 0x511   :  { %2175 = vmatmul.bf16.vlgmr.msra.gmra.mxu1 %v1952_v62 }
 0x513   :  { %2162 = vmatmul.bf16.vlgmr.msra.gmra.mxu0 %v1952_v62 }
 0x58e   :  { %v2176_v33 = vpop.f32.mrf.mxu1 }
 0x58f   :  { %v2177_v25 = vadd.f32 %v2176_v33, %v1987_v15 }
 0x590   :  { %v2163_v1 = vpop.f32.mrf.mxu0 }
 0x591   :  { %v2202_v32 = vpop.f32.mrf.mxu3  ;;  %v2209_v3 = vmax.f32 %v2177_v25, 0.0  ;;  %v2164_v2 = vadd.f32 %v2163_v1, %v1986_v48 }
 0x592   :  { %v2203_v49 = vadd.f32 %v2202_v32, %v1989_v9  ;;  %v2189_v10 = vpop.f32.mrf.mxu2 }
 0x593   :  { %v2190_v24 = vadd.f32 %v2189_v10, %v1988_v14  ;;  %v2211_v29 = vmul.f32 %v2210_v26, %v2209_v3  ;;  %v2207_v30 = vmul.f32 %v2206_v27, %v2164_v2 }
 0x594   :  { %v3805_v11 = vmul.f32 -1.442695, %v2203_v49 }
 0x595   :  { %v2212_v40 = vadd.f32 %v2211_v29, %v2207_v30 }
 0x596   :  { %4406 = vpow2.f32 %v3805_v11  ;;  %v2178_v12 = vpop.f32.mrf.mxu1 }
 0x598   :  { %v2165_v20 = vpop.f32.mrf.mxu0 }
 0x599   :  { %v2204_v13 = vpop.f32.mrf.mxu3 }
 0x59a   :  { %v2191_v21 = vpop.f32.mrf.mxu2 }
 0x59c   :  { %v4407_v22 = vpop.eup %4406 }
 0x59d   :  { %v2220_v23 = vadd.f32 1.0, %v4407_v22 }
 0x59f   :  { %4408 = vrcp.f32 %v2220_v23  ;;  %v2232_v39 = vand.u32 2147483648, %v2220_v23  ;;  %v2230_v19 = vand.u32 2147483647, %v2220_v23  ;;  %vm2226_vm9 = vweird.f32 %v2220_v23 }
 0x5a0   :  { %4410 = vtanh.f32 %v2190_v24 }
 0x5a1   :  { %v2233_v41 = vor.u32 1.1754944e-38, %v2232_v39  ;;  %vm2231_vm11 = vcmp.eq.f32.partialorder %v2230_v19, 8.507059e+37 }
 0x5a5   :  { %v4409_v28 = vpop.eup %4408 }
 0x5a6   :  { %v2222_v31 = vmul.f32 %v4409_v28, %v2220_v23  ;;  %v4411_v36 = vpop.eup %4410  ;;  %vm2227_vm8 = vweird.f32 %v4409_v28 }
 0x5a7   :  { %v2215_v63 = vmul.f32 %v4411_v36, %v2214_v37  ;;  %vm2228_vm10 = vmor %vm2226_vm9, %vm2227_vm8 }
 0x5a8   :  { %v2223_v38 = vsub.f32 1.0, %v2222_v31 }
 0x5a9   :  { %v2216_v43 = vadd.f32 %v2215_v63, %v2212_v40 }
 0x5aa   :  { %v2224_v0 = vmul.f32 %v4409_v28, %v2223_v38 }
 0x5ac   :  { %v2225_v18 = vadd.f32 %v4409_v28, %v2224_v0 }
 0x5ae   :  { %v2229_v44 = vsel %vm2228_vm10, %v4409_v28, %v2225_v18 }
 0x5af   :  { %v2234_v45 = vsel %vm2231_vm11, %v2233_v41, %v2229_v44 }
 0x5b0   :  { %v2237_v46 = vmul.f32 %v2236_v42, %v2234_v45 }
 0x5b2   :  { %v4992_v47 = vadd.f32 %v2237_v46, %v2216_v43 }
 0x5b3   :  { %4744 = dma.done.wait [#allocation3 + $0x1], 4096 }
 0x5b4   :  { %4745 = vsyncadd [#allocation3 + $0x1], 4294963200  ;;  %s2247_s15 = scalar_lea.hbm %s5036_s3, 2048  ;;  %s4997_s16 = sld [smem:[#allocation4 + $0x20]] }
 0x5b5   :  { %s2255_s17 = sshll.u32 %s2247_s15, 4  ;;  %s4999_s18 = sld [smem:[#allocation4 + $0x21]]  ;;  %v5006_v50 = vld [vmem:[#allocation9 + $0x20] ss:$8 sm:$0xf]  ;;  %s2256_s17 = int_to_ptr.hbm [resolvable:$true] %s2255_s17 }
 0x5b6   :  { %s5001_s20 = sld [smem:[#allocation4 + $0x22]] }
 0x5b7   :  { %s5003_s21 = sld [smem:[#allocation4 + $0x23]] }
 0x5b8   :  { %2260 = dma.hbm_to_vmem [thread:$0]  %s2256_s17, 4096, %s4799_s6, [#allocation3] }
 0x5b9   :  { %v4327_v51 = vld [vmem:[#allocation2 + $0x1ec] sm:$0xf]  ;;  %v3934_v52 = vld [vmem:[#allocation2 + $0x1f8] sm:$0xf0]  ;;  %v3932_v17 = vld [vmem:[#allocation2 + $0x1e8] sm:$0xf] }
 0x5ba   :  { %v4323_v53 = vld [vmem:[#allocation2 + $0x1cc] sm:$0xf]  ;;  %v3937_v54 = vor.u32 %v4327_v51, %v3934_v52  ;;  %v3918_v55 = vld [vmem:[#allocation2 + $0x1d8] sm:$0xf0]  ;;  %v4329_v16 = vld [vmem:[#allocation2 + $0x1f4] sm:$0xf0] }
 0x5bb   :  { %v3921_v34 = vor.u32 %v4323_v53, %v3918_v55  ;;  %v3933_v56 = vor.u32 %v4329_v16, %v3932_v17  ;;  %v3916_v57 = vld [vmem:[#allocation2 + $0x1c8] sm:$0xf]  ;;  %v4325_v58 = vld [vmem:[#allocation2 + $0x1d4] sm:$0xf0]  ;;  %v4319_v59 = vld [vmem:[#allocation2 + $0x1ac] sm:$0xf] }
 0x5bc   :  { %2502 = vmatpush.bf16.msrb.mxu3 %v3937_v54  ;;  %v3902_v60 = vld [vmem:[#allocation2 + $0x1b8] sm:$0xf0]  ;;  %v3917_v61 = vor.u32 %v4325_v58, %v3916_v57  ;;  %v4326_v62 = vld [vmem:[#allocation2 + $0x1e4] sm:$0xf]  ;;  %v3926_v4 = vld [vmem:[#allocation2 + $0x1f0] sm:$0xf0] }
 0x5bd   :  { %2489 = vmatpush.bf16.msrb.mxu2 %v3933_v56  ;;  %v3900_v5 = vld [vmem:[#allocation2 + $0x1a8] sm:$0xf]  ;;  %v4321_v6 = vld [vmem:[#allocation2 + $0x1b4] sm:$0xf0]  ;;  %v3929_v7 = vor.u32 %v4326_v62, %v3926_v4  ;;  %v3924_v8 = vld [vmem:[#allocation2 + $0x1e0] sm:$0xf]  ;;  %v3905_v9 = vor.u32 %v4319_v59, %v3902_v60 }
 0x5be   :  { %v4315_v33 = vld [vmem:[#allocation2 + $0x18c] sm:$0xf]  ;;  %v4328_v32 = vld [vmem:[#allocation2 + $0x1ec] sm:$0xf0]  ;;  %v3886_v49 = vld [vmem:[#allocation2 + $0x198] sm:$0xf0]  ;;  %v3901_v12 = vor.u32 %v4321_v6, %v3900_v5 }
 0x5bf   :  { %2476 = vmatpush.bf16.msrb.mxu1 %v3929_v7  ;;  %v3925_v1 = vor.u32 %v4328_v32, %v3924_v8  ;;  %v4322_v10 = vld [vmem:[#allocation2 + $0x1c4] sm:$0xf]  ;;  %v3910_v11 = vld [vmem:[#allocation2 + $0x1d0] sm:$0xf0]  ;;  %v3908_v14 = vld [vmem:[#allocation2 + $0x1c0] sm:$0xf]  ;;  %v3889_v24 = vor.u32 %v4315_v33, %v3886_v49 }
 0x5c0   :  { %2503 = vmatpush.bf16.msrb.mxu3 %v3921_v34  ;;  %v3913_v13 = vor.u32 %v4322_v10, %v3910_v11  ;;  %v4324_v15 = vld [vmem:[#allocation2 + $0x1cc] sm:$0xf0]  ;;  %v3884_v20 = vld [vmem:[#allocation2 + $0x188] sm:$0xf]  ;;  %v4317_v21 = vld [vmem:[#allocation2 + $0x194] sm:$0xf0] }
 0x5c1   :  { %2490 = vmatpush.bf16.msrb.mxu2 %v3917_v61  ;;  %2463 = vmatpush.bf16.msrb.mxu0 %v3925_v1  ;;  %v3909_v22 = vor.u32 %v4324_v15, %v3908_v14  ;;  %v4318_v23 = vld [vmem:[#allocation2 + $0x1a4] sm:$0xf]  ;;  %v4311_v25 = vld [vmem:[#allocation2 + $0x16c] sm:$0xf]  ;;  %v3894_v48 = vld [vmem:[#allocation2 + $0x1b0] sm:$0xf0]  ;;  %v3885_v28 = vor.u32 %v4317_v21, %v3884_v20  ;;  %v2261_v15 = vpack.c.bf16 %v4992_v47, %v4992_v47 }
 0x5c2   :  { %v3870_v3 = vld [vmem:[#allocation2 + $0x178] sm:$0xf0]  ;;  %v3897_v2 = vor.u32 %v4318_v23, %v3894_v48  ;;  %v3892_v26 = vld [vmem:[#allocation2 + $0x1a0] sm:$0xf]  ;;  %v4320_v27 = vld [vmem:[#allocation2 + $0x1ac] sm:$0xf0] }
 0x5c3   :  { %2477 = vmatpush.bf16.msrb.mxu1 %v3913_v13  ;;  %v4314_v29 = vld [vmem:[#allocation2 + $0x184] sm:$0xf]  ;;  %v3878_v30 = vld [vmem:[#allocation2 + $0x190] sm:$0xf0]  ;;  %v3868_v31 = vld [vmem:[#allocation2 + $0x168] sm:$0xf]  ;;  %v3893_v37 = vor.u32 %v4320_v27, %v3892_v26  ;;  %v3873_v38 = vor.u32 %v4311_v25, %v3870_v3 }
 0x5c4   :  { %2504 = vmatpush.bf16.msrb.mxu3 %v3905_v9  ;;  %v4313_v36 = vld [vmem:[#allocation2 + $0x174] sm:$0xf0]  ;;  %v3876_v39 = vld [vmem:[#allocation2 + $0x180] sm:$0xf]  ;;  %v4316_v40 = vld [vmem:[#allocation2 + $0x18c] sm:$0xf0]  ;;  %v3881_v19 = vor.u32 %v4314_v29, %v3878_v30 }
 0x5c5   :  { %2491 = vmatpush.bf16.msrb.mxu2 %v3901_v12  ;;  %2464 = vmatpush.bf16.msrb.mxu0 %v3909_v22  ;;  %v4307_v0 = vld [vmem:[#allocation2 + $0x14c] sm:$0xf]  ;;  %v3854_v63 = vld [vmem:[#allocation2 + $0x158] sm:$0xf0]  ;;  %v3869_v18 = vor.u32 %v4313_v36, %v3868_v31  ;;  %v4310_v41 = vld [vmem:[#allocation2 + $0x164] sm:$0xf]  ;;  %v3877_v45 = vor.u32 %v4316_v40, %v3876_v39 }
 0x5c6   :  { %v3862_v42 = vld [vmem:[#allocation2 + $0x170] sm:$0xf0]  ;;  %v3852_v43 = vld [vmem:[#allocation2 + $0x148] sm:$0xf]  ;;  %v4309_v44 = vld [vmem:[#allocation2 + $0x154] sm:$0xf0]  ;;  %v3857_v46 = vor.u32 %v4307_v0, %v3854_v63 }
 0x5c7   :  { %2478 = vmatpush.bf16.msrb.mxu1 %v3897_v2  ;;  %v3860_v51 = vld [vmem:[#allocation2 + $0x160] sm:$0xf]  ;;  %v4312_v52 = vld [vmem:[#allocation2 + $0x16c] sm:$0xf0]  ;;  %v4303_v53 = vld [vmem:[#allocation2 + $0x12c] sm:$0xf]  ;;  %v3865_v55 = vor.u32 %v4310_v41, %v3862_v42  ;;  %v3853_v17 = vor.u32 %v4309_v44, %v3852_v43  ;;  %v2519_v41 = vstv %s4973_s11  ;;  %v2515_v42 = vstv %s4971_s9 }
 0x5c8   :  { %2505 = vmatpush.bf16.msrb.mxu3 %v3889_v24  ;;  %v3838_v54 = vld [vmem:[#allocation2 + $0x138] sm:$0xf0]  ;;  %v4306_v16 = vld [vmem:[#allocation2 + $0x144] sm:$0xf]  ;;  %v3846_v34 = vld [vmem:[#allocation2 + $0x150] sm:$0xf0]  ;;  %v3861_v58 = vor.u32 %v4312_v52, %v3860_v51  ;;  %v2523_v52 = vstv %s4975_s12 }
 0x5c9   :  { %2492 = vmatpush.bf16.msrb.mxu2 %v3885_v28  ;;  %2465 = vmatpush.bf16.msrb.mxu0 %v3893_v37  ;;  %v3836_v56 = vld [vmem:[#allocation2 + $0x128] sm:$0xf]  ;;  %v4305_v57 = vld [vmem:[#allocation2 + $0x134] sm:$0xf0]  ;;  %v3841_v59 = vor.u32 %v4303_v53, %v3838_v54  ;;  %v3844_v60 = vld [vmem:[#allocation2 + $0x140] sm:$0xf]  ;;  %v3849_v5 = vor.u32 %v4306_v16, %v3846_v34 }
 0x5ca   :  { %v4308_v61 = vld [vmem:[#allocation2 + $0x14c] sm:$0xf0]  ;;  %v4299_v62 = vld [vmem:[#allocation2 + $0x10c] sm:$0xf]  ;;  %v3822_v4 = vld [vmem:[#allocation2 + $0x118] sm:$0xf0]  ;;  %v3837_v6 = vor.u32 %v4305_v57, %v3836_v56  ;;  %v2545_v57 = vstv %s4977_s13 }
 0x5cb   :  { %2479 = vmatpush.bf16.msrb.mxu1 %v3881_v19  ;;  %v4302_v7 = vld [vmem:[#allocation2 + $0x124] sm:$0xf]  ;;  %v3830_v8 = vld [vmem:[#allocation2 + $0x130] sm:$0xf0]  ;;  %v3820_v9 = vld [vmem:[#allocation2 + $0x108] sm:$0xf]  ;;  %v3845_v32 = vor.u32 %v4308_v61, %v3844_v60  ;;  %v3825_v49 = vor.u32 %v4299_v62, %v3822_v4 }
 0x5cc   :  { %2506 = vmatpush.bf16.msrb.mxu3 %v3873_v38  ;;  %v4301_v33 = vld [vmem:[#allocation2 + $0x114] sm:$0xf0]  ;;  %v3828_v1 = vld [vmem:[#allocation2 + $0x120] sm:$0xf]  ;;  %v4304_v10 = vld [vmem:[#allocation2 + $0x12c] sm:$0xf0]  ;;  %v3833_v11 = vor.u32 %v4302_v7, %v3830_v8 }
 0x5cd   :  { %2493 = vmatpush.bf16.msrb.mxu2 %v3869_v18  ;;  %2466 = vmatpush.bf16.msrb.mxu0 %v3877_v45  ;;  %v3821_v12 = vor.u32 %v4301_v33, %v3820_v9  ;;  %v4298_v13 = vld [vmem:[#allocation2 + $0x104] sm:$0xf]  ;;  %v3814_v14 = vld [vmem:[#allocation2 + $0x110] sm:$0xf0]  ;;  %v3829_v20 = vor.u32 %v4304_v10, %v3828_v1  ;;  %v3812_v21 = vld [vmem:[#allocation2 + $0x100] sm:$0xf] }
 0x5ce   :  { %v4300_v22 = vld [vmem:[#allocation2 + $0x10c] sm:$0xf0]  ;;  %v3817_v23 = vor.u32 %v4298_v13, %v3814_v14  ;;  %v2298_v25 = vperm.slane %v4980_v35, 3  ;;  %v2297_v30 = vperm.slane %v4980_v35, 2  ;;  %v2296_v31 = vperm.slane %v4980_v35, 1 }
 0x5cf   :  { %2480 = vmatpush.bf16.msrb.mxu1 %v3865_v55  ;;  %v3813_v24 = vor.u32 %v4300_v22, %v3812_v21  ;;  %v2295_v63 = vperm.slane %v4980_v35, 0 }
 0x5d0   :  { %2507 = vmatpush.bf16.msrb.mxu3 %v3857_v46 }
 0x5d1   :  { %2494 = vmatpush.bf16.msrb.mxu2 %v3853_v17  ;;  %2467 = vmatpush.bf16.msrb.mxu0 %v3861_v58 }
 0x5d3   :  { %2481 = vmatpush.bf16.msrb.mxu1 %v3849_v5 }
 0x5d4   :  { %2508 = vmatpush.bf16.msrb.mxu3 %v3841_v59 }
 0x5d5   :  { %2495 = vmatpush.bf16.msrb.mxu2 %v3837_v6  ;;  %2468 = vmatpush.bf16.msrb.mxu0 %v3845_v32 }
 0x5d7   :  { %2482 = vmatpush.bf16.msrb.mxu1 %v3833_v11 }
 0x5d8   :  { %2509 = vmatpush.bf16.msrb.mxu3 %v3825_v49 }
 0x5d9   :  { %2496 = vmatpush.bf16.msrb.mxu2 %v3821_v12  ;;  %2469 = vmatpush.bf16.msrb.mxu0 %v3829_v20 }
 0x5db   :  { %2510 = vmatmul.bf16.vlgmr.msrb.gmra.mxu3 %v2261_v15  ;;  %2483 = vmatpush.bf16.msrb.mxu1 %v3817_v23 }
 0x5dc   :  { %2497 = vmatmul.bf16.vlgmr.msrb.gmra.mxu2 %v2261_v15 }
 0x5dd   :  { %2470 = vmatpush.bf16.msrb.mxu0 %v3813_v24 }
 0x5de   :  { %2484 = vmatmul.bf16.vlgmr.msrb.gmra.mxu1 %v2261_v15 }
 0x5e0   :  { %2471 = vmatmul.bf16.vlgmr.msrb.gmra.mxu0 %v2261_v15 }
 0x65b   :  { %v2485_v48 = vpop.f32.mrf.mxu1 }
 0x65c   :  { %v2486_v0 = vadd.f32 %v2485_v48, %v2296_v31 }
 0x65d   :  { %v2472_v2 = vpop.f32.mrf.mxu0 }
 0x65e   :  { %v2511_v47 = vpop.f32.mrf.mxu3  ;;  %v2518_v19 = vmax.f32 %v2486_v0, 0.0  ;;  %v2473_v18 = vadd.f32 %v2472_v2, %v2295_v63 }
 0x65f   :  { %v2512_v3 = vadd.f32 %v2511_v47, %v2298_v25  ;;  %v2498_v26 = vpop.f32.mrf.mxu2 }
 0x660   :  { %v2499_v40 = vadd.f32 %v2498_v26, %v2297_v30  ;;  %v2520_v44 = vmul.f32 %v2519_v41, %v2518_v19  ;;  %v2516_v45 = vmul.f32 %v2515_v42, %v2473_v18 }
 0x661   :  { %v3938_v27 = vmul.f32 -1.442695, %v2512_v3 }
 0x662   :  { %v2521_v55 = vadd.f32 %v2520_v44, %v2516_v45 }
 0x663   :  { %4412 = vpow2.f32 %v3938_v27  ;;  %v2487_v28 = vpop.f32.mrf.mxu1 }
 0x665   :  { %v2474_v36 = vpop.f32.mrf.mxu0 }
 0x666   :  { %v2513_v29 = vpop.f32.mrf.mxu3 }
 0x667   :  { %v2500_v37 = vpop.f32.mrf.mxu2 }
 0x669   :  { %v4413_v38 = vpop.eup %4412 }
 0x66a   :  { %v2529_v39 = vadd.f32 1.0, %v4413_v38 }
 0x66c   :  { %4414 = vrcp.f32 %v2529_v39  ;;  %v2541_v54 = vand.u32 2147483648, %v2529_v39  ;;  %v2539_v35 = vand.u32 2147483647, %v2529_v39  ;;  %vm2535_vm13 = vweird.f32 %v2529_v39 }
 0x66d   :  { %4416 = vtanh.f32 %v2499_v40 }
 0x66e   :  { %v2542_v56 = vor.u32 1.1754944e-38, %v2541_v54  ;;  %vm2540_vm15 = vcmp.eq.f32.partialorder %v2539_v35, 8.507059e+37 }
 0x672   :  { %v4415_v43 = vpop.eup %4414 }
 0x673   :  { %v2531_v46 = vmul.f32 %v4415_v43, %v2529_v39  ;;  %v4417_v51 = vpop.eup %4416  ;;  %vm2536_vm12 = vweird.f32 %v4415_v43 }
 0x674   :  { %v2524_v16 = vmul.f32 %v4417_v51, %v2523_v52  ;;  %vm2537_vm14 = vmor %vm2535_vm13, %vm2536_vm12 }
 0x675   :  { %v2532_v53 = vsub.f32 1.0, %v2531_v46 }
 0x676   :  { %v2525_v58 = vadd.f32 %v2524_v16, %v2521_v55 }
 0x677   :  { %v2533_v17 = vmul.f32 %v4415_v43, %v2532_v53 }
 0x679   :  { %v2534_v34 = vadd.f32 %v4415_v43, %v2533_v17 }
 0x67b   :  { %v2538_v59 = vsel %vm2537_vm14, %v4415_v43, %v2534_v34 }
 0x67c   :  { %v2543_v60 = vsel %vm2540_vm15, %v2542_v56, %v2538_v59 }
 0x67d   :  { %v2546_v61 = vmul.f32 %v2545_v57, %v2543_v60 }
 0x67f   :  { %v5018_v62 = vadd.f32 %v2546_v61, %v2525_v58 }
 0x680   :  { %4746 = dma.done.wait [#allocation3], 4096 }
 0x681   :  { %4747 = vsyncadd [#allocation3], 4294963200  ;;  %v4359_v4 = vld [vmem:[#allocation2 + $0xec] sm:$0xf]  ;;  %v4067_v5 = vld [vmem:[#allocation2 + $0xf8] sm:$0xf0] }
 0x682   :  { %v4355_v6 = vld [vmem:[#allocation2 + $0xcc] sm:$0xf]  ;;  %v4070_v7 = vor.u32 %v4359_v4, %v4067_v5  ;;  %v4051_v8 = vld [vmem:[#allocation2 + $0xd8] sm:$0xf0]  ;;  %v4065_v9 = vld [vmem:[#allocation2 + $0xe8] sm:$0xf] }
 0x683   :  { %v4361_v33 = vld [vmem:[#allocation2 + $0xf4] sm:$0xf0]  ;;  %v4054_v32 = vor.u32 %v4355_v6, %v4051_v8  ;;  %v4049_v1 = vld [vmem:[#allocation2 + $0xc8] sm:$0xf]  ;;  %v4351_v11 = vld [vmem:[#allocation2 + $0xac] sm:$0xf] }
 0x684   :  { %2797 = vmatpush.bf16.msra.mxu3 %v4070_v7  ;;  %v4066_v49 = vor.u32 %v4361_v33, %v4065_v9  ;;  %v4357_v10 = vld [vmem:[#allocation2 + $0xd4] sm:$0xf0]  ;;  %v4035_v12 = vld [vmem:[#allocation2 + $0xb8] sm:$0xf0]  ;;  %v4358_v14 = vld [vmem:[#allocation2 + $0xe4] sm:$0xf] }
 0x685   :  { %v4050_v13 = vor.u32 %v4357_v10, %v4049_v1  ;;  %v4059_v15 = vld [vmem:[#allocation2 + $0xf0] sm:$0xf0]  ;;  %v4033_v20 = vld [vmem:[#allocation2 + $0xa8] sm:$0xf]  ;;  %v4353_v21 = vld [vmem:[#allocation2 + $0xb4] sm:$0xf0]  ;;  %v4038_v24 = vor.u32 %v4351_v11, %v4035_v12 }
 0x686   :  { %2784 = vmatpush.bf16.msra.mxu2 %v4066_v49  ;;  %v4062_v22 = vor.u32 %v4358_v14, %v4059_v15  ;;  %v4057_v23 = vld [vmem:[#allocation2 + $0xe0] sm:$0xf]  ;;  %v4347_v25 = vld [vmem:[#allocation2 + $0x8c] sm:$0xf]  ;;  %v4360_v48 = vld [vmem:[#allocation2 + $0xec] sm:$0xf0]  ;;  %v4034_v27 = vor.u32 %v4353_v21, %v4033_v20 }
 0x687   :  { %v4019_v47 = vld [vmem:[#allocation2 + $0x98] sm:$0xf0]  ;;  %v4058_v3 = vor.u32 %v4360_v48, %v4057_v23  ;;  %v4354_v2 = vld [vmem:[#allocation2 + $0xc4] sm:$0xf]  ;;  %v4043_v26 = vld [vmem:[#allocation2 + $0xd0] sm:$0xf0] }
 0x688   :  { %2798 = vmatpush.bf16.msra.mxu3 %v4054_v32  ;;  %2771 = vmatpush.bf16.msra.mxu1 %v4062_v22  ;;  %v4046_v28 = vor.u32 %v4354_v2, %v4043_v26  ;;  %v4041_v29 = vld [vmem:[#allocation2 + $0xc0] sm:$0xf]  ;;  %v4356_v30 = vld [vmem:[#allocation2 + $0xcc] sm:$0xf0]  ;;  %v4017_v31 = vld [vmem:[#allocation2 + $0x88] sm:$0xf]  ;;  %v4022_v39 = vor.u32 %v4347_v25, %v4019_v47 }
 0x689   :  { %2758 = vmatpush.bf16.msra.mxu0 %v4058_v3  ;;  %v4349_v36 = vld [vmem:[#allocation2 + $0x94] sm:$0xf0]  ;;  %v4042_v37 = vor.u32 %v4356_v30, %v4041_v29  ;;  %v4350_v38 = vld [vmem:[#allocation2 + $0xa4] sm:$0xf]  ;;  %v4343_v40 = vld [vmem:[#allocation2 + $0x6c] sm:$0xf]  ;;  %v2556_v29 = vpack.c.bf16 %v5018_v62, %v5018_v62 }
 0x68a   :  { %2785 = vmatpush.bf16.msra.mxu2 %v4050_v13  ;;  %v4027_v0 = vld [vmem:[#allocation2 + $0xb0] sm:$0xf0]  ;;  %v4003_v63 = vld [vmem:[#allocation2 + $0x78] sm:$0xf0]  ;;  %v4025_v18 = vld [vmem:[#allocation2 + $0xa0] sm:$0xf]  ;;  %v4018_v42 = vor.u32 %v4349_v36, %v4017_v31 }
 0x68b   :  { %v4030_v19 = vor.u32 %v4350_v38, %v4027_v0  ;;  %v4352_v41 = vld [vmem:[#allocation2 + $0xac] sm:$0xf0]  ;;  %v4346_v43 = vld [vmem:[#allocation2 + $0x84] sm:$0xf]  ;;  %v4011_v44 = vld [vmem:[#allocation2 + $0x90] sm:$0xf0]  ;;  %v4006_v52 = vor.u32 %v4343_v40, %v4003_v63 }
 0x68c   :  { %2799 = vmatpush.bf16.msra.mxu3 %v4038_v24  ;;  %2772 = vmatpush.bf16.msra.mxu1 %v4046_v28  ;;  %v4001_v45 = vld [vmem:[#allocation2 + $0x68] sm:$0xf]  ;;  %v4345_v46 = vld [vmem:[#allocation2 + $0x74] sm:$0xf0]  ;;  %v4026_v51 = vor.u32 %v4352_v41, %v4025_v18  ;;  %v4009_v53 = vld [vmem:[#allocation2 + $0x80] sm:$0xf]  ;;  %v4014_v16 = vor.u32 %v4346_v43, %v4011_v44 }
 0x68d   :  { %2759 = vmatpush.bf16.msra.mxu0 %v4042_v37  ;;  %v4348_v54 = vld [vmem:[#allocation2 + $0x8c] sm:$0xf0]  ;;  %v4339_v55 = vld [vmem:[#allocation2 + $0x4c] sm:$0xf]  ;;  %v3987_v17 = vld [vmem:[#allocation2 + $0x58] sm:$0xf0]  ;;  %v4002_v35 = vor.u32 %v4345_v46, %v4001_v45 }
 0x68e   :  { %2786 = vmatpush.bf16.msra.mxu2 %v4034_v27  ;;  %v4342_v34 = vld [vmem:[#allocation2 + $0x64] sm:$0xf]  ;;  %v3995_v56 = vld [vmem:[#allocation2 + $0x70] sm:$0xf0]  ;;  %v3985_v57 = vld [vmem:[#allocation2 + $0x48] sm:$0xf]  ;;  %v4010_v59 = vor.u32 %v4348_v54, %v4009_v53  ;;  %v3990_v60 = vor.u32 %v4339_v55, %v3987_v17 }
 0x68f   :  { %v4341_v58 = vld [vmem:[#allocation2 + $0x54] sm:$0xf0]  ;;  %v3993_v61 = vld [vmem:[#allocation2 + $0x60] sm:$0xf]  ;;  %v4344_v4 = vld [vmem:[#allocation2 + $0x6c] sm:$0xf0]  ;;  %v3998_v7 = vor.u32 %v4342_v34, %v3995_v56  ;;  %v2810_v34 = vstv %s4997_s16 }
 0x690   :  { %2800 = vmatpush.bf16.msra.mxu3 %v4022_v39  ;;  %2773 = vmatpush.bf16.msra.mxu1 %v4030_v19  ;;  %v4335_v5 = vld [vmem:[#allocation2 + $0x2c] sm:$0xf]  ;;  %v3971_v6 = vld [vmem:[#allocation2 + $0x38] sm:$0xf0]  ;;  %v3986_v8 = vor.u32 %v4341_v58, %v3985_v57  ;;  %v4338_v9 = vld [vmem:[#allocation2 + $0x44] sm:$0xf]  ;;  %v3994_v1 = vor.u32 %v4344_v4, %v3993_v61  ;;  %v2818_v61 = vstv %s5001_s20 }
 0x691   :  { %2760 = vmatpush.bf16.msra.mxu0 %v4026_v51  ;;  %v3979_v33 = vld [vmem:[#allocation2 + $0x50] sm:$0xf0]  ;;  %v3969_v32 = vld [vmem:[#allocation2 + $0x28] sm:$0xf]  ;;  %v4337_v49 = vld [vmem:[#allocation2 + $0x34] sm:$0xf0]  ;;  %v3974_v10 = vor.u32 %v4335_v5, %v3971_v6 }
 0x692   :  { %2787 = vmatpush.bf16.msra.mxu2 %v4018_v42  ;;  %v3977_v11 = vld [vmem:[#allocation2 + $0x40] sm:$0xf]  ;;  %v4340_v12 = vld [vmem:[#allocation2 + $0x4c] sm:$0xf0]  ;;  %v4331_v13 = vld [vmem:[#allocation2 + $0xc] sm:$0xf]  ;;  %v3982_v15 = vor.u32 %v4338_v9, %v3979_v33  ;;  %v3970_v20 = vor.u32 %v4337_v49, %v3969_v32  ;;  %v2840_v32 = vstv %s5003_s21 }
 0x693   :  { %v3955_v14 = vld [vmem:[#allocation2 + $0x18] sm:$0xf0]  ;;  %v4334_v21 = vld [vmem:[#allocation2 + $0x24] sm:$0xf]  ;;  %v3963_v22 = vld [vmem:[#allocation2 + $0x30] sm:$0xf0]  ;;  %v3978_v25 = vor.u32 %v4340_v12, %v3977_v11 }
 0x694   :  { %2801 = vmatpush.bf16.msra.mxu3 %v4006_v52  ;;  %2774 = vmatpush.bf16.msra.mxu1 %v4014_v16  ;;  %v3953_v23 = vld [vmem:[#allocation2 + $0x8] sm:$0xf]  ;;  %v4333_v24 = vld [vmem:[#allocation2 + $0x14] sm:$0xf0]  ;;  %v3958_v48 = vor.u32 %v4331_v13, %v3955_v14  ;;  %v3961_v47 = vld [vmem:[#allocation2 + $0x20] sm:$0xf]  ;;  %v3966_v2 = vor.u32 %v4334_v21, %v3963_v22 }
 0x695   :  { %2761 = vmatpush.bf16.msra.mxu0 %v4010_v59  ;;  %v4336_v3 = vld [vmem:[#allocation2 + $0x2c] sm:$0xf0]  ;;  %v3954_v26 = vor.u32 %v4333_v24, %v3953_v23  ;;  %v4330_v27 = vld [vmem:[#allocation2 + $0x4] sm:$0xf]  ;;  %v3947_v28 = vld [vmem:[#allocation2 + $0x10] sm:$0xf0] }
 0x696   :  { %2788 = vmatpush.bf16.msra.mxu2 %v4002_v35  ;;  %v3962_v30 = vor.u32 %v4336_v3, %v3961_v47  ;;  %v3945_v31 = vld [vmem:[#allocation2] sm:$0xf]  ;;  %v4332_v36 = vld [vmem:[#allocation2 + $0xc] sm:$0xf0]  ;;  %v3950_v37 = vor.u32 %v4330_v27, %v3947_v28  ;;  %v2593_v39 = vperm.slane %v5006_v50, 3  ;;  %v2592_v43 = vperm.slane %v5006_v50, 2 }
 0x697   :  { %v3946_v38 = vor.u32 %v4332_v36, %v3945_v31  ;;  %v2591_v44 = vperm.slane %v5006_v50, 1  ;;  %v2590_v55 = vperm.slane %v5006_v50, 0  ;;  %v2814_v35 = vstv %s4999_s18  ;;  %s4757_s3 = smov [#allocation11]   ;;  %s2851_s24 = sshll.u32 %s5037_s4, 4  ;;  %s2852_s24 = int_to_ptr.hbm [resolvable:$true] %s2851_s24 }
 0x698   :  { %2802 = vmatpush.bf16.msra.mxu3 %v3990_v60  ;;  %2775 = vmatpush.bf16.msra.mxu1 %v3998_v7  ;;  %s2849_s6 = sshll.u32 %s4757_s3, 4  ;;  %s2850_s6 = int_to_ptr.vmem [resolvable:$true] %s2849_s6 }
 0x699   :  { %2762 = vmatpush.bf16.msra.mxu0 %v3994_v1 }
 0x69a   :  { %2789 = vmatpush.bf16.msra.mxu2 %v3986_v8 }
 0x69c   :  { %2803 = vmatpush.bf16.msra.mxu3 %v3974_v10  ;;  %2776 = vmatpush.bf16.msra.mxu1 %v3982_v15 }
 0x69d   :  { %2763 = vmatpush.bf16.msra.mxu0 %v3978_v25 }
 0x69e   :  { %2790 = vmatpush.bf16.msra.mxu2 %v3970_v20 }
 0x6a0   :  { %2804 = vmatpush.bf16.msra.mxu3 %v3958_v48  ;;  %2777 = vmatpush.bf16.msra.mxu1 %v3966_v2 }
 0x6a1   :  { %2764 = vmatpush.bf16.msra.mxu0 %v3962_v30 }
 0x6a2   :  { %2791 = vmatpush.bf16.msra.mxu2 %v3954_v26 }
 0x6a3   :  { %2805 = vmatmul.bf16.vlgmr.msra.gmra.mxu3 %v2556_v29 }
 0x6a4   :  { %2778 = vmatpush.bf16.msra.mxu1 %v3950_v37 }
 0x6a5   :  { %2792 = vmatmul.bf16.vlgmr.msra.gmra.mxu2 %v2556_v29  ;;  %2765 = vmatpush.bf16.msra.mxu0 %v3946_v38 }
 0x6a7   :  { %2779 = vmatmul.bf16.vlgmr.msra.gmra.mxu1 %v2556_v29 }
 0x6a8   :  { %2766 = vmatmul.bf16.vlgmr.msra.gmra.mxu0 %v2556_v29 }
 0x724   :  { %v2780_v40 = vpop.f32.mrf.mxu1 }
 0x725   :  { %v2767_v63 = vpop.f32.mrf.mxu0  ;;  %v2781_v54 = vadd.f32 %v2780_v40, %v2591_v44 }
 0x726   :  { %v2806_v62 = vpop.f32.mrf.mxu3  ;;  %v2768_v16 = vadd.f32 %v2767_v63, %v2590_v55 }
 0x727   :  { %v2807_v0 = vadd.f32 %v2806_v62, %v2593_v39  ;;  %v2813_v17 = vmax.f32 %v2781_v54, 0.0 }
 0x728   :  { %v2793_v19 = vpop.f32.mrf.mxu2  ;;  %v2811_v58 = vmul.f32 %v2810_v34, %v2768_v16 }
 0x729   :  { %v4071_v18 = vmul.f32 -1.442695, %v2807_v0  ;;  %v2794_v53 = vadd.f32 %v2793_v19, %v2592_v43  ;;  %v2815_v57 = vmul.f32 %v2814_v35, %v2813_v17 }
 0x72b   :  { %4418 = vpow2.f32 %v4071_v18  ;;  %v2816_v5 = vadd.f32 %v2815_v57, %v2811_v58 }
 0x72c   :  { %v2782_v41 = vpop.f32.mrf.mxu1 }
 0x72d   :  { %v2769_v45 = vpop.f32.mrf.mxu0 }
 0x72e   :  { %v2808_v42 = vpop.f32.mrf.mxu3 }
 0x730   :  { %v2795_v46 = vpop.f32.mrf.mxu2 }
 0x731   :  { %v4419_v51 = vpop.eup %4418 }
 0x732   :  { %v2824_v52 = vadd.f32 1.0, %v4419_v51 }
 0x734   :  { %4420 = vrcp.f32 %v2824_v52  ;;  %v2836_v6 = vand.u32 2147483648, %v2824_v52  ;;  %v2834_v50 = vand.u32 2147483647, %v2824_v52  ;;  %vm2830_vm1 = vweird.f32 %v2824_v52 }
 0x735   :  { %4422 = vtanh.f32 %v2794_v53 }
 0x736   :  { %v2837_v33 = vor.u32 1.1754944e-38, %v2836_v6  ;;  %vm2835_vm3 = vcmp.eq.f32.partialorder %v2834_v50, 8.507059e+37 }
 0x73a   :  { %v4421_v56 = vpop.eup %4420 }
 0x73b   :  { %v2826_v59 = vmul.f32 %v4421_v56, %v2824_v52  ;;  %v4423_v60 = vpop.eup %4422  ;;  %vm2831_vm0 = vweird.f32 %v4421_v56 }
 0x73c   :  { %v2819_v7 = vmul.f32 %v4423_v60, %v2818_v61  ;;  %vm2832_vm2 = vmor %vm2830_vm1, %vm2831_vm0 }
 0x73d   :  { %v2827_v4 = vsub.f32 1.0, %v2826_v59 }
 0x73e   :  { %v2820_v49 = vadd.f32 %v2819_v7, %v2816_v5 }
 0x73f   :  { %v2828_v8 = vmul.f32 %v4421_v56, %v2827_v4 }
 0x741   :  { %v2829_v9 = vadd.f32 %v4421_v56, %v2828_v8 }
 0x743   :  { %v2833_v1 = vsel %vm2832_vm2, %v4421_v56, %v2829_v9 }
 0x744   :  { %v2838_v10 = vsel %vm2835_vm3, %v2837_v33, %v2833_v1 }
 0x745   :  { %v2841_v11 = vmul.f32 %v2840_v32, %v2838_v10 }
 0x747   :  { %v2842_v12 = vadd.f32 %v2841_v11, %v2820_v49 }
 0x749   :  { %2843 = vst [vmem:[#allocation11] sm:$0xff] %v2842_v12 }
 0x74a   :  { %2854 = dma.vmem_to_hbm [thread:$0]  %s2850_s6, 128, %s2852_s24, [#allocation6]  }
 0x74b   :  { %4748 = dma.done.wait [#allocation6], 128  }
 0x74c   :  { %4749 = vsyncadd [#allocation6], 4294967168 }
 0x74d   :  { %2859 = vsyncpa [#allocation5], 1 }
 0x74e   :  { %2860 = vsyncpa [#allocation10], 1 }
 0x74f   :  { %2861 = vsyncpa [#allocation6], 1 }
 0x750   :  { %2862 = vsyncpa [#allocation7], 1 }
 0x751   :  { %2863 = vsyncmov [#allocation3] }
 0x754   :  { %s2864_s25 = vpop.sfrf %2863 }
 0x755   :  { %p4072_p0 = scmp.ne.s32.totalorder %s2864_s25, 0 }
 0x757   :  { %2868 = shalt.err (%p4072_p0)  }
 0x758   :  { %2870 = vsyncmov [#allocation3 + $0x1] }
 0x75b   :  { %s2871_s26 = vpop.sfrf %2870 }
 0x75c   :  { %p4073_p1 = scmp.ne.s32.totalorder %s2871_s26, 0 }
 0x75e   :  { %2875 = shalt.err (%p4073_p1)  }

</bundles_post_ra>
